<compile_context>
chip_gen: v7x
topology: tpu7x:2x2x1
jax: 0.10.0
libtpu: 0.0.40
codegen_flags: <defaults>
</compile_context>

<pallas_src>
import functools

import jax
import jax.numpy as jnp
from jax.experimental import pallas as pl
from jax.experimental.pallas import tpu as pltpu


_GP = 128     # per-gate lane padding (hidden width carried inside the kernel)
_OPAD = 128   # lane-dense output width; sliced back to out_channels outside


# ----------------------------------------------------------------------------
# Kernel: whole GRU stack + final linear, single invocation (no grid).
# ----------------------------------------------------------------------------
def _gru_kernel(x_ref, *refs, num_layers, seq_len):
    # refs = [w_ih_0, w_hh_0, b_i_0, b_hn_0, ..., lin_w, lin_b, o_ref, gi_ref, seq_ref]
    gi_ref = refs[-2]             # VMEM scratch (S*NP, 3*GP) f32: fused input projection
    seq_ref = refs[-1]            # VMEM scratch (S*NP, GP)   f32: layer l -> l+1 sequence
    o_ref = refs[-3]              # (NP, OPAD) lane-dense f32 output
    lin_b_ref = refs[-4]          # (1, OPAD) f32
    lin_w_ref = refs[-5]          # (L, GP, OPAD) f32
    layer_refs = refs[:-5]        # 4 refs per layer

    S = seq_len
    GP = _GP
    G2, G3 = 2 * GP, 3 * GP
    NP = o_ref.shape[0]           # padded batch (multiple of 8 sublanes)

    inp2 = x_ref[...]             # (S*NP, Cin) bf16, time-major rows (row = t*NP + b)
    finals = []
    for l in range(num_layers):
        w_ih = layer_refs[4 * l + 0][...]   # (Din, 3*GP) bf16, gate g at lanes [g*GP, g*GP+H)
        w_hh = layer_refs[4 * l + 1][...]   # (GP, 3*GP)  bf16
        b_i = layer_refs[4 * l + 2][...]    # (1, 3*GP)   f32  (b_ih with b_hr/b_hz folded in)
        b_hn = layer_refs[4 * l + 3][...]   # (1, GP)     f32  (b_hn only)

        # Fused input projection for every timestep & batch row: one MXU push per layer.
        gi_ref[...] = jnp.dot(inp2, w_ih, preferred_element_type=jnp.float32) + b_i

        h = jnp.zeros((NP, GP), jnp.float32)
        for t in range(S):                               # unrolled serial recurrence
            git = gi_ref[t * NP:(t + 1) * NP, :]         # (NP, 3*GP) whole-tile view
            gh = jnp.dot(h.astype(jnp.bfloat16), w_hh,
                         preferred_element_type=jnp.float32)        # (NP, 3*GP)
            rz = jax.nn.sigmoid(git[:, :G2] + gh[:, :G2])           # fused r|z, one EUP block
            r = rz[:, :GP]
            z = rz[:, GP:]
            n = jnp.tanh(git[:, G2:] + r * (gh[:, G2:] + b_hn))
            h = n + z * (h - n)
            if l < num_layers - 1:                       # last layer: only final h needed
                seq_ref[t * NP:(t + 1) * NP, :] = h      # aligned full-tile store
        finals.append(h)
        if l < num_layers - 1:
            inp2 = seq_ref[...].astype(jnp.bfloat16)     # (S*NP, GP) stays in VMEM

    # Final linear on concat of per-layer final hidden states, as a sum of per-layer
    # matmuls (no lane-axis concatenate). Output is lane-dense -> unmasked stores.
    acc = jnp.zeros((NP, o_ref.shape[-1]), jnp.float32)
    for l in range(num_layers):
        acc = acc + jnp.dot(finals[l], lin_w_ref[l],
                            preferred_element_type=jnp.float32)
    o_ref[...] = acc + lin_b_ref[...]


# ----------------------------------------------------------------------------
# One-time parameter packing: gate-aligned, zero-padded, bf16 MXU operands.
# ----------------------------------------------------------------------------
def prepare_padded_params(params, in_channels):
    L = len(params["layers"])
    H = params["layers"][0]["w_hh_T"].shape[0]
    O = params["lin_w_T"].shape[1]
    GP = _GP

    layers = []
    for l, lp in enumerate(params["layers"]):
        din = lp["w_ih_T"].shape[0]                      # Cin for layer 0, H otherwise
        din_pad = din if l == 0 else GP                  # layers >0 consume GP-wide h
        w_ih = jnp.zeros((din_pad, 3 * GP), jnp.float32)
        w_hh = jnp.zeros((GP, 3 * GP), jnp.float32)
        for g in range(3):
            w_ih = w_ih.at[:din, g * GP:g * GP + H].set(lp["w_ih_T"][:, g * H:(g + 1) * H])
            w_hh = w_hh.at[:H, g * GP:g * GP + H].set(lp["w_hh_T"][:, g * H:(g + 1) * H])
        # Fold b_hr / b_hz into the batched projection bias; keep b_hn separate
        # (it must sit inside r * (gh_n + b_hn)).
        b_i = jnp.zeros((1, 3 * GP), jnp.float32)
        b_i = b_i.at[:, 0 * GP:0 * GP + H].set(lp["b_ih"][:, 0:H] + lp["b_hh"][:, 0:H])
        b_i = b_i.at[:, 1 * GP:1 * GP + H].set(lp["b_ih"][:, H:2 * H] + lp["b_hh"][:, H:2 * H])
        b_i = b_i.at[:, 2 * GP:2 * GP + H].set(lp["b_ih"][:, 2 * H:3 * H])
        b_hn = jnp.zeros((1, GP), jnp.float32).at[:, :H].set(lp["b_hh"][:, 2 * H:3 * H])
        layers.append(dict(
            w_ih=w_ih.astype(jnp.bfloat16),
            w_hh=w_hh.astype(jnp.bfloat16),
            b_i=b_i,
            b_hn=b_hn,
        ))

    lin_w = jnp.zeros((L, GP, _OPAD), jnp.float32)
    lin_w = lin_w.at[:, :H, :O].set(params["lin_w_T"].reshape(L, H, O))
    lin_b = jnp.zeros((1, _OPAD), jnp.float32).at[:, :O].set(params["lin_b"])
    return dict(layers=layers, lin_w=lin_w, lin_b=lin_b, L=L, H=H, O=O)


# ----------------------------------------------------------------------------
# Wrapper (pallas_call plumbing). Mirrors GRU.forward.
# ----------------------------------------------------------------------------
def gru_forward(signatures, padded, out_channels):
    """signatures: list of length 1 containing S arrays of shape (N, in_channels).
    Returns: (N, out_channels), matching the PyTorch module."""
    assert len(signatures) == 1
    sigs = signatures[0]
    x = jnp.stack(sigs, axis=1)                          # (N, S, Cin) batch_first
    N, S, Cin = x.shape
    L = padded["L"]
    GP, OPAD = _GP, _OPAD
    O = out_channels
    NP = max(8, ((N + 7) // 8) * 8)                      # batch padded to 8 sublanes

    # Time-major rows (row = t*NP + b), batch zero-padded, bf16 MXU operand.
    xt = jnp.zeros((S, NP, Cin), jnp.float32).at[:, :N, :].set(jnp.transpose(x, (1, 0, 2)))
    x2d = xt.reshape(S * NP, Cin).astype(jnp.bfloat16)

    flat_inputs = [x2d]
    for lp in padded["layers"]:
        flat_inputs += [lp["w_ih"], lp["w_hh"], lp["b_i"], lp["b_hn"]]
    flat_inputs += [padded["lin_w"], padded["lin_b"]]

    vmem = pl.BlockSpec(memory_space=pltpu.MemorySpace.VMEM)
    kernel = functools.partial(_gru_kernel, num_layers=L, seq_len=S)

    # Advisory cost estimate (matmul flops + transcendentals + HBM traffic).
    flops = 2 * S * NP * Cin * 3 * GP
    flops += (L - 1) * 2 * S * NP * GP * 3 * GP
    flops += L * S * 2 * NP * GP * 3 * GP
    flops += L * 2 * NP * GP * OPAD
    transcendentals = L * S * NP * 3 * GP
    bytes_accessed = sum(int(a.size) * a.dtype.itemsize for a in flat_inputs) + NP * OPAD * 4

    out_pad = pl.pallas_call(
        kernel,
        out_shape=jax.ShapeDtypeStruct((NP, OPAD), jnp.float32),
        in_specs=[vmem] * len(flat_inputs),
        out_specs=vmem,
        scratch_shapes=[pltpu.VMEM((S * NP, 3 * GP), jnp.float32),
                        pltpu.VMEM((S * NP, GP), jnp.float32)],
        compiler_params=pltpu.CompilerParams(vmem_limit_bytes=32 * 1024 * 1024),
        cost_estimate=pl.CostEstimate(flops=flops,
                                      transcendentals=transcendentals,
                                      bytes_accessed=bytes_accessed),
    )(*flat_inputs)

    return out_pad[:N, :O]                               # (N, out_channels)


# ----------------------------------------------------------------------------
# Pure-JAX reference (matches torch.nn.GRU + nn.Linear semantics)
# ----------------------------------------------------------------------------
def gru_reference(x, params):                            # x: (N, S, Cin)
    N, S, _ = x.shape
    hp = jax.lax.Precision.HIGHEST
    inp = x
    h_layers = []
    for lp in params["layers"]:
        w_ih_T, w_hh_T = lp["w_ih_T"], lp["w_hh_T"]
        b_ih, b_hh = lp["b_ih"], lp["b_hh"]
        H = w_hh_T.shape[0]
        h = jnp.zeros((N, H), jnp.float32)
        outs = []
        for t in range(S):
            gi = jnp.dot(inp[:, t, :], w_ih_T, precision=hp) + b_ih
            gh = jnp.dot(h, w_hh_T, precision=hp) + b_hh
            r = jax.nn.sigmoid(gi[:, 0:H] + gh[:, 0:H])
            z = jax.nn.sigmoid(gi[:, H:2 * H] + gh[:, H:2 * H])
            n = jnp.tanh(gi[:, 2 * H:3 * H] + r * gh[:, 2 * H:3 * H])
            h = (1.0 - z) * n + z * h
            outs.append(h)
        inp = jnp.stack(outs, axis=1)
        h_layers.append(h)
    hidden = jnp.concatenate(h_layers, axis=-1)          # (N, L*H)
    return jnp.dot(hidden, params["lin_w_T"], precision=hp) + params["lin_b"]


# ----------------------------------------------------------------------------
# Deterministic parameter construction (synthetic, PyTorch-style uniform init)
# ----------------------------------------------------------------------------
def init_params(key, in_channels, hidden_channels, out_channels, num_layers):
    H = hidden_channels
    k = 1.0 / (H ** 0.5)

    def u(kk, shape, bound):
        return jax.random.uniform(kk, shape, jnp.float32, -bound, bound)

    layers = []
    for l in range(num_layers):
        din = in_channels if l == 0 else H
        ks = jax.random.split(jax.random.fold_in(key, l), 4)
        layers.append(dict(
            w_ih_T=u(ks[0], (din, 3 * H), k),            # weight_ih_l{l}.T  [r|z|n]
            w_hh_T=u(ks[1], (H, 3 * H), k),              # weight_hh_l{l}.T
            b_ih=u(ks[2], (1, 3 * H), k),
            b_hh=u(ks[3], (1, 3 * H), k),
        ))
    total = num_layers * H
    kb = 1.0 / (total ** 0.5)
    k1, k2 = jax.random.split(jax.random.fold_in(key, 1000))
    return dict(
        layers=layers,
        lin_w_T=u(k1, (total, out_channels), kb),        # linear.weight.T
        lin_b=u(k2, (1, out_channels), kb),
    )


# ----------------------------------------------------------------------------
if __name__ == "__main__":
    in_channels = 4
    hidden_channels = 32
    out_channels = 4
    num_layers = 2
    N, S = 2, 8          # batch, sequence length (number of stacked signatures)

    key = jax.random.PRNGKey(0)
    params = init_params(key, in_channels, hidden_channels, out_channels, num_layers)
    padded = prepare_padded_params(params, in_channels)   # one-time packing (not per call)

    sig_keys = jax.random.split(jax.random.fold_in(key, 7), S)
    signatures = [[jax.random.normal(sig_keys[t], (N, in_channels), jnp.float32)
                   for t in range(S)]]

    out = gru_forward(signatures, padded, out_channels)
    out = jax.block_until_ready(out)
    assert out.shape == (N, out_channels), out.shape

    ref = gru_reference(jnp.stack(signatures[0], axis=1), params)
    # bf16 MXU operands with f32 accumulation -> slightly looser tolerance than pure f32.
    assert jnp.allclose(out, ref, atol=2e-2, rtol=2e-2), (out, ref)

    print("KERNEL_OK")
</pallas_src>

<mosaic_0001>
module attributes {stable_mosaic.version = 11 : i64} {
  func.func @_gru_kernel(%arg0: memref<64x4xbf16, #tpu.memory_space<vmem>>, %arg1: memref<4x384xbf16, #tpu.memory_space<vmem>>, %arg2: memref<128x384xbf16, #tpu.memory_space<vmem>>, %arg3: memref<1x384xf32, #tpu.memory_space<vmem>>, %arg4: memref<1x128xf32, #tpu.memory_space<vmem>>, %arg5: memref<128x384xbf16, #tpu.memory_space<vmem>>, %arg6: memref<128x384xbf16, #tpu.memory_space<vmem>>, %arg7: memref<1x384xf32, #tpu.memory_space<vmem>>, %arg8: memref<1x128xf32, #tpu.memory_space<vmem>>, %arg9: memref<2x128x128xf32, #tpu.memory_space<vmem>>, %arg10: memref<1x128xf32, #tpu.memory_space<vmem>>, %arg11: memref<8x128xf32, #tpu.memory_space<vmem>>, %arg12: memref<64x384xf32, #tpu.memory_space<vmem>>, %arg13: memref<64x128xf32, #tpu.memory_space<vmem>>) attributes {dimension_semantics = [], scalar_prefetch = 0 : i64, scratch_operands = 2 : i64, tpu.core_type = #tpu.core_type<tc>} {
    %c0 = arith.constant 0 : index
    %c0_0 = arith.constant 0 : index
    %0 = vector.load %arg0[%c0, %c0_0] : memref<64x4xbf16, #tpu.memory_space<vmem>>, vector<64x4xbf16>
    %c0_1 = arith.constant 0 : index
    %c0_2 = arith.constant 0 : index
    %1 = vector.load %arg1[%c0_1, %c0_2] : memref<4x384xbf16, #tpu.memory_space<vmem>>, vector<4x384xbf16>
    %c0_3 = arith.constant 0 : index
    %c0_4 = arith.constant 0 : index
    %2 = vector.load %arg2[%c0_3, %c0_4] : memref<128x384xbf16, #tpu.memory_space<vmem>>, vector<128x384xbf16>
    %c0_5 = arith.constant 0 : index
    %c0_6 = arith.constant 0 : index
    %3 = vector.load %arg3[%c0_5, %c0_6] : memref<1x384xf32, #tpu.memory_space<vmem>>, vector<1x384xf32>
    %c0_7 = arith.constant 0 : index
    %c0_8 = arith.constant 0 : index
    %4 = vector.load %arg4[%c0_7, %c0_8] : memref<1x128xf32, #tpu.memory_space<vmem>>, vector<1x128xf32>
    %cst = arith.constant dense<0.000000e+00> : vector<64x384xf32>
    %5 = tpu.matmul %0, %1, %cst {dimension_numbers = #tpu.dot_dimension_numbers<[1], [0], [0], [1], [0, 0, 1, 1], [], []>} : vector<64x4xbf16>, vector<4x384xbf16>, vector<64x384xf32> -> vector<64x384xf32>
    %6 = vector.broadcast %3 : vector<1x384xf32> to vector<64x384xf32>
    %7 = arith.addf %5, %6 : vector<64x384xf32>
    %c0_9 = arith.constant 0 : index
    %c0_10 = arith.constant 0 : index
    %8 = vector.load %arg12[%c0_9, %c0_10] : memref<64x384xf32, #tpu.memory_space<vmem>>, vector<64x384xf32>
    tpu.vector_store %arg12[%c0_9, %c0_10], %7 {strides = array<i32>} : memref<64x384xf32, #tpu.memory_space<vmem>>, vector<64x384xf32>,
    %cst_11 = arith.constant 0.000000e+00 : f32
    %9 = vector.broadcast %cst_11 : f32 to vector<8x128xf32>
    %c0_12 = arith.constant 0 : index
    %c0_13 = arith.constant 0 : index
    %10 = vector.load %arg12[%c0_12, %c0_13] : memref<64x384xf32, #tpu.memory_space<vmem>>, vector<8x384xf32>
    %11 = arith.truncf %9 : vector<8x128xf32> to vector<8x128xbf16>
    %cst_14 = arith.constant dense<0.000000e+00> : vector<8x384xf32>
    %12 = tpu.matmul %11, %2, %cst_14 {dimension_numbers = #tpu.dot_dimension_numbers<[1], [0], [0], [1], [0, 0, 1, 1], [], []>} : vector<8x128xbf16>, vector<128x384xbf16>, vector<8x384xf32> -> vector<8x384xf32>
    %13 = vector.extract_strided_slice %10 {offsets = [0, 0], sizes = [8, 256], strides = [1, 1]} : vector<8x384xf32> to vector<8x256xf32>
    %14 = vector.extract_strided_slice %12 {offsets = [0, 0], sizes = [8, 256], strides = [1, 1]} : vector<8x384xf32> to vector<8x256xf32>
    %15 = arith.addf %13, %14 : vector<8x256xf32>
    %16 = arith.negf %15 : vector<8x256xf32>
    %17 = math.exp %16 : vector<8x256xf32>
    %cst_15 = arith.constant 1.000000e+00 : f32
    %18 = vector.broadcast %cst_15 : f32 to vector<8x256xf32>
    %19 = arith.addf %18, %17 : vector<8x256xf32>
    %20 = arith.divf %18, %19 : vector<8x256xf32>
    %21 = vector.extract_strided_slice %20 {offsets = [0, 0], sizes = [8, 128], strides = [1, 1]} : vector<8x256xf32> to vector<8x128xf32>
    %22 = vector.extract_strided_slice %20 {offsets = [0, 128], sizes = [8, 128], strides = [1, 1]} : vector<8x256xf32> to vector<8x128xf32>
    %23 = vector.extract_strided_slice %10 {offsets = [0, 256], sizes = [8, 128], strides = [1, 1]} : vector<8x384xf32> to vector<8x128xf32>
    %24 = vector.extract_strided_slice %12 {offsets = [0, 256], sizes = [8, 128], strides = [1, 1]} : vector<8x384xf32> to vector<8x128xf32>
    %25 = vector.broadcast %4 : vector<1x128xf32> to vector<8x128xf32>
    %26 = arith.addf %24, %25 : vector<8x128xf32>
    %27 = arith.mulf %21, %26 : vector<8x128xf32>
    %28 = arith.addf %23, %27 : vector<8x128xf32>
    %29 = math.tanh %28 : vector<8x128xf32>
    %30 = arith.subf %9, %29 : vector<8x128xf32>
    %31 = arith.mulf %22, %30 : vector<8x128xf32>
    %32 = arith.addf %29, %31 : vector<8x128xf32>
    %c0_16 = arith.constant 0 : index
    %c0_17 = arith.constant 0 : index
    %33 = vector.load %arg13[%c0_16, %c0_17] : memref<64x128xf32, #tpu.memory_space<vmem>>, vector<8x128xf32>
    tpu.vector_store %arg13[%c0_16, %c0_17], %32 {strides = array<i32>} : memref<64x128xf32, #tpu.memory_space<vmem>>, vector<8x128xf32>,
    %c8 = arith.constant 8 : index
    %c0_18 = arith.constant 0 : index
    %34 = vector.load %arg12[%c8, %c0_18] : memref<64x384xf32, #tpu.memory_space<vmem>>, vector<8x384xf32>
    %35 = arith.truncf %32 : vector<8x128xf32> to vector<8x128xbf16>
    %cst_19 = arith.constant dense<0.000000e+00> : vector<8x384xf32>
    %36 = tpu.matmul %35, %2, %cst_19 {dimension_numbers = #tpu.dot_dimension_numbers<[1], [0], [0], [1], [0, 0, 1, 1], [], []>} : vector<8x128xbf16>, vector<128x384xbf16>, vector<8x384xf32> -> vector<8x384xf32>
    %37 = vector.extract_strided_slice %34 {offsets = [0, 0], sizes = [8, 256], strides = [1, 1]} : vector<8x384xf32> to vector<8x256xf32>
    %38 = vector.extract_strided_slice %36 {offsets = [0, 0], sizes = [8, 256], strides = [1, 1]} : vector<8x384xf32> to vector<8x256xf32>
    %39 = arith.addf %37, %38 : vector<8x256xf32>
    %40 = arith.negf %39 : vector<8x256xf32>
    %41 = math.exp %40 : vector<8x256xf32>
    %cst_20 = arith.constant 1.000000e+00 : f32
    %42 = vector.broadcast %cst_20 : f32 to vector<8x256xf32>
    %43 = arith.addf %42, %41 : vector<8x256xf32>
    %44 = arith.divf %42, %43 : vector<8x256xf32>
    %45 = vector.extract_strided_slice %44 {offsets = [0, 0], sizes = [8, 128], strides = [1, 1]} : vector<8x256xf32> to vector<8x128xf32>
    %46 = vector.extract_strided_slice %44 {offsets = [0, 128], sizes = [8, 128], strides = [1, 1]} : vector<8x256xf32> to vector<8x128xf32>
    %47 = vector.extract_strided_slice %34 {offsets = [0, 256], sizes = [8, 128], strides = [1, 1]} : vector<8x384xf32> to vector<8x128xf32>
    %48 = vector.extract_strided_slice %36 {offsets = [0, 256], sizes = [8, 128], strides = [1, 1]} : vector<8x384xf32> to vector<8x128xf32>
    %49 = vector.broadcast %4 : vector<1x128xf32> to vector<8x128xf32>
    %50 = arith.addf %48, %49 : vector<8x128xf32>
    %51 = arith.mulf %45, %50 : vector<8x128xf32>
    %52 = arith.addf %47, %51 : vector<8x128xf32>
    %53 = math.tanh %52 : vector<8x128xf32>
    %54 = arith.subf %32, %53 : vector<8x128xf32>
    %55 = arith.mulf %46, %54 : vector<8x128xf32>
    %56 = arith.addf %53, %55 : vector<8x128xf32>
    %c8_21 = arith.constant 8 : index
    %c0_22 = arith.constant 0 : index
    %57 = vector.load %arg13[%c8_21, %c0_22] : memref<64x128xf32, #tpu.memory_space<vmem>>, vector<8x128xf32>
    tpu.vector_store %arg13[%c8_21, %c0_22], %56 {strides = array<i32>} : memref<64x128xf32, #tpu.memory_space<vmem>>, vector<8x128xf32>,
    %c16 = arith.constant 16 : index
    %c0_23 = arith.constant 0 : index
    %58 = vector.load %arg12[%c16, %c0_23] : memref<64x384xf32, #tpu.memory_space<vmem>>, vector<8x384xf32>
    %59 = arith.truncf %56 : vector<8x128xf32> to vector<8x128xbf16>
    %cst_24 = arith.constant dense<0.000000e+00> : vector<8x384xf32>
    %60 = tpu.matmul %59, %2, %cst_24 {dimension_numbers = #tpu.dot_dimension_numbers<[1], [0], [0], [1], [0, 0, 1, 1], [], []>} : vector<8x128xbf16>, vector<128x384xbf16>, vector<8x384xf32> -> vector<8x384xf32>
    %61 = vector.extract_strided_slice %58 {offsets = [0, 0], sizes = [8, 256], strides = [1, 1]} : vector<8x384xf32> to vector<8x256xf32>
    %62 = vector.extract_strided_slice %60 {offsets = [0, 0], sizes = [8, 256], strides = [1, 1]} : vector<8x384xf32> to vector<8x256xf32>
    %63 = arith.addf %61, %62 : vector<8x256xf32>
    %64 = arith.negf %63 : vector<8x256xf32>
    %65 = math.exp %64 : vector<8x256xf32>
    %cst_25 = arith.constant 1.000000e+00 : f32
    %66 = vector.broadcast %cst_25 : f32 to vector<8x256xf32>
    %67 = arith.addf %66, %65 : vector<8x256xf32>
    %68 = arith.divf %66, %67 : vector<8x256xf32>
    %69 = vector.extract_strided_slice %68 {offsets = [0, 0], sizes = [8, 128], strides = [1, 1]} : vector<8x256xf32> to vector<8x128xf32>
    %70 = vector.extract_strided_slice %68 {offsets = [0, 128], sizes = [8, 128], strides = [1, 1]} : vector<8x256xf32> to vector<8x128xf32>
    %71 = vector.extract_strided_slice %58 {offsets = [0, 256], sizes = [8, 128], strides = [1, 1]} : vector<8x384xf32> to vector<8x128xf32>
    %72 = vector.extract_strided_slice %60 {offsets = [0, 256], sizes = [8, 128], strides = [1, 1]} : vector<8x384xf32> to vector<8x128xf32>
    %73 = vector.broadcast %4 : vector<1x128xf32> to vector<8x128xf32>
    %74 = arith.addf %72, %73 : vector<8x128xf32>
    %75 = arith.mulf %69, %74 : vector<8x128xf32>
    %76 = arith.addf %71, %75 : vector<8x128xf32>
    %77 = math.tanh %76 : vector<8x128xf32>
    %78 = arith.subf %56, %77 : vector<8x128xf32>
    %79 = arith.mulf %70, %78 : vector<8x128xf32>
    %80 = arith.addf %77, %79 : vector<8x128xf32>
    %c16_26 = arith.constant 16 : index
    %c0_27 = arith.constant 0 : index
    %81 = vector.load %arg13[%c16_26, %c0_27] : memref<64x128xf32, #tpu.memory_space<vmem>>, vector<8x128xf32>
    tpu.vector_store %arg13[%c16_26, %c0_27], %80 {strides = array<i32>} : memref<64x128xf32, #tpu.memory_space<vmem>>, vector<8x128xf32>,
    %c24 = arith.constant 24 : index
    %c0_28 = arith.constant 0 : index
    %82 = vector.load %arg12[%c24, %c0_28] : memref<64x384xf32, #tpu.memory_space<vmem>>, vector<8x384xf32>
    %83 = arith.truncf %80 : vector<8x128xf32> to vector<8x128xbf16>
    %cst_29 = arith.constant dense<0.000000e+00> : vector<8x384xf32>
    %84 = tpu.matmul %83, %2, %cst_29 {dimension_numbers = #tpu.dot_dimension_numbers<[1], [0], [0], [1], [0, 0, 1, 1], [], []>} : vector<8x128xbf16>, vector<128x384xbf16>, vector<8x384xf32> -> vector<8x384xf32>
    %85 = vector.extract_strided_slice %82 {offsets = [0, 0], sizes = [8, 256], strides = [1, 1]} : vector<8x384xf32> to vector<8x256xf32>
    %86 = vector.extract_strided_slice %84 {offsets = [0, 0], sizes = [8, 256], strides = [1, 1]} : vector<8x384xf32> to vector<8x256xf32>
    %87 = arith.addf %85, %86 : vector<8x256xf32>
    %88 = arith.negf %87 : vector<8x256xf32>
    %89 = math.exp %88 : vector<8x256xf32>
    %cst_30 = arith.constant 1.000000e+00 : f32
    %90 = vector.broadcast %cst_30 : f32 to vector<8x256xf32>
    %91 = arith.addf %90, %89 : vector<8x256xf32>
    %92 = arith.divf %90, %91 : vector<8x256xf32>
    %93 = vector.extract_strided_slice %92 {offsets = [0, 0], sizes = [8, 128], strides = [1, 1]} : vector<8x256xf32> to vector<8x128xf32>
    %94 = vector.extract_strided_slice %92 {offsets = [0, 128], sizes = [8, 128], strides = [1, 1]} : vector<8x256xf32> to vector<8x128xf32>
    %95 = vector.extract_strided_slice %82 {offsets = [0, 256], sizes = [8, 128], strides = [1, 1]} : vector<8x384xf32> to vector<8x128xf32>
    %96 = vector.extract_strided_slice %84 {offsets = [0, 256], sizes = [8, 128], strides = [1, 1]} : vector<8x384xf32> to vector<8x128xf32>
    %97 = vector.broadcast %4 : vector<1x128xf32> to vector<8x128xf32>
    %98 = arith.addf %96, %97 : vector<8x128xf32>
    %99 = arith.mulf %93, %98 : vector<8x128xf32>
    %100 = arith.addf %95, %99 : vector<8x128xf32>
    %101 = math.tanh %100 : vector<8x128xf32>
    %102 = arith.subf %80, %101 : vector<8x128xf32>
    %103 = arith.mulf %94, %102 : vector<8x128xf32>
    %104 = arith.addf %101, %103 : vector<8x128xf32>
    %c24_31 = arith.constant 24 : index
    %c0_32 = arith.constant 0 : index
    %105 = vector.load %arg13[%c24_31, %c0_32] : memref<64x128xf32, #tpu.memory_space<vmem>>, vector<8x128xf32>
    tpu.vector_store %arg13[%c24_31, %c0_32], %104 {strides = array<i32>} : memref<64x128xf32, #tpu.memory_space<vmem>>, vector<8x128xf32>,
    %c32 = arith.constant 32 : index
    %c0_33 = arith.constant 0 : index
    %106 = vector.load %arg12[%c32, %c0_33] : memref<64x384xf32, #tpu.memory_space<vmem>>, vector<8x384xf32>
    %107 = arith.truncf %104 : vector<8x128xf32> to vector<8x128xbf16>
    %cst_34 = arith.constant dense<0.000000e+00> : vector<8x384xf32>
    %108 = tpu.matmul %107, %2, %cst_34 {dimension_numbers = #tpu.dot_dimension_numbers<[1], [0], [0], [1], [0, 0, 1, 1], [], []>} : vector<8x128xbf16>, vector<128x384xbf16>, vector<8x384xf32> -> vector<8x384xf32>
    %109 = vector.extract_strided_slice %106 {offsets = [0, 0], sizes = [8, 256], strides = [1, 1]} : vector<8x384xf32> to vector<8x256xf32>
    %110 = vector.extract_strided_slice %108 {offsets = [0, 0], sizes = [8, 256], strides = [1, 1]} : vector<8x384xf32> to vector<8x256xf32>
    %111 = arith.addf %109, %110 : vector<8x256xf32>
    %112 = arith.negf %111 : vector<8x256xf32>
    %113 = math.exp %112 : vector<8x256xf32>
    %cst_35 = arith.constant 1.000000e+00 : f32
    %114 = vector.broadcast %cst_35 : f32 to vector<8x256xf32>
    %115 = arith.addf %114, %113 : vector<8x256xf32>
    %116 = arith.divf %114, %115 : vector<8x256xf32>
    %117 = vector.extract_strided_slice %116 {offsets = [0, 0], sizes = [8, 128], strides = [1, 1]} : vector<8x256xf32> to vector<8x128xf32>
    %118 = vector.extract_strided_slice %116 {offsets = [0, 128], sizes = [8, 128], strides = [1, 1]} : vector<8x256xf32> to vector<8x128xf32>
    %119 = vector.extract_strided_slice %106 {offsets = [0, 256], sizes = [8, 128], strides = [1, 1]} : vector<8x384xf32> to vector<8x128xf32>
    %120 = vector.extract_strided_slice %108 {offsets = [0, 256], sizes = [8, 128], strides = [1, 1]} : vector<8x384xf32> to vector<8x128xf32>
    %121 = vector.broadcast %4 : vector<1x128xf32> to vector<8x128xf32>
    %122 = arith.addf %120, %121 : vector<8x128xf32>
    %123 = arith.mulf %117, %122 : vector<8x128xf32>
    %124 = arith.addf %119, %123 : vector<8x128xf32>
    %125 = math.tanh %124 : vector<8x128xf32>
    %126 = arith.subf %104, %125 : vector<8x128xf32>
    %127 = arith.mulf %118, %126 : vector<8x128xf32>
    %128 = arith.addf %125, %127 : vector<8x128xf32>
    %c32_36 = arith.constant 32 : index
    %c0_37 = arith.constant 0 : index
    %129 = vector.load %arg13[%c32_36, %c0_37] : memref<64x128xf32, #tpu.memory_space<vmem>>, vector<8x128xf32>
    tpu.vector_store %arg13[%c32_36, %c0_37], %128 {strides = array<i32>} : memref<64x128xf32, #tpu.memory_space<vmem>>, vector<8x128xf32>,
    %c40 = arith.constant 40 : index
    %c0_38 = arith.constant 0 : index
    %130 = vector.load %arg12[%c40, %c0_38] : memref<64x384xf32, #tpu.memory_space<vmem>>, vector<8x384xf32>
    %131 = arith.truncf %128 : vector<8x128xf32> to vector<8x128xbf16>
    %cst_39 = arith.constant dense<0.000000e+00> : vector<8x384xf32>
    %132 = tpu.matmul %131, %2, %cst_39 {dimension_numbers = #tpu.dot_dimension_numbers<[1], [0], [0], [1], [0, 0, 1, 1], [], []>} : vector<8x128xbf16>, vector<128x384xbf16>, vector<8x384xf32> -> vector<8x384xf32>
    %133 = vector.extract_strided_slice %130 {offsets = [0, 0], sizes = [8, 256], strides = [1, 1]} : vector<8x384xf32> to vector<8x256xf32>
    %134 = vector.extract_strided_slice %132 {offsets = [0, 0], sizes = [8, 256], strides = [1, 1]} : vector<8x384xf32> to vector<8x256xf32>
    %135 = arith.addf %133, %134 : vector<8x256xf32>
    %136 = arith.negf %135 : vector<8x256xf32>
    %137 = math.exp %136 : vector<8x256xf32>
    %cst_40 = arith.constant 1.000000e+00 : f32
    %138 = vector.broadcast %cst_40 : f32 to vector<8x256xf32>
    %139 = arith.addf %138, %137 : vector<8x256xf32>
    %140 = arith.divf %138, %139 : vector<8x256xf32>
    %141 = vector.extract_strided_slice %140 {offsets = [0, 0], sizes = [8, 128], strides = [1, 1]} : vector<8x256xf32> to vector<8x128xf32>
    %142 = vector.extract_strided_slice %140 {offsets = [0, 128], sizes = [8, 128], strides = [1, 1]} : vector<8x256xf32> to vector<8x128xf32>
    %143 = vector.extract_strided_slice %130 {offsets = [0, 256], sizes = [8, 128], strides = [1, 1]} : vector<8x384xf32> to vector<8x128xf32>
    %144 = vector.extract_strided_slice %132 {offsets = [0, 256], sizes = [8, 128], strides = [1, 1]} : vector<8x384xf32> to vector<8x128xf32>
    %145 = vector.broadcast %4 : vector<1x128xf32> to vector<8x128xf32>
    %146 = arith.addf %144, %145 : vector<8x128xf32>
    %147 = arith.mulf %141, %146 : vector<8x128xf32>
    %148 = arith.addf %143, %147 : vector<8x128xf32>
    %149 = math.tanh %148 : vector<8x128xf32>
    %150 = arith.subf %128, %149 : vector<8x128xf32>
    %151 = arith.mulf %142, %150 : vector<8x128xf32>
    %152 = arith.addf %149, %151 : vector<8x128xf32>
    %c40_41 = arith.constant 40 : index
    %c0_42 = arith.constant 0 : index
    %153 = vector.load %arg13[%c40_41, %c0_42] : memref<64x128xf32, #tpu.memory_space<vmem>>, vector<8x128xf32>
    tpu.vector_store %arg13[%c40_41, %c0_42], %152 {strides = array<i32>} : memref<64x128xf32, #tpu.memory_space<vmem>>, vector<8x128xf32>,
    %c48 = arith.constant 48 : index
    %c0_43 = arith.constant 0 : index
    %154 = vector.load %arg12[%c48, %c0_43] : memref<64x384xf32, #tpu.memory_space<vmem>>, vector<8x384xf32>
    %155 = arith.truncf %152 : vector<8x128xf32> to vector<8x128xbf16>
    %cst_44 = arith.constant dense<0.000000e+00> : vector<8x384xf32>
    %156 = tpu.matmul %155, %2, %cst_44 {dimension_numbers = #tpu.dot_dimension_numbers<[1], [0], [0], [1], [0, 0, 1, 1], [], []>} : vector<8x128xbf16>, vector<128x384xbf16>, vector<8x384xf32> -> vector<8x384xf32>
    %157 = vector.extract_strided_slice %154 {offsets = [0, 0], sizes = [8, 256], strides = [1, 1]} : vector<8x384xf32> to vector<8x256xf32>
    %158 = vector.extract_strided_slice %156 {offsets = [0, 0], sizes = [8, 256], strides = [1, 1]} : vector<8x384xf32> to vector<8x256xf32>
    %159 = arith.addf %157, %158 : vector<8x256xf32>
    %160 = arith.negf %159 : vector<8x256xf32>
    %161 = math.exp %160 : vector<8x256xf32>
    %cst_45 = arith.constant 1.000000e+00 : f32
    %162 = vector.broadcast %cst_45 : f32 to vector<8x256xf32>
    %163 = arith.addf %162, %161 : vector<8x256xf32>
    %164 = arith.divf %162, %163 : vector<8x256xf32>
    %165 = vector.extract_strided_slice %164 {offsets = [0, 0], sizes = [8, 128], strides = [1, 1]} : vector<8x256xf32> to vector<8x128xf32>
    %166 = vector.extract_strided_slice %164 {offsets = [0, 128], sizes = [8, 128], strides = [1, 1]} : vector<8x256xf32> to vector<8x128xf32>
    %167 = vector.extract_strided_slice %154 {offsets = [0, 256], sizes = [8, 128], strides = [1, 1]} : vector<8x384xf32> to vector<8x128xf32>
    %168 = vector.extract_strided_slice %156 {offsets = [0, 256], sizes = [8, 128], strides = [1, 1]} : vector<8x384xf32> to vector<8x128xf32>
    %169 = vector.broadcast %4 : vector<1x128xf32> to vector<8x128xf32>
    %170 = arith.addf %168, %169 : vector<8x128xf32>
    %171 = arith.mulf %165, %170 : vector<8x128xf32>
    %172 = arith.addf %167, %171 : vector<8x128xf32>
    %173 = math.tanh %172 : vector<8x128xf32>
    %174 = arith.subf %152, %173 : vector<8x128xf32>
    %175 = arith.mulf %166, %174 : vector<8x128xf32>
    %176 = arith.addf %173, %175 : vector<8x128xf32>
    %c48_46 = arith.constant 48 : index
    %c0_47 = arith.constant 0 : index
    %177 = vector.load %arg13[%c48_46, %c0_47] : memref<64x128xf32, #tpu.memory_space<vmem>>, vector<8x128xf32>
    tpu.vector_store %arg13[%c48_46, %c0_47], %176 {strides = array<i32>} : memref<64x128xf32, #tpu.memory_space<vmem>>, vector<8x128xf32>,
    %c56 = arith.constant 56 : index
    %c0_48 = arith.constant 0 : index
    %178 = vector.load %arg12[%c56, %c0_48] : memref<64x384xf32, #tpu.memory_space<vmem>>, vector<8x384xf32>
    %179 = arith.truncf %176 : vector<8x128xf32> to vector<8x128xbf16>
    %cst_49 = arith.constant dense<0.000000e+00> : vector<8x384xf32>
    %180 = tpu.matmul %179, %2, %cst_49 {dimension_numbers = #tpu.dot_dimension_numbers<[1], [0], [0], [1], [0, 0, 1, 1], [], []>} : vector<8x128xbf16>, vector<128x384xbf16>, vector<8x384xf32> -> vector<8x384xf32>
    %181 = vector.extract_strided_slice %178 {offsets = [0, 0], sizes = [8, 256], strides = [1, 1]} : vector<8x384xf32> to vector<8x256xf32>
    %182 = vector.extract_strided_slice %180 {offsets = [0, 0], sizes = [8, 256], strides = [1, 1]} : vector<8x384xf32> to vector<8x256xf32>
    %183 = arith.addf %181, %182 : vector<8x256xf32>
    %184 = arith.negf %183 : vector<8x256xf32>
    %185 = math.exp %184 : vector<8x256xf32>
    %cst_50 = arith.constant 1.000000e+00 : f32
    %186 = vector.broadcast %cst_50 : f32 to vector<8x256xf32>
    %187 = arith.addf %186, %185 : vector<8x256xf32>
    %188 = arith.divf %186, %187 : vector<8x256xf32>
    %189 = vector.extract_strided_slice %188 {offsets = [0, 0], sizes = [8, 128], strides = [1, 1]} : vector<8x256xf32> to vector<8x128xf32>
    %190 = vector.extract_strided_slice %188 {offsets = [0, 128], sizes = [8, 128], strides = [1, 1]} : vector<8x256xf32> to vector<8x128xf32>
    %191 = vector.extract_strided_slice %178 {offsets = [0, 256], sizes = [8, 128], strides = [1, 1]} : vector<8x384xf32> to vector<8x128xf32>
    %192 = vector.extract_strided_slice %180 {offsets = [0, 256], sizes = [8, 128], strides = [1, 1]} : vector<8x384xf32> to vector<8x128xf32>
    %193 = vector.broadcast %4 : vector<1x128xf32> to vector<8x128xf32>
    %194 = arith.addf %192, %193 : vector<8x128xf32>
    %195 = arith.mulf %189, %194 : vector<8x128xf32>
    %196 = arith.addf %191, %195 : vector<8x128xf32>
    %197 = math.tanh %196 : vector<8x128xf32>
    %198 = arith.subf %176, %197 : vector<8x128xf32>
    %199 = arith.mulf %190, %198 : vector<8x128xf32>
    %200 = arith.addf %197, %199 : vector<8x128xf32>
    %c56_51 = arith.constant 56 : index
    %c0_52 = arith.constant 0 : index
    %201 = vector.load %arg13[%c56_51, %c0_52] : memref<64x128xf32, #tpu.memory_space<vmem>>, vector<8x128xf32>
    tpu.vector_store %arg13[%c56_51, %c0_52], %200 {strides = array<i32>} : memref<64x128xf32, #tpu.memory_space<vmem>>, vector<8x128xf32>,
    %c0_53 = arith.constant 0 : index
    %c0_54 = arith.constant 0 : index
    %202 = vector.load %arg13[%c0_53, %c0_54] : memref<64x128xf32, #tpu.memory_space<vmem>>, vector<64x128xf32>
    %203 = arith.truncf %202 : vector<64x128xf32> to vector<64x128xbf16>
    %c0_55 = arith.constant 0 : index
    %c0_56 = arith.constant 0 : index
    %204 = vector.load %arg5[%c0_55, %c0_56] : memref<128x384xbf16, #tpu.memory_space<vmem>>, vector<128x384xbf16>
    %c0_57 = arith.constant 0 : index
    %c0_58 = arith.constant 0 : index
    %205 = vector.load %arg6[%c0_57, %c0_58] : memref<128x384xbf16, #tpu.memory_space<vmem>>, vector<128x384xbf16>
    %c0_59 = arith.constant 0 : index
    %c0_60 = arith.constant 0 : index
    %206 = vector.load %arg7[%c0_59, %c0_60] : memref<1x384xf32, #tpu.memory_space<vmem>>, vector<1x384xf32>
    %c0_61 = arith.constant 0 : index
    %c0_62 = arith.constant 0 : index
    %207 = vector.load %arg8[%c0_61, %c0_62] : memref<1x128xf32, #tpu.memory_space<vmem>>, vector<1x128xf32>
    %cst_63 = arith.constant dense<0.000000e+00> : vector<64x384xf32>
    %208 = tpu.matmul %203, %204, %cst_63 {dimension_numbers = #tpu.dot_dimension_numbers<[1], [0], [0], [1], [0, 0, 1, 1], [], []>} : vector<64x128xbf16>, vector<128x384xbf16>, vector<64x384xf32> -> vector<64x384xf32>
    %209 = vector.broadcast %206 : vector<1x384xf32> to vector<64x384xf32>
    %210 = arith.addf %208, %209 : vector<64x384xf32>
    %c0_64 = arith.constant 0 : index
    %c0_65 = arith.constant 0 : index
    %211 = vector.load %arg12[%c0_64, %c0_65] : memref<64x384xf32, #tpu.memory_space<vmem>>, vector<64x384xf32>
    tpu.vector_store %arg12[%c0_64, %c0_65], %210 {strides = array<i32>} : memref<64x384xf32, #tpu.memory_space<vmem>>, vector<64x384xf32>,
    %cst_66 = arith.constant 0.000000e+00 : f32
    %212 = vector.broadcast %cst_66 : f32 to vector<8x128xf32>
    %c0_67 = arith.constant 0 : index
    %c0_68 = arith.constant 0 : index
    %213 = vector.load %arg12[%c0_67, %c0_68] : memref<64x384xf32, #tpu.memory_space<vmem>>, vector<8x384xf32>
    %214 = arith.truncf %212 : vector<8x128xf32> to vector<8x128xbf16>
    %cst_69 = arith.constant dense<0.000000e+00> : vector<8x384xf32>
    %215 = tpu.matmul %214, %205, %cst_69 {dimension_numbers = #tpu.dot_dimension_numbers<[1], [0], [0], [1], [0, 0, 1, 1], [], []>} : vector<8x128xbf16>, vector<128x384xbf16>, vector<8x384xf32> -> vector<8x384xf32>
    %216 = vector.extract_strided_slice %213 {offsets = [0, 0], sizes = [8, 256], strides = [1, 1]} : vector<8x384xf32> to vector<8x256xf32>
    %217 = vector.extract_strided_slice %215 {offsets = [0, 0], sizes = [8, 256], strides = [1, 1]} : vector<8x384xf32> to vector<8x256xf32>
    %218 = arith.addf %216, %217 : vector<8x256xf32>
    %219 = arith.negf %218 : vector<8x256xf32>
    %220 = math.exp %219 : vector<8x256xf32>
    %cst_70 = arith.constant 1.000000e+00 : f32
    %221 = vector.broadcast %cst_70 : f32 to vector<8x256xf32>
    %222 = arith.addf %221, %220 : vector<8x256xf32>
    %223 = arith.divf %221, %222 : vector<8x256xf32>
    %224 = vector.extract_strided_slice %223 {offsets = [0, 0], sizes = [8, 128], strides = [1, 1]} : vector<8x256xf32> to vector<8x128xf32>
    %225 = vector.extract_strided_slice %223 {offsets = [0, 128], sizes = [8, 128], strides = [1, 1]} : vector<8x256xf32> to vector<8x128xf32>
    %226 = vector.extract_strided_slice %213 {offsets = [0, 256], sizes = [8, 128], strides = [1, 1]} : vector<8x384xf32> to vector<8x128xf32>
    %227 = vector.extract_strided_slice %215 {offsets = [0, 256], sizes = [8, 128], strides = [1, 1]} : vector<8x384xf32> to vector<8x128xf32>
    %228 = vector.broadcast %207 : vector<1x128xf32> to vector<8x128xf32>
    %229 = arith.addf %227, %228 : vector<8x128xf32>
    %230 = arith.mulf %224, %229 : vector<8x128xf32>
    %231 = arith.addf %226, %230 : vector<8x128xf32>
    %232 = math.tanh %231 : vector<8x128xf32>
    %233 = arith.subf %212, %232 : vector<8x128xf32>
    %234 = arith.mulf %225, %233 : vector<8x128xf32>
    %235 = arith.addf %232, %234 : vector<8x128xf32>
    %c8_71 = arith.constant 8 : index
    %c0_72 = arith.constant 0 : index
    %236 = vector.load %arg12[%c8_71, %c0_72] : memref<64x384xf32, #tpu.memory_space<vmem>>, vector<8x384xf32>
    %237 = arith.truncf %235 : vector<8x128xf32> to vector<8x128xbf16>
    %cst_73 = arith.constant dense<0.000000e+00> : vector<8x384xf32>
    %238 = tpu.matmul %237, %205, %cst_73 {dimension_numbers = #tpu.dot_dimension_numbers<[1], [0], [0], [1], [0, 0, 1, 1], [], []>} : vector<8x128xbf16>, vector<128x384xbf16>, vector<8x384xf32> -> vector<8x384xf32>
    %239 = vector.extract_strided_slice %236 {offsets = [0, 0], sizes = [8, 256], strides = [1, 1]} : vector<8x384xf32> to vector<8x256xf32>
    %240 = vector.extract_strided_slice %238 {offsets = [0, 0], sizes = [8, 256], strides = [1, 1]} : vector<8x384xf32> to vector<8x256xf32>
    %241 = arith.addf %239, %240 : vector<8x256xf32>
    %242 = arith.negf %241 : vector<8x256xf32>
    %243 = math.exp %242 : vector<8x256xf32>
    %cst_74 = arith.constant 1.000000e+00 : f32
    %244 = vector.broadcast %cst_74 : f32 to vector<8x256xf32>
    %245 = arith.addf %244, %243 : vector<8x256xf32>
    %246 = arith.divf %244, %245 : vector<8x256xf32>
    %247 = vector.extract_strided_slice %246 {offsets = [0, 0], sizes = [8, 128], strides = [1, 1]} : vector<8x256xf32> to vector<8x128xf32>
    %248 = vector.extract_strided_slice %246 {offsets = [0, 128], sizes = [8, 128], strides = [1, 1]} : vector<8x256xf32> to vector<8x128xf32>
    %249 = vector.extract_strided_slice %236 {offsets = [0, 256], sizes = [8, 128], strides = [1, 1]} : vector<8x384xf32> to vector<8x128xf32>
    %250 = vector.extract_strided_slice %238 {offsets = [0, 256], sizes = [8, 128], strides = [1, 1]} : vector<8x384xf32> to vector<8x128xf32>
    %251 = vector.broadcast %207 : vector<1x128xf32> to vector<8x128xf32>
    %252 = arith.addf %250, %251 : vector<8x128xf32>
    %253 = arith.mulf %247, %252 : vector<8x128xf32>
    %254 = arith.addf %249, %253 : vector<8x128xf32>
    %255 = math.tanh %254 : vector<8x128xf32>
    %256 = arith.subf %235, %255 : vector<8x128xf32>
    %257 = arith.mulf %248, %256 : vector<8x128xf32>
    %258 = arith.addf %255, %257 : vector<8x128xf32>
    %c16_75 = arith.constant 16 : index
    %c0_76 = arith.constant 0 : index
    %259 = vector.load %arg12[%c16_75, %c0_76] : memref<64x384xf32, #tpu.memory_space<vmem>>, vector<8x384xf32>
    %260 = arith.truncf %258 : vector<8x128xf32> to vector<8x128xbf16>
    %cst_77 = arith.constant dense<0.000000e+00> : vector<8x384xf32>
    %261 = tpu.matmul %260, %205, %cst_77 {dimension_numbers = #tpu.dot_dimension_numbers<[1], [0], [0], [1], [0, 0, 1, 1], [], []>} : vector<8x128xbf16>, vector<128x384xbf16>, vector<8x384xf32> -> vector<8x384xf32>
    %262 = vector.extract_strided_slice %259 {offsets = [0, 0], sizes = [8, 256], strides = [1, 1]} : vector<8x384xf32> to vector<8x256xf32>
    %263 = vector.extract_strided_slice %261 {offsets = [0, 0], sizes = [8, 256], strides = [1, 1]} : vector<8x384xf32> to vector<8x256xf32>
    %264 = arith.addf %262, %263 : vector<8x256xf32>
    %265 = arith.negf %264 : vector<8x256xf32>
    %266 = math.exp %265 : vector<8x256xf32>
    %cst_78 = arith.constant 1.000000e+00 : f32
    %267 = vector.broadcast %cst_78 : f32 to vector<8x256xf32>
    %268 = arith.addf %267, %266 : vector<8x256xf32>
    %269 = arith.divf %267, %268 : vector<8x256xf32>
    %270 = vector.extract_strided_slice %269 {offsets = [0, 0], sizes = [8, 128], strides = [1, 1]} : vector<8x256xf32> to vector<8x128xf32>
    %271 = vector.extract_strided_slice %269 {offsets = [0, 128], sizes = [8, 128], strides = [1, 1]} : vector<8x256xf32> to vector<8x128xf32>
    %272 = vector.extract_strided_slice %259 {offsets = [0, 256], sizes = [8, 128], strides = [1, 1]} : vector<8x384xf32> to vector<8x128xf32>
    %273 = vector.extract_strided_slice %261 {offsets = [0, 256], sizes = [8, 128], strides = [1, 1]} : vector<8x384xf32> to vector<8x128xf32>
    %274 = vector.broadcast %207 : vector<1x128xf32> to vector<8x128xf32>
    %275 = arith.addf %273, %274 : vector<8x128xf32>
    %276 = arith.mulf %270, %275 : vector<8x128xf32>
    %277 = arith.addf %272, %276 : vector<8x128xf32>
    %278 = math.tanh %277 : vector<8x128xf32>
    %279 = arith.subf %258, %278 : vector<8x128xf32>
    %280 = arith.mulf %271, %279 : vector<8x128xf32>
    %281 = arith.addf %278, %280 : vector<8x128xf32>
    %c24_79 = arith.constant 24 : index
    %c0_80 = arith.constant 0 : index
    %282 = vector.load %arg12[%c24_79, %c0_80] : memref<64x384xf32, #tpu.memory_space<vmem>>, vector<8x384xf32>
    %283 = arith.truncf %281 : vector<8x128xf32> to vector<8x128xbf16>
    %cst_81 = arith.constant dense<0.000000e+00> : vector<8x384xf32>
    %284 = tpu.matmul %283, %205, %cst_81 {dimension_numbers = #tpu.dot_dimension_numbers<[1], [0], [0], [1], [0, 0, 1, 1], [], []>} : vector<8x128xbf16>, vector<128x384xbf16>, vector<8x384xf32> -> vector<8x384xf32>
    %285 = vector.extract_strided_slice %282 {offsets = [0, 0], sizes = [8, 256], strides = [1, 1]} : vector<8x384xf32> to vector<8x256xf32>
    %286 = vector.extract_strided_slice %284 {offsets = [0, 0], sizes = [8, 256], strides = [1, 1]} : vector<8x384xf32> to vector<8x256xf32>
    %287 = arith.addf %285, %286 : vector<8x256xf32>
    %288 = arith.negf %287 : vector<8x256xf32>
    %289 = math.exp %288 : vector<8x256xf32>
    %cst_82 = arith.constant 1.000000e+00 : f32
    %290 = vector.broadcast %cst_82 : f32 to vector<8x256xf32>
    %291 = arith.addf %290, %289 : vector<8x256xf32>
    %292 = arith.divf %290, %291 : vector<8x256xf32>
    %293 = vector.extract_strided_slice %292 {offsets = [0, 0], sizes = [8, 128], strides = [1, 1]} : vector<8x256xf32> to vector<8x128xf32>
    %294 = vector.extract_strided_slice %292 {offsets = [0, 128], sizes = [8, 128], strides = [1, 1]} : vector<8x256xf32> to vector<8x128xf32>
    %295 = vector.extract_strided_slice %282 {offsets = [0, 256], sizes = [8, 128], strides = [1, 1]} : vector<8x384xf32> to vector<8x128xf32>
    %296 = vector.extract_strided_slice %284 {offsets = [0, 256], sizes = [8, 128], strides = [1, 1]} : vector<8x384xf32> to vector<8x128xf32>
    %297 = vector.broadcast %207 : vector<1x128xf32> to vector<8x128xf32>
    %298 = arith.addf %296, %297 : vector<8x128xf32>
    %299 = arith.mulf %293, %298 : vector<8x128xf32>
    %300 = arith.addf %295, %299 : vector<8x128xf32>
    %301 = math.tanh %300 : vector<8x128xf32>
    %302 = arith.subf %281, %301 : vector<8x128xf32>
    %303 = arith.mulf %294, %302 : vector<8x128xf32>
    %304 = arith.addf %301, %303 : vector<8x128xf32>
    %c32_83 = arith.constant 32 : index
    %c0_84 = arith.constant 0 : index
    %305 = vector.load %arg12[%c32_83, %c0_84] : memref<64x384xf32, #tpu.memory_space<vmem>>, vector<8x384xf32>
    %306 = arith.truncf %304 : vector<8x128xf32> to vector<8x128xbf16>
    %cst_85 = arith.constant dense<0.000000e+00> : vector<8x384xf32>
    %307 = tpu.matmul %306, %205, %cst_85 {dimension_numbers = #tpu.dot_dimension_numbers<[1], [0], [0], [1], [0, 0, 1, 1], [], []>} : vector<8x128xbf16>, vector<128x384xbf16>, vector<8x384xf32> -> vector<8x384xf32>
    %308 = vector.extract_strided_slice %305 {offsets = [0, 0], sizes = [8, 256], strides = [1, 1]} : vector<8x384xf32> to vector<8x256xf32>
    %309 = vector.extract_strided_slice %307 {offsets = [0, 0], sizes = [8, 256], strides = [1, 1]} : vector<8x384xf32> to vector<8x256xf32>
    %310 = arith.addf %308, %309 : vector<8x256xf32>
    %311 = arith.negf %310 : vector<8x256xf32>
    %312 = math.exp %311 : vector<8x256xf32>
    %cst_86 = arith.constant 1.000000e+00 : f32
    %313 = vector.broadcast %cst_86 : f32 to vector<8x256xf32>
    %314 = arith.addf %313, %312 : vector<8x256xf32>
    %315 = arith.divf %313, %314 : vector<8x256xf32>
    %316 = vector.extract_strided_slice %315 {offsets = [0, 0], sizes = [8, 128], strides = [1, 1]} : vector<8x256xf32> to vector<8x128xf32>
    %317 = vector.extract_strided_slice %315 {offsets = [0, 128], sizes = [8, 128], strides = [1, 1]} : vector<8x256xf32> to vector<8x128xf32>
    %318 = vector.extract_strided_slice %305 {offsets = [0, 256], sizes = [8, 128], strides = [1, 1]} : vector<8x384xf32> to vector<8x128xf32>
    %319 = vector.extract_strided_slice %307 {offsets = [0, 256], sizes = [8, 128], strides = [1, 1]} : vector<8x384xf32> to vector<8x128xf32>
    %320 = vector.broadcast %207 : vector<1x128xf32> to vector<8x128xf32>
    %321 = arith.addf %319, %320 : vector<8x128xf32>
    %322 = arith.mulf %316, %321 : vector<8x128xf32>
    %323 = arith.addf %318, %322 : vector<8x128xf32>
    %324 = math.tanh %323 : vector<8x128xf32>
    %325 = arith.subf %304, %324 : vector<8x128xf32>
    %326 = arith.mulf %317, %325 : vector<8x128xf32>
    %327 = arith.addf %324, %326 : vector<8x128xf32>
    %c40_87 = arith.constant 40 : index
    %c0_88 = arith.constant 0 : index
    %328 = vector.load %arg12[%c40_87, %c0_88] : memref<64x384xf32, #tpu.memory_space<vmem>>, vector<8x384xf32>
    %329 = arith.truncf %327 : vector<8x128xf32> to vector<8x128xbf16>
    %cst_89 = arith.constant dense<0.000000e+00> : vector<8x384xf32>
    %330 = tpu.matmul %329, %205, %cst_89 {dimension_numbers = #tpu.dot_dimension_numbers<[1], [0], [0], [1], [0, 0, 1, 1], [], []>} : vector<8x128xbf16>, vector<128x384xbf16>, vector<8x384xf32> -> vector<8x384xf32>
    %331 = vector.extract_strided_slice %328 {offsets = [0, 0], sizes = [8, 256], strides = [1, 1]} : vector<8x384xf32> to vector<8x256xf32>
    %332 = vector.extract_strided_slice %330 {offsets = [0, 0], sizes = [8, 256], strides = [1, 1]} : vector<8x384xf32> to vector<8x256xf32>
    %333 = arith.addf %331, %332 : vector<8x256xf32>
    %334 = arith.negf %333 : vector<8x256xf32>
    %335 = math.exp %334 : vector<8x256xf32>
    %cst_90 = arith.constant 1.000000e+00 : f32
    %336 = vector.broadcast %cst_90 : f32 to vector<8x256xf32>
    %337 = arith.addf %336, %335 : vector<8x256xf32>
    %338 = arith.divf %336, %337 : vector<8x256xf32>
    %339 = vector.extract_strided_slice %338 {offsets = [0, 0], sizes = [8, 128], strides = [1, 1]} : vector<8x256xf32> to vector<8x128xf32>
    %340 = vector.extract_strided_slice %338 {offsets = [0, 128], sizes = [8, 128], strides = [1, 1]} : vector<8x256xf32> to vector<8x128xf32>
    %341 = vector.extract_strided_slice %328 {offsets = [0, 256], sizes = [8, 128], strides = [1, 1]} : vector<8x384xf32> to vector<8x128xf32>
    %342 = vector.extract_strided_slice %330 {offsets = [0, 256], sizes = [8, 128], strides = [1, 1]} : vector<8x384xf32> to vector<8x128xf32>
    %343 = vector.broadcast %207 : vector<1x128xf32> to vector<8x128xf32>
    %344 = arith.addf %342, %343 : vector<8x128xf32>
    %345 = arith.mulf %339, %344 : vector<8x128xf32>
    %346 = arith.addf %341, %345 : vector<8x128xf32>
    %347 = math.tanh %346 : vector<8x128xf32>
    %348 = arith.subf %327, %347 : vector<8x128xf32>
    %349 = arith.mulf %340, %348 : vector<8x128xf32>
    %350 = arith.addf %347, %349 : vector<8x128xf32>
    %c48_91 = arith.constant 48 : index
    %c0_92 = arith.constant 0 : index
    %351 = vector.load %arg12[%c48_91, %c0_92] : memref<64x384xf32, #tpu.memory_space<vmem>>, vector<8x384xf32>
    %352 = arith.truncf %350 : vector<8x128xf32> to vector<8x128xbf16>
    %cst_93 = arith.constant dense<0.000000e+00> : vector<8x384xf32>
    %353 = tpu.matmul %352, %205, %cst_93 {dimension_numbers = #tpu.dot_dimension_numbers<[1], [0], [0], [1], [0, 0, 1, 1], [], []>} : vector<8x128xbf16>, vector<128x384xbf16>, vector<8x384xf32> -> vector<8x384xf32>
    %354 = vector.extract_strided_slice %351 {offsets = [0, 0], sizes = [8, 256], strides = [1, 1]} : vector<8x384xf32> to vector<8x256xf32>
    %355 = vector.extract_strided_slice %353 {offsets = [0, 0], sizes = [8, 256], strides = [1, 1]} : vector<8x384xf32> to vector<8x256xf32>
    %356 = arith.addf %354, %355 : vector<8x256xf32>
    %357 = arith.negf %356 : vector<8x256xf32>
    %358 = math.exp %357 : vector<8x256xf32>
    %cst_94 = arith.constant 1.000000e+00 : f32
    %359 = vector.broadcast %cst_94 : f32 to vector<8x256xf32>
    %360 = arith.addf %359, %358 : vector<8x256xf32>
    %361 = arith.divf %359, %360 : vector<8x256xf32>
    %362 = vector.extract_strided_slice %361 {offsets = [0, 0], sizes = [8, 128], strides = [1, 1]} : vector<8x256xf32> to vector<8x128xf32>
    %363 = vector.extract_strided_slice %361 {offsets = [0, 128], sizes = [8, 128], strides = [1, 1]} : vector<8x256xf32> to vector<8x128xf32>
    %364 = vector.extract_strided_slice %351 {offsets = [0, 256], sizes = [8, 128], strides = [1, 1]} : vector<8x384xf32> to vector<8x128xf32>
    %365 = vector.extract_strided_slice %353 {offsets = [0, 256], sizes = [8, 128], strides = [1, 1]} : vector<8x384xf32> to vector<8x128xf32>
    %366 = vector.broadcast %207 : vector<1x128xf32> to vector<8x128xf32>
    %367 = arith.addf %365, %366 : vector<8x128xf32>
    %368 = arith.mulf %362, %367 : vector<8x128xf32>
    %369 = arith.addf %364, %368 : vector<8x128xf32>
    %370 = math.tanh %369 : vector<8x128xf32>
    %371 = arith.subf %350, %370 : vector<8x128xf32>
    %372 = arith.mulf %363, %371 : vector<8x128xf32>
    %373 = arith.addf %370, %372 : vector<8x128xf32>
    %c56_95 = arith.constant 56 : index
    %c0_96 = arith.constant 0 : index
    %374 = vector.load %arg12[%c56_95, %c0_96] : memref<64x384xf32, #tpu.memory_space<vmem>>, vector<8x384xf32>
    %375 = arith.truncf %373 : vector<8x128xf32> to vector<8x128xbf16>
    %cst_97 = arith.constant dense<0.000000e+00> : vector<8x384xf32>
    %376 = tpu.matmul %375, %205, %cst_97 {dimension_numbers = #tpu.dot_dimension_numbers<[1], [0], [0], [1], [0, 0, 1, 1], [], []>} : vector<8x128xbf16>, vector<128x384xbf16>, vector<8x384xf32> -> vector<8x384xf32>
    %377 = vector.extract_strided_slice %374 {offsets = [0, 0], sizes = [8, 256], strides = [1, 1]} : vector<8x384xf32> to vector<8x256xf32>
    %378 = vector.extract_strided_slice %376 {offsets = [0, 0], sizes = [8, 256], strides = [1, 1]} : vector<8x384xf32> to vector<8x256xf32>
    %379 = arith.addf %377, %378 : vector<8x256xf32>
    %380 = arith.negf %379 : vector<8x256xf32>
    %381 = math.exp %380 : vector<8x256xf32>
    %cst_98 = arith.constant 1.000000e+00 : f32
    %382 = vector.broadcast %cst_98 : f32 to vector<8x256xf32>
    %383 = arith.addf %382, %381 : vector<8x256xf32>
    %384 = arith.divf %382, %383 : vector<8x256xf32>
    %385 = vector.extract_strided_slice %384 {offsets = [0, 0], sizes = [8, 128], strides = [1, 1]} : vector<8x256xf32> to vector<8x128xf32>
    %386 = vector.extract_strided_slice %384 {offsets = [0, 128], sizes = [8, 128], strides = [1, 1]} : vector<8x256xf32> to vector<8x128xf32>
    %387 = vector.extract_strided_slice %374 {offsets = [0, 256], sizes = [8, 128], strides = [1, 1]} : vector<8x384xf32> to vector<8x128xf32>
    %388 = vector.extract_strided_slice %376 {offsets = [0, 256], sizes = [8, 128], strides = [1, 1]} : vector<8x384xf32> to vector<8x128xf32>
    %389 = vector.broadcast %207 : vector<1x128xf32> to vector<8x128xf32>
    %390 = arith.addf %388, %389 : vector<8x128xf32>
    %391 = arith.mulf %385, %390 : vector<8x128xf32>
    %392 = arith.addf %387, %391 : vector<8x128xf32>
    %393 = math.tanh %392 : vector<8x128xf32>
    %394 = arith.subf %373, %393 : vector<8x128xf32>
    %395 = arith.mulf %386, %394 : vector<8x128xf32>
    %396 = arith.addf %393, %395 : vector<8x128xf32>
    %cst_99 = arith.constant 0.000000e+00 : f32
    %397 = vector.broadcast %cst_99 : f32 to vector<8x128xf32>
    %c0_100 = arith.constant 0 : index
    %c0_101 = arith.constant 0 : index
    %c0_102 = arith.constant 0 : index
    %398 = vector.load %arg9[%c0_100, %c0_101, %c0_102] : memref<2x128x128xf32, #tpu.memory_space<vmem>>, vector<1x128x128xf32>
    %399 = vector.shape_cast %398 : vector<1x128x128xf32> to vector<128x128xf32>
    %cst_103 = arith.constant dense<0.000000e+00> : vector<8x128xf32>
    %400 = tpu.matmul %200, %399, %cst_103 {dimension_numbers = #tpu.dot_dimension_numbers<[1], [0], [0], [1], [0, 0, 1, 1], [], []>} : vector<8x128xf32>, vector<128x128xf32>, vector<8x128xf32> -> vector<8x128xf32>
    %401 = arith.addf %397, %400 : vector<8x128xf32>
    %c1 = arith.constant 1 : index
    %c0_104 = arith.constant 0 : index
    %c0_105 = arith.constant 0 : index
    %402 = vector.load %arg9[%c1, %c0_104, %c0_105] : memref<2x128x128xf32, #tpu.memory_space<vmem>>, vector<1x128x128xf32>
    %403 = vector.shape_cast %402 : vector<1x128x128xf32> to vector<128x128xf32>
    %cst_106 = arith.constant dense<0.000000e+00> : vector<8x128xf32>
    %404 = tpu.matmul %396, %403, %cst_106 {dimension_numbers = #tpu.dot_dimension_numbers<[1], [0], [0], [1], [0, 0, 1, 1], [], []>} : vector<8x128xf32>, vector<128x128xf32>, vector<8x128xf32> -> vector<8x128xf32>
    %405 = arith.addf %401, %404 : vector<8x128xf32>
    %c0_107 = arith.constant 0 : index
    %c0_108 = arith.constant 0 : index
    %406 = vector.load %arg10[%c0_107, %c0_108] : memref<1x128xf32, #tpu.memory_space<vmem>>, vector<1x128xf32>
    %407 = vector.broadcast %406 : vector<1x128xf32> to vector<8x128xf32>
    %408 = arith.addf %405, %407 : vector<8x128xf32>
    %c0_109 = arith.constant 0 : index
    %c0_110 = arith.constant 0 : index
    %409 = vector.load %arg11[%c0_109, %c0_110] : memref<8x128xf32, #tpu.memory_space<vmem>>, vector<8x128xf32>
    tpu.vector_store %arg11[%c0_109, %c0_110], %408 {strides = array<i32>} : memref<8x128xf32, #tpu.memory_space<vmem>>, vector<8x128xf32>,
    return
  }
}

</mosaic_0001>

<bundles_post_ra>
// kernel: tpu_custom_call.1
= control target key start
LH: loop header
LB: loop body
LE: loop exit
PB: predicated region body
PF: predicated region fallthrough
CT: control target
= control target key end

     0   :  { %16 = vsyncpa [#allocation5], 0  ;;  %s5325_s0 = inlined_call_operand.vmem [shape: bf16[64,4], index: 0, kind: input, shape index: {}]   ;;  %s5326_s1 = inlined_call_operand.vmem [shape: bf16[4,384], index: 1, kind: input, shape index: {}]   ;;  %s5327_s2 = inlined_call_operand.hbm [shape: bf16[128,384], index: 2, kind: input, shape index: {}]   ;;  %s5328_s3 = inlined_call_operand.vmem [shape: f32[1,384], index: 3, kind: input, shape index: {}]   ;;  %s5329_s4 = inlined_call_operand.vmem [shape: f32[1,128], index: 4, kind: input, shape index: {}]   ;;  %s5330_s5 = inlined_call_operand.hbm [shape: bf16[128,384], index: 5, kind: input, shape index: {}]   ;;  %s5331_s6 = inlined_call_operand.hbm [shape: bf16[128,384], index: 6, kind: input, shape index: {}]   ;;  %s5332_s7 = inlined_call_operand.vmem [shape: f32[1,384], index: 7, kind: input, shape index: {}]   ;;  %s5333_s8 = inlined_call_operand.vmem [shape: f32[1,128], index: 8, kind: input, shape index: {}]   ;;  %s5334_s9 = inlined_call_operand.hbm [shape: f32[2,128,128], index: 9, kind: input, shape index: {}]   ;;  %s5335_s10 = inlined_call_operand.vmem [shape: f32[1,128], index: 10, kind: input, shape index: {}]   ;;  %s5336_s11 = inlined_call_operand.hbm [shape: f32[8,128], index: 11, kind: output, shape index: {}]  }
   0x1   :  { %17 = vsyncpa [#allocation8], 0 }
   0x2   :  { %18 = vsyncpa [#allocation11], 0 }
   0x3   :  { %19 = vsyncpa [#allocation6], 0  ;;  %s4159_s17 = smov [#allocation7]   ;;  %s4160_s19 = smov [#allocation4]  }
   0x4   :  { %s45_s18 = sshll.u32 %s4159_s17, 4  ;;  %s29_s20 = sshll.u32 %s4160_s19, 4  ;;  %s46_s18 = int_to_ptr.vmem [resolvable:$true] %s45_s18  ;;  %s4233_s20 = int_to_ptr.vmem [resolvable:$true] %s29_s20 }
   0x5   :  { %s4041_s23 = scalar_lea.hbm %s5330_s5, 3072 }
   0x6   :  { %p4042_p0 = scmp.ne.s32.totalorder %s5330_s5, %s4041_s23  ;;  %p4045_p1 = scmp.lt.u32.totalorder %s4041_s23, %s5330_s5 }
   0x8   :  { %p4047_p2 = pnand %p4045_p1, %p4042_p0 }
   0xa   :  { %4050 = shalt.err (!%p4047_p2)
}
   0xb   :  { %s4051_s28 = scalar_lea.vmem %s46_s18, 3072  ;;  %p4056_p4 = scmp.lt.s32.totalorder %s46_s18, %s46_s18 }
   0xc   :  { %p4052_p3 = scmp.ne.s32.totalorder %s46_s18, %s4051_s28  ;;  %p4057_p5 = scmp.lt.s32.totalorder %s4051_s28, %s4051_s28 }
   0xe   :  { %p4058_p6 = por %p4057_p5, %p4056_p4 }
  0x10   :  { %p4059_p7 = pnand %p4058_p6, %p4052_p3 }
  0x12   :  { %4062 = shalt.err (!%p4059_p7)
}
  0x13   :  { %s4161_s29 = smov 192   ;;  %s4162_s30 = smov 12  }
  0x14   :  { %51 = dma.hbm_to_vmem [thread:$0]  %s5330_s5, 3072, %s46_s18, [#allocation8], %s4161_s29, %s4161_s29, %s4162_s30  }
  0x15   :  { %s4063_s16 = scalar_lea.hbm %s5327_s2, 3072 }
  0x16   :  { %p4064_p8 = scmp.ne.s32.totalorder %s5327_s2, %s4063_s16  ;;  %p4067_p9 = scmp.lt.u32.totalorder %s4063_s16, %s5327_s2 }
  0x18   :  { %p4069_p10 = pnand %p4067_p9, %p4064_p8 }
  0x1a   :  { %4072 = shalt.err (!%p4069_p10)
}
  0x1b   :  { %s4073_s23 = scalar_lea.vmem %s4233_s20, 3072  ;;  %p4078_p12 = scmp.lt.s32.totalorder %s4233_s20, %s4233_s20 }
  0x1c   :  { %p4074_p11 = scmp.ne.s32.totalorder %s4233_s20, %s4073_s23  ;;  %p4079_p13 = scmp.lt.s32.totalorder %s4073_s23, %s4073_s23 }
  0x1e   :  { %p4080_p0 = por %p4079_p13, %p4078_p12 }
  0x20   :  { %p4081_p1 = pnand %p4080_p0, %p4074_p11 }
  0x22   :  { %4084 = shalt.err (!%p4081_p1)
}
  0x23   :  { %35 = dma.hbm_to_vmem [thread:$0]  %s5327_s2, 3072, %s4233_s20, [#allocation5], %s4161_s29, %s4161_s29, %s4162_s30  }
  0x24   :  { %s4163_s24 = smov [#allocation9]   ;;  %s4164_s26 = smov [#allocation10]  }
  0x25   :  { %s57_s25 = sshll.u32 %s4163_s24, 4  ;;  %s73_s27 = sshll.u32 %s4164_s26, 4  ;;  %s58_s25 = int_to_ptr.vmem [resolvable:$true] %s57_s25  ;;  %s4270_s27 = int_to_ptr.vmem [resolvable:$true] %s73_s27 }
  0x26   :  { %s4085_s13 = scalar_lea.hbm %s5331_s6, 3072 }
  0x27   :  { %p4086_p2 = scmp.ne.s32.totalorder %s5331_s6, %s4085_s13  ;;  %p4089_p3 = scmp.lt.u32.totalorder %s4085_s13, %s5331_s6 }
  0x29   :  { %p4091_p4 = pnand %p4089_p3, %p4086_p2 }
  0x2b   :  { %4094 = shalt.err (!%p4091_p4)
}
  0x2c   :  { %s4095_s2 = scalar_lea.vmem %s58_s25, 3072  ;;  %p4100_p6 = scmp.lt.s32.totalorder %s58_s25, %s58_s25 }
  0x2d   :  { %p4096_p5 = scmp.ne.s32.totalorder %s58_s25, %s4095_s2  ;;  %p4101_p7 = scmp.lt.s32.totalorder %s4095_s2, %s4095_s2 }
  0x2f   :  { %p4102_p8 = por %p4101_p7, %p4100_p6 }
  0x31   :  { %p4103_p9 = pnand %p4102_p8, %p4096_p5 }
  0x33   :  { %4106 = shalt.err (!%p4103_p9)
}
  0x34   :  { %63 = dma.hbm_to_vmem [thread:$0]  %s5331_s6, 3072, %s58_s25, [#allocation8], %s4161_s29, %s4161_s29, %s4162_s30  }
  0x35   :  { %s4107_s23 = scalar_lea.hbm %s5334_s9, 4096 }
  0x36   :  { %p4108_p10 = scmp.ne.s32.totalorder %s5334_s9, %s4107_s23  ;;  %p4111_p11 = scmp.lt.u32.totalorder %s4107_s23, %s5334_s9 }
  0x38   :  { %p4113_p12 = pnand %p4111_p11, %p4108_p10 }
  0x3a   :  { %4116 = shalt.err (!%p4113_p12)
}
  0x3b   :  { %s4117_s28 = scalar_lea.vmem %s4270_s27, 4096  ;;  %p4122_p0 = scmp.lt.s32.totalorder %s4270_s27, %s4270_s27 }
  0x3c   :  { %p4118_p13 = scmp.ne.s32.totalorder %s4270_s27, %s4117_s28  ;;  %p4123_p1 = scmp.lt.s32.totalorder %s4117_s28, %s4117_s28 }
  0x3e   :  { %p4124_p2 = por %p4123_p1, %p4122_p0 }
  0x40   :  { %p4125_p3 = pnand %p4124_p2, %p4118_p13 }
  0x42   :  { %4128 = shalt.err (!%p4125_p3)
}
  0x43   :  { %s4165_s6 = smov 128   ;;  %s4166_s29 = smov 8  }
  0x44   :  { %79 = dma.hbm_to_vmem [thread:$0]  %s5334_s9, 4096, %s4270_s27, [#allocation11], %s4165_s6, %s4165_s6, %s4166_s29  }
  0x45   :  { %4151 = dma.done.wait [#allocation5], 3072  }
  0x46   :  { %4152 = vsyncadd [#allocation5], 4294964224 }
  0x47   :  { %4153 = dma.done.wait [#allocation8], 6144  }
  0x48   :  { %4154 = vsyncadd [#allocation8], 4294961152 }
  0x49   :  { %4155 = dma.done.wait [#allocation11], 4096  }
  0x4a   :  { %4156 = vsyncadd [#allocation11], 4294963200  ;;  %v139_v0 = vlaneseq  ;;  %v4167_v1 = vmov 1983009808   ;;  %v5340_v3 = vmov 0   ;;  %vm204_vm0 = vcmask 1041408  }
  0x4b   :  { %v177_v2 = vunpack.c.l.s4 %v4167_v1  ;;  %246 = vmatprep.mubr.bf16.mxu0 %v5340_v3  ;;  %v103_v7 = vld [vmem:[%s5326_s1] sm:$0x3f]  ;;  %vm191_vm1 = vcmask 31744   ;;  %v4314_v13 = vld [vmem:[#allocation4 + $0x4] ss:$12 sps:$4 sm:$0xff]   ;;  %v5342_v18 = vmov 0.0  }
  0x4c   :  { %v4305_v4 = vshrl.u32 %v139_v0, 7  ;;  %v3731_v9 = vld [vmem:[%s5325_s0] sm:$0xff]   ;;  %v175_v10 = vcombine.high %v103_v7, %v103_v7  ;;  %v3738_v19 = vld [vmem:[%s5325_s0 + $0x8] sm:$0xff]   ;;  %v4328_v20 = vld [vmem:[#allocation4 + $0x18] ss:$12 sps:$4 sm:$0xff]   ;;  %vm4170_vm2 = vmmov 0  }
  0x4d   :  { %v178_v5 = vunpack.c.0.s8 %v177_v2  ;;  %3246 = vmatprep.mubr.msk.bf16.mxu1 %vm191_vm1, %v3731_v9  ;;  %v4317_v15 = vld [vmem:[#allocation4] ss:$12 sps:$4 sm:$0xff]   ;;  %v4320_v17 = vld [vmem:[#allocation4 + $0x1c] ss:$12 sps:$4 sm:$0xff]   ;;  %v4359_v29 = vld [vmem:[#allocation4 + $0x64] ss:$12 sps:$4 sm:$0xff]  }
  0x4e   :  { %5347 = vst [vmem:[#allocation17_spill] sm:$0xff] %v4305_v4  ;;  %v3745_v21 = vld [vmem:[%s5325_s0 + $0x10] sm:$0xff]   ;;  %v4335_v22 = vld [vmem:[#allocation4 + $0x34] ss:$12 sps:$4 sm:$0xff]   ;;  %v5339_v43 = vsub.s32 0, %v4305_v4  ;;  %v5338_v45 = vsub.s32 1, %v4305_v4 }
  0x4f   :  { %v181_v6 = vsub.s32 %v178_v5, %v4305_v4  ;;  %v4339_v23 = vld [vmem:[#allocation4 + $0x30] ss:$12 sps:$4 sm:$0xff]   ;;  %v4342_v24 = vld [vmem:[#allocation4 + $0x4c] ss:$12 sps:$4 sm:$0xff]   ;;  %v4345_v25 = vld [vmem:[#allocation4 + $0x8] ss:$12 sps:$4 sm:$0xff]  }
  0x50   :  { %v4347_v26 = vld [vmem:[#allocation4 + $0x48] ss:$12 sps:$4 sm:$0xff]   ;;  %v4351_v27 = vld [vmem:[#allocation4 + $0x20] ss:$12 sps:$4 sm:$0xff]   ;;  %v4366_v31 = vld [vmem:[#allocation4 + $0x38] ss:$12 sps:$4 sm:$0xff]  }
  0x51   :  { %v182_v8 = vrot.slane %v103_v7, %v181_v6  ;;  %v189_v14 = vrot.slane %v175_v10, %v181_v6  ;;  %v3753_v28 = vld [vmem:[%s5325_s0 + $0x18] sm:$0xff]   ;;  %v4371_v32 = vld [vmem:[#allocation4 + $0x7c] ss:$12 sps:$4 sm:$0xff]   ;;  %v4391_v38 = vld [vmem:[#allocation4 + $0xac] ss:$12 sps:$4 sm:$0xff]   ;;  %v5337_v46 = vsub.s32 2, %v4305_v4 }
  0x52   :  { %v4362_v30 = vld [vmem:[#allocation4 + $0x60] ss:$12 sps:$4 sm:$0xff]   ;;  %v4375_v33 = vld [vmem:[#allocation4 + $0x50] ss:$12 sps:$4 sm:$0xff]   ;;  %v4377_v34 = vld [vmem:[#allocation4 + $0x78] ss:$12 sps:$4 sm:$0xff]  }
  0x53   :  { %v190_v11 = vcombine.high %v182_v8, %v182_v8  ;;  %v206_v12 = vsel %vm204_vm0, %v182_v8, 0  ;;  %3716 = vmatprep.subr.msk.bf16.mxu1 %vm204_vm0, %v189_v14  ;;  %v212_v16 = vsel %vm204_vm0, %v189_v14, 0  ;;  %v4380_v35 = vld [vmem:[#allocation4 + $0x94] ss:$12 sps:$4 sm:$0xff]   ;;  %v4389_v37 = vld [vmem:[#allocation4 + $0x90] ss:$12 sps:$4 sm:$0xff]  }
  0x54   :  { %3245 = vmatpush3.bf16.msra.mxu1 %v212_v16  ;;  %v4387_v36 = vld [vmem:[#allocation4 + $0x68] ss:$12 sps:$4 sm:$0xff]   ;;  %v4397_v39 = vld [vmem:[#allocation4 + $0x80] ss:$12 sps:$4 sm:$0xff]   ;;  %v4407_v41 = vld [vmem:[#allocation4 + $0x98] ss:$12 sps:$4 sm:$0xff]  }
  0x55   :  { %2933 = vmatprep.subr.msk.bf16.mxu0 %vm204_vm0, %v190_v11  ;;  %3254 = vmatprep.subr.bf16.mxu1 %v5342_v18  ;;  %v4399_v40 = vld [vmem:[#allocation4 + $0xa8] ss:$12 sps:$4 sm:$0xff]   ;;  %v4412_v42 = vld [vmem:[#allocation4 + $0xb0] ss:$12 sps:$4 sm:$0xff]   ;;  %s4172_s28 = smov [#allocation12]  }
  0x56   :  { %215 = vmatpush1.bf16.msra.mxu0 %v206_v12  ;;  %v136_v44 = vld [vmem:[%s5328_s3] sm:$0x7]  ;;  %s2918_s6 = sshll.u32 %s4172_s28, 4  ;;  %s2919_s6 = int_to_ptr.vmem [resolvable:$true] %s2918_s6 }
  0x57   :  { %507 = vmatprep.subr.bf16.mxu0 %v4314_v13  ;;  %3247 = vmatmul.mubr.msk.bf16.vlgmr.msra.gmra.mrb[0].mxu1 %vm191_vm1, %v3738_v19  ;;  %v142_v47 = vrot.slane %v136_v44, %v5339_v43  ;;  %v146_v48 = vrot.slane %v136_v44, %v5338_v45  ;;  %v150_v49 = vrot.slane %v136_v44, %v5337_v46  ;;  %s4129_s29 = scalar_lea.vmem %s2919_s6, 128  ;;  %p4134_p5 = scmp.lt.s32.totalorder %s2919_s6, %s2919_s6 }
  0x58   :  { %3250 = vmatprep.mubr.msk.bf16.mxu1 %vm191_vm1, %v3745_v21  ;;  %3255 = vmatpush3.bf16.msra.mxu1 %v4345_v25  ;;  %p4130_p4 = scmp.ne.s32.totalorder %s2919_s6, %s4129_s29  ;;  %p4135_p6 = scmp.lt.s32.totalorder %s4129_s29, %s4129_s29 }
  0x59   :  { %2934 = vmatmul.mubr.msk.bf16.vlgmr.msra.gmra.mrb[0].mxu0 %vm191_vm1, %v3731_v9  ;;  %3256 = vmatprep.subr.bf16.mxu1 %v5342_v18 }
  0x5a   :  { %508 = vmatpush1.bf16.msra.mxu0 %v4317_v15  ;;  %256 = vmatprep.mubr.bf16.mxu0 %v5340_v3  ;;  %p4136_p7 = por %p4135_p6, %p4134_p5 }
  0x5b   :  { %509 = vmatprep.subr.bf16.mxu0 %v4320_v17 }
  0x5c   :  { %3257 = vmatpush3.bf16.msra.mxu1 %v4351_v27  ;;  %p4137_p8 = pnand %p4136_p7, %p4130_p4 }
  0x5d   :  { %3258 = vmatprep.subr.bf16.mxu1 %v5342_v18 }
  0x5e   :  { %510 = vmatpush1.bf16.msra.mxu0 %v4328_v20 }
  0x5f   :  { %511 = vmatprep.subr.bf16.mxu0 %v4335_v22  ;;  %3251 = vmatmul.mubr.msk.bf16.gmra.mrb[4].mxu1 %vm191_vm1, %v3753_v28 }
  0x60   :  { %3270 = vmatprep.mubr.msk.bf16.mxu1 %vm4170_vm2, %v5342_v18  ;;  %3259 = vmatpush3.bf16.msra.mxu1 %v4366_v31 }
  0x61   :  { %2935 = vmatmul.mubr.msk.bf16.gmra.mrb[4].mxu0 %vm191_vm1, %v3738_v19  ;;  %3260 = vmatprep.subr.bf16.mxu1 %v5342_v18 }
  0x62   :  { %512 = vmatpush1.bf16.msra.mxu0 %v4339_v23  ;;  %266 = vmatprep.mubr.bf16.mxu0 %v5340_v3 }
  0x63   :  { %513 = vmatprep.subr.bf16.mxu0 %v4342_v24 }
  0x64   :  { %3261 = vmatpush3.bf16.msra.mxu1 %v4375_v33 }
  0x65   :  { %3262 = vmatprep.subr.bf16.mxu1 %v5342_v18 }
  0x66   :  { %514 = vmatpush1.bf16.msra.mxu0 %v4347_v26 }
  0x67   :  { %515 = vmatprep.subr.bf16.mxu0 %v4359_v29 }
  0x68   :  { %3263 = vmatpush3.bf16.msra.mxu1 %v4387_v36 }
  0x69   :  { %2936 = vmatmul.mubr.msk.bf16.gmra.mrb[8].mxu0 %vm191_vm1, %v3745_v21  ;;  %3264 = vmatprep.subr.bf16.mxu1 %v5342_v18 }
  0x6a   :  { %516 = vmatpush1.bf16.msra.mxu0 %v4362_v30  ;;  %276 = vmatprep.mubr.bf16.mxu0 %v5340_v3 }
  0x6b   :  { %517 = vmatprep.subr.bf16.mxu0 %v4371_v32 }
  0x6c   :  { %3265 = vmatpush3.bf16.msra.mxu1 %v4397_v39 }
  0x6d   :  { %3266 = vmatprep.subr.bf16.mxu1 %v5342_v18 }
  0x6e   :  { %518 = vmatpush1.bf16.msra.mxu0 %v4377_v34 }
  0x6f   :  { %519 = vmatprep.subr.bf16.mxu0 %v4380_v35 }
  0x70   :  { %3267 = vmatpush3.bf16.msra.mxu1 %v4407_v41 }
  0x71   :  { %2937 = vmatmul.mubr.msk.bf16.gmra.mrb[12].mxu0 %vm191_vm1, %v3753_v28  ;;  %3268 = vmatprep.subr.bf16.mxu1 %v5342_v18 }
  0x72   :  { %520 = vmatpush1.bf16.msra.mxu0 %v4389_v37  ;;  %539 = vmatprep.mubr.bf16.mxu0 %v5340_v3 }
  0x73   :  { %521 = vmatprep.subr.bf16.mxu0 %v4391_v38 }
  0x74   :  { %3269 = vmatpush3.bf16.msra.mxu1 %v4412_v42 }
  0x75   :  { %3274 = vmatprep.subr.bf16.mxu1 %v5342_v18 }
  0x76   :  { %522 = vmatpush1.bf16.msra.mxu0 %v4399_v40 }
  0x77   :  { %620 = vmatprep.subr.bf16.mxu0 %v4314_v13  ;;  %3271 = vmatmul.mubr.bf16.vlgmr.msra.gmra.mrb[8].mxu1 %v5340_v3 }
  0x78   :  { %3275 = vmatpush3.bf16.msra.mxu1 %v4345_v25  ;;  %3290 = vmatprep.mubr.msk.bf16.mxu1 %vm4170_vm2, %v5342_v18 }
  0x79   :  { %540 = vmatmul.mubr.bf16.vlgmr.msra.gmra.mrb[16].mxu0 %v5340_v3  ;;  %3276 = vmatprep.subr.bf16.mxu1 %v5342_v18 }
  0x7a   :  { %621 = vmatpush1.bf16.msra.mxu0 %v4317_v15  ;;  %652 = vmatprep.mubr.bf16.mxu0 %v5340_v3 }
  0x7b   :  { %622 = vmatprep.subr.bf16.mxu0 %v4320_v17 }
  0x7c   :  { %3277 = vmatpush3.bf16.msra.mxu1 %v4351_v27 }
  0x7d   :  { %3278 = vmatprep.subr.bf16.mxu1 %v5342_v18 }
  0x7e   :  { %623 = vmatpush1.bf16.msra.mxu0 %v4328_v20 }
  0x7f   :  { %624 = vmatprep.subr.bf16.mxu0 %v4335_v22 }
  0x80   :  { %3279 = vmatpush3.bf16.msra.mxu1 %v4366_v31 }
  0x81   :  { %3280 = vmatprep.subr.bf16.mxu1 %v5342_v18 }
  0x82   :  { %625 = vmatpush1.bf16.msra.mxu0 %v4339_v23 }
  0x83   :  { %626 = vmatprep.subr.bf16.mxu0 %v4342_v24 }
  0x84   :  { %3281 = vmatpush3.bf16.msra.mxu1 %v4375_v33 }
  0x85   :  { %3282 = vmatprep.subr.bf16.mxu1 %v5342_v18 }
  0x86   :  { %627 = vmatpush1.bf16.msra.mxu0 %v4347_v26 }
  0x87   :  { %628 = vmatprep.subr.bf16.mxu0 %v4359_v29 }
  0x88   :  { %3283 = vmatpush3.bf16.msra.mxu1 %v4387_v36 }
  0x89   :  { %3284 = vmatprep.subr.bf16.mxu1 %v5342_v18 }
  0x8a   :  { %629 = vmatpush1.bf16.msra.mxu0 %v4362_v30 }
  0x8b   :  { %630 = vmatprep.subr.bf16.mxu0 %v4371_v32 }
  0x8c   :  { %3285 = vmatpush3.bf16.msra.mxu1 %v4397_v39 }
  0x8d   :  { %3286 = vmatprep.subr.bf16.mxu1 %v5342_v18 }
  0x8e   :  { %631 = vmatpush1.bf16.msra.mxu0 %v4377_v34 }
  0x8f   :  { %632 = vmatprep.subr.bf16.mxu0 %v4380_v35 }
  0x90   :  { %3287 = vmatpush3.bf16.msra.mxu1 %v4407_v41 }
  0x91   :  { %3288 = vmatprep.subr.bf16.mxu1 %v5342_v18 }
  0x92   :  { %633 = vmatpush1.bf16.msra.mxu0 %v4389_v37 }
  0x93   :  { %634 = vmatprep.subr.bf16.mxu0 %v4391_v38 }
  0x94   :  { %3289 = vmatpush3.bf16.msra.mxu1 %v4412_v42 }
  0x95   :  { %3294 = vmatprep.subr.bf16.mxu1 %v5342_v18 }
  0x96   :  { %635 = vmatpush1.bf16.msra.mxu0 %v4399_v40 }
  0x97   :  { %727 = vmatprep.subr.bf16.mxu0 %v4314_v13 }
 0x12a   :  { %v3248_v55 = vpop.f32.mrb[0].mxu1 }
 0x12b   :  { %v4470_v58 = vadd.f32 %v3248_v55, %v150_v49  ;;  %v321_v59 = vpop.f32.mrb[1].mxu1 }
 0x12c   :  { %v248_v50 = vpop.f32.mrb[0].mxu0  ;;  %v322_v61 = vadd.f32 %v321_v59, %v150_v49  ;;  %v3249_v62 = vpop.f32.mrb[2].mxu1 }
 0x12d   :  { %v249_v51 = vadd.f32 %v248_v50, %v142_v47  ;;  %v250_v52 = vpop.f32.mrb[1].mxu0  ;;  %v4474_v63 = vadd.f32 %v3249_v62, %v150_v49  ;;  %v324_v0 = vpop.f32.mrb[3].mxu1 }
 0x12e   :  { %v251_v53 = vadd.f32 %v250_v52, %v146_v48  ;;  %v252_v54 = vpop.f32.mrb[2].mxu0  ;;  %v4476_v1 = vadd.f32 %v324_v0, %v150_v49 }
 0x12f   :  { %v4468_v56 = vadd.f32 %v252_v54, %v142_v47  ;;  %v254_v57 = vpop.f32.mrb[3].mxu0 }
 0x130   :  { %v4472_v60 = vadd.f32 %v254_v57, %v146_v48 }
 0x132   :  { %v3252_v11 = vpop.f32.mrb[4].mxu1 }
 0x133   :  { %v4486_v14 = vadd.f32 %v3252_v11, %v150_v49  ;;  %v337_v16 = vpop.f32.mrb[5].mxu1 }
 0x134   :  { %v258_v2 = vpop.f32.mrb[4].mxu0  ;;  %v4488_v19 = vadd.f32 %v337_v16, %v150_v49  ;;  %v3253_v21 = vpop.f32.mrb[6].mxu1 }
 0x135   :  { %v4478_v5 = vadd.f32 %v258_v2, %v142_v47  ;;  %v260_v6 = vpop.f32.mrb[5].mxu0  ;;  %5348 = vst [vmem:[#allocation18_spill] sm:$0xff] %v4486_v14  ;;  %v4490_v28 = vadd.f32 %v3253_v21, %v150_v49  ;;  %v340_v44 = vpop.f32.mrb[7].mxu1 }
 0x136   :  { %v4480_v7 = vadd.f32 %v260_v6, %v146_v48  ;;  %v262_v8 = vpop.f32.mrb[6].mxu0  ;;  %v4492_v50 = vadd.f32 %v340_v44, %v150_v49 }
 0x137   :  { %v4482_v9 = vadd.f32 %v262_v8, %v142_v47  ;;  %v264_v10 = vpop.f32.mrb[7].mxu0  ;;  %5349 = vst [vmem:[#allocation19_spill] sm:$0xff] %v4490_v28 }
 0x138   :  { %v4484_v12 = vadd.f32 %v264_v10, %v146_v48 }
 0x13c   :  { %v268_v52 = vpop.f32.mrb[8].mxu0 }
 0x13d   :  { %v4494_v54 = vadd.f32 %v268_v52, %v142_v47  ;;  %v270_v55 = vpop.f32.mrb[9].mxu0 }
 0x13e   :  { %v4496_v57 = vadd.f32 %v270_v55, %v146_v48  ;;  %v272_v59 = vpop.f32.mrb[10].mxu0 }
 0x13f   :  { %v4498_v62 = vadd.f32 %v272_v59, %v142_v47  ;;  %v274_v0 = vpop.f32.mrb[11].mxu0 }
 0x140   :  { %v4500_v2 = vadd.f32 %v274_v0, %v146_v48 }
 0x144   :  { %v278_v6 = vpop.f32.mrb[12].mxu0 }
 0x145   :  { %v4502_v8 = vadd.f32 %v278_v6, %v142_v47  ;;  %v280_v10 = vpop.f32.mrb[13].mxu0 }
 0x146   :  { %v4504_v11 = vadd.f32 %v280_v10, %v146_v48  ;;  %v282_v49 = vpop.f32.mrb[14].mxu0 }
 0x147   :  { %v4506_v16 = vadd.f32 %v282_v49, %v142_v47  ;;  %v284_v21 = vpop.f32.mrb[15].mxu0  ;;  %v4513_v47 = vld [vmem:[%s5329_s4] ss:$0 sm:$0xff] }
 0x148   :  { %v4508_v44 = vadd.f32 %v284_v21, %v146_v48 }
 0x14a   :  { %v582_v3 = vpop.f32.mrb[8].mxu1 }
 0x14b   :  { %v3272_v6 = vpop.f32.mrb[9].mxu1 }
 0x14c   :  { %v541_v52 = vpop.f32.mrb[16].mxu0  ;;  %v585_v18 = vpop.f32.mrb[10].mxu1 }
 0x14d   :  { %v588_v55 = vadd.f32 %v541_v52, %v249_v51  ;;  %v543_v46 = vpop.f32.mrb[17].mxu0  ;;  %v3273_v4 = vpop.f32.mrb[11].mxu1 }
 0x14e   :  { %v589_v59 = vadd.f32 %v543_v46, %v251_v53  ;;  %v545_v45 = vpop.f32.mrb[18].mxu0  ;;  %v608_v46 = vadd.f32 %v4513_v47, %v582_v3  ;;  %v5350_v3 = vmov 0.0  }
 0x14f   :  { %v2966_v43 = vmul.f32 -1.442695, %v588_v55  ;;  %v546_v0 = vpop.f32.mrb[19].mxu0 }
 0x150   :  { %v2967_v10 = vmul.f32 -1.442695, %v589_v59 }
 0x151   :  { %3832 = vpow2.f32 %v2966_v43 }
 0x152   :  { %3834 = vpow2.f32 %v2967_v10 }
 0x15b   :  { %v3833_v28 = vpop.eup %3832 }
 0x15c   :  { %v596_v14 = vadd.f32 1.0, %v3833_v28  ;;  %v3835_v45 = vpop.eup %3834 }
 0x15d   :  { %v597_v43 = vadd.f32 1.0, %v3835_v45 }
 0x15e   :  { %3836 = vrcp.f32 %v596_v14 }
 0x168   :  { %v3837_v48 = vpop.eup %3836 }
 0x169   :  { %v609_v51 = vmul.f32 %v3837_v48, %v608_v46 }
 0x16b   :  { %v610_v53 = vadd.f32 %v609_v51, %v322_v61  ;;  %v5351_v61 = vmov 0  }
 0x16d   :  { %3838 = vtanh.f32 %v610_v53 }
 0x16e   :  { %3840 = vrcp.f32 %v597_v43 }
 0x177   :  { %v3839_v4 = vpop.eup %3838 }
 0x178   :  { %v612_v18 = vsub.f32 0.0, %v3839_v4  ;;  %v3841_v49 = vpop.eup %3840 }
 0x17a   :  { %v613_v28 = vmul.f32 %v3841_v49, %v612_v18 }
 0x17c   :  { %v4516_v21 = vadd.f32 %v3839_v4, %v613_v28 }
 0x17e   :  { %v619_v14 = vpack.c.bf16 %v4516_v21, %v4516_v21 }
 0x180   :  { %653 = vmatmul.mubr.bf16.vlgmr.msra.gmra.mrb[20].mxu0 %v619_v14  ;;  %3291 = vmatmul.mubr.bf16.vlgmr.msra.gmra.mrb[12].mxu1 %v619_v14 }
 0x181   :  { %728 = vmatpush1.bf16.msra.mxu0 %v4317_v15  ;;  %3295 = vmatpush3.bf16.msra.mxu1 %v4345_v25 }
 0x182   :  { %729 = vmatprep.subr.bf16.mxu0 %v4320_v17  ;;  %3296 = vmatprep.subr.bf16.mxu1 %v5350_v3 }
 0x183   :  { %759 = vmatprep.mubr.bf16.mxu0 %v5351_v61  ;;  %3310 = vmatprep.mubr.msk.bf16.mxu1 %vm4170_vm2, %v5350_v3 }
 0x185   :  { %730 = vmatpush1.bf16.msra.mxu0 %v4328_v20  ;;  %3297 = vmatpush3.bf16.msra.mxu1 %v4351_v27 }
 0x186   :  { %731 = vmatprep.subr.bf16.mxu0 %v4335_v22  ;;  %3298 = vmatprep.subr.bf16.mxu1 %v5350_v3 }
 0x189   :  { %732 = vmatpush1.bf16.msra.mxu0 %v4339_v23  ;;  %3299 = vmatpush3.bf16.msra.mxu1 %v4366_v31 }
 0x18a   :  { %733 = vmatprep.subr.bf16.mxu0 %v4342_v24  ;;  %3300 = vmatprep.subr.bf16.mxu1 %v5350_v3 }
 0x18d   :  { %734 = vmatpush1.bf16.msra.mxu0 %v4347_v26  ;;  %3301 = vmatpush3.bf16.msra.mxu1 %v4375_v33 }
 0x18e   :  { %735 = vmatprep.subr.bf16.mxu0 %v4359_v29  ;;  %3302 = vmatprep.subr.bf16.mxu1 %v5350_v3 }
 0x191   :  { %736 = vmatpush1.bf16.msra.mxu0 %v4362_v30  ;;  %3303 = vmatpush3.bf16.msra.mxu1 %v4387_v36 }
 0x192   :  { %737 = vmatprep.subr.bf16.mxu0 %v4371_v32  ;;  %3304 = vmatprep.subr.bf16.mxu1 %v5350_v3 }
 0x195   :  { %738 = vmatpush1.bf16.msra.mxu0 %v4377_v34  ;;  %3305 = vmatpush3.bf16.msra.mxu1 %v4397_v39 }
 0x196   :  { %739 = vmatprep.subr.bf16.mxu0 %v4380_v35  ;;  %3306 = vmatprep.subr.bf16.mxu1 %v5350_v3 }
 0x199   :  { %740 = vmatpush1.bf16.msra.mxu0 %v4389_v37  ;;  %3307 = vmatpush3.bf16.msra.mxu1 %v4407_v41 }
 0x19a   :  { %741 = vmatprep.subr.bf16.mxu0 %v4391_v38  ;;  %3308 = vmatprep.subr.bf16.mxu1 %v5350_v3 }
 0x19d   :  { %742 = vmatpush1.bf16.msra.mxu0 %v4399_v40  ;;  %3309 = vmatpush3.bf16.msra.mxu1 %v4412_v42 }
 0x19e   :  { %834 = vmatprep.subr.bf16.mxu0 %v4314_v13  ;;  %3314 = vmatprep.subr.bf16.mxu1 %v5350_v3 }
 0x253   :  { %v654_v52 = vpop.f32.mrb[20].mxu0  ;;  %v695_v55 = vpop.f32.mrb[12].mxu1 }
 0x254   :  { %v701_v59 = vadd.f32 %v654_v52, %v4468_v56  ;;  %v656_v0 = vpop.f32.mrb[21].mxu0  ;;  %v3292_v6 = vpop.f32.mrb[13].mxu1  ;;  %v715_v28 = vadd.f32 %v4513_v47, %v695_v55 }
 0x255   :  { %v702_v10 = vadd.f32 %v656_v0, %v4472_v60  ;;  %v658_v46 = vpop.f32.mrb[22].mxu0  ;;  %v698_v45 = vpop.f32.mrb[14].mxu1 }
 0x256   :  { %v2969_v48 = vmul.f32 -1.442695, %v701_v59  ;;  %v659_v51 = vpop.f32.mrb[23].mxu0  ;;  %v3293_v43 = vpop.f32.mrb[15].mxu1 }
 0x257   :  { %v2970_v53 = vmul.f32 -1.442695, %v702_v10 }
 0x258   :  { %3842 = vpow2.f32 %v2969_v48 }
 0x259   :  { %3844 = vpow2.f32 %v2970_v53 }
 0x262   :  { %v3843_v4 = vpop.eup %3842 }
 0x263   :  { %v709_v18 = vadd.f32 1.0, %v3843_v4  ;;  %v3845_v49 = vpop.eup %3844 }
 0x264   :  { %v710_v6 = vadd.f32 1.0, %v3845_v49 }
 0x265   :  { %3846 = vrcp.f32 %v709_v18 }
 0x26f   :  { %v3847_v14 = vpop.eup %3846 }
 0x270   :  { %v716_v56 = vmul.f32 %v3847_v14, %v715_v28 }
 0x272   :  { %v717_v52 = vadd.f32 %v716_v56, %v4476_v1 }
 0x274   :  { %3848 = vtanh.f32 %v717_v52 }
 0x275   :  { %3850 = vrcp.f32 %v710_v6 }
 0x27e   :  { %v3849_v60 = vpop.eup %3848 }
 0x27f   :  { %v719_v59 = vsub.f32 %v4516_v21, %v3849_v60  ;;  %v3851_v0 = vpop.eup %3850 }
 0x281   :  { %v720_v46 = vmul.f32 %v3851_v0, %v719_v59 }
 0x283   :  { %v4560_v10 = vadd.f32 %v3849_v60, %v720_v46 }
 0x285   :  { %v726_v45 = vpack.c.bf16 %v4560_v10, %v4560_v10 }
 0x287   :  { %760 = vmatmul.mubr.bf16.vlgmr.msra.gmra.mrb[24].mxu0 %v726_v45  ;;  %3311 = vmatmul.mubr.bf16.vlgmr.msra.gmra.mrb[16].mxu1 %v726_v45 }
 0x288   :  { %835 = vmatpush1.bf16.msra.mxu0 %v4317_v15  ;;  %3315 = vmatpush3.bf16.msra.mxu1 %v4345_v25 }
 0x289   :  { %836 = vmatprep.subr.bf16.mxu0 %v4320_v17  ;;  %3316 = vmatprep.subr.bf16.mxu1 %v5350_v3 }
 0x28a   :  { %866 = vmatprep.mubr.bf16.mxu0 %v5351_v61  ;;  %3330 = vmatprep.mubr.msk.bf16.mxu1 %vm4170_vm2, %v5350_v3 }
 0x28c   :  { %837 = vmatpush1.bf16.msra.mxu0 %v4328_v20  ;;  %3317 = vmatpush3.bf16.msra.mxu1 %v4351_v27 }
 0x28d   :  { %838 = vmatprep.subr.bf16.mxu0 %v4335_v22  ;;  %3318 = vmatprep.subr.bf16.mxu1 %v5350_v3 }
 0x290   :  { %839 = vmatpush1.bf16.msra.mxu0 %v4339_v23  ;;  %3319 = vmatpush3.bf16.msra.mxu1 %v4366_v31 }
 0x291   :  { %840 = vmatprep.subr.bf16.mxu0 %v4342_v24  ;;  %3320 = vmatprep.subr.bf16.mxu1 %v5350_v3 }
 0x294   :  { %841 = vmatpush1.bf16.msra.mxu0 %v4347_v26  ;;  %3321 = vmatpush3.bf16.msra.mxu1 %v4375_v33 }
 0x295   :  { %842 = vmatprep.subr.bf16.mxu0 %v4359_v29  ;;  %3322 = vmatprep.subr.bf16.mxu1 %v5350_v3 }
 0x298   :  { %843 = vmatpush1.bf16.msra.mxu0 %v4362_v30  ;;  %3323 = vmatpush3.bf16.msra.mxu1 %v4387_v36 }
 0x299   :  { %844 = vmatprep.subr.bf16.mxu0 %v4371_v32  ;;  %3324 = vmatprep.subr.bf16.mxu1 %v5350_v3 }
 0x29c   :  { %845 = vmatpush1.bf16.msra.mxu0 %v4377_v34  ;;  %3325 = vmatpush3.bf16.msra.mxu1 %v4397_v39 }
 0x29d   :  { %846 = vmatprep.subr.bf16.mxu0 %v4380_v35  ;;  %3326 = vmatprep.subr.bf16.mxu1 %v5350_v3 }
 0x2a0   :  { %847 = vmatpush1.bf16.msra.mxu0 %v4389_v37  ;;  %3327 = vmatpush3.bf16.msra.mxu1 %v4407_v41 }
 0x2a1   :  { %848 = vmatprep.subr.bf16.mxu0 %v4391_v38  ;;  %3328 = vmatprep.subr.bf16.mxu1 %v5350_v3 }
 0x2a4   :  { %849 = vmatpush1.bf16.msra.mxu0 %v4399_v40  ;;  %3329 = vmatpush3.bf16.msra.mxu1 %v4412_v42 }
 0x2a5   :  { %941 = vmatprep.subr.bf16.mxu0 %v4314_v13  ;;  %3334 = vmatprep.subr.bf16.mxu1 %v5350_v3 }
 0x35a   :  { %v761_v1 = vpop.f32.mrb[24].mxu0  ;;  %v802_v55 = vpop.f32.mrb[16].mxu1 }
 0x35b   :  { %v808_v48 = vadd.f32 %v761_v1, %v4478_v5  ;;  %v763_v51 = vpop.f32.mrb[25].mxu0  ;;  %v3312_v43 = vpop.f32.mrb[17].mxu1  ;;  %v822_v59 = vadd.f32 %v4513_v47, %v802_v55 }
 0x35c   :  { %v809_v53 = vadd.f32 %v763_v51, %v4480_v7  ;;  %v765_v4 = vpop.f32.mrb[26].mxu0  ;;  %v805_v18 = vpop.f32.mrb[18].mxu1 }
 0x35d   :  { %v2971_v49 = vmul.f32 -1.442695, %v808_v48  ;;  %v766_v28 = vpop.f32.mrb[27].mxu0  ;;  %v3313_v14 = vpop.f32.mrb[19].mxu1 }
 0x35e   :  { %v2972_v56 = vmul.f32 -1.442695, %v809_v53 }
 0x35f   :  { %3852 = vpow2.f32 %v2971_v49 }
 0x360   :  { %3854 = vpow2.f32 %v2972_v56 }
 0x369   :  { %v3853_v52 = vpop.eup %3852 }
 0x36a   :  { %v816_v6 = vadd.f32 1.0, %v3853_v52  ;;  %v3855_v60 = vpop.eup %3854 }
 0x36b   :  { %v817_v45 = vadd.f32 1.0, %v3855_v60 }
 0x36c   :  { %3856 = vrcp.f32 %v816_v6 }
 0x376   :  { %v3857_v0 = vpop.eup %3856 }
 0x377   :  { %v823_v5 = vmul.f32 %v3857_v0, %v822_v59 }
 0x379   :  { %v824_v46 = vadd.f32 %v823_v5, %v4470_v58 }
 0x37b   :  { %3858 = vtanh.f32 %v824_v46 }
 0x37c   :  { %3860 = vrcp.f32 %v817_v45 }
 0x385   :  { %v3859_v7 = vpop.eup %3858 }
 0x386   :  { %v826_v1 = vsub.f32 %v4560_v10, %v3859_v7  ;;  %v3861_v48 = vpop.eup %3860 }
 0x388   :  { %v827_v51 = vmul.f32 %v3861_v48, %v826_v1 }
 0x38a   :  { %v4604_v43 = vadd.f32 %v3859_v7, %v827_v51 }
 0x38c   :  { %v833_v53 = vpack.c.bf16 %v4604_v43, %v4604_v43 }
 0x38e   :  { %867 = vmatmul.mubr.bf16.vlgmr.msra.gmra.mrb[28].mxu0 %v833_v53  ;;  %3331 = vmatmul.mubr.bf16.vlgmr.msra.gmra.mrb[20].mxu1 %v833_v53 }
 0x38f   :  { %942 = vmatpush1.bf16.msra.mxu0 %v4317_v15  ;;  %3335 = vmatpush3.bf16.msra.mxu1 %v4345_v25 }
 0x390   :  { %943 = vmatprep.subr.bf16.mxu0 %v4320_v17  ;;  %3336 = vmatprep.subr.bf16.mxu1 %v5350_v3 }
 0x391   :  { %973 = vmatprep.mubr.bf16.mxu0 %v5351_v61  ;;  %3350 = vmatprep.mubr.msk.bf16.mxu1 %vm4170_vm2, %v5350_v3 }
 0x393   :  { %944 = vmatpush1.bf16.msra.mxu0 %v4328_v20  ;;  %3337 = vmatpush3.bf16.msra.mxu1 %v4351_v27 }
 0x394   :  { %945 = vmatprep.subr.bf16.mxu0 %v4335_v22  ;;  %3338 = vmatprep.subr.bf16.mxu1 %v5350_v3 }
 0x397   :  { %946 = vmatpush1.bf16.msra.mxu0 %v4339_v23  ;;  %3339 = vmatpush3.bf16.msra.mxu1 %v4366_v31 }
 0x398   :  { %947 = vmatprep.subr.bf16.mxu0 %v4342_v24  ;;  %3340 = vmatprep.subr.bf16.mxu1 %v5350_v3 }
 0x39b   :  { %948 = vmatpush1.bf16.msra.mxu0 %v4347_v26  ;;  %3341 = vmatpush3.bf16.msra.mxu1 %v4375_v33 }
 0x39c   :  { %949 = vmatprep.subr.bf16.mxu0 %v4359_v29  ;;  %3342 = vmatprep.subr.bf16.mxu1 %v5350_v3 }
 0x39f   :  { %950 = vmatpush1.bf16.msra.mxu0 %v4362_v30  ;;  %3343 = vmatpush3.bf16.msra.mxu1 %v4387_v36 }
 0x3a0   :  { %951 = vmatprep.subr.bf16.mxu0 %v4371_v32  ;;  %3344 = vmatprep.subr.bf16.mxu1 %v5350_v3 }
 0x3a3   :  { %952 = vmatpush1.bf16.msra.mxu0 %v4377_v34  ;;  %3345 = vmatpush3.bf16.msra.mxu1 %v4397_v39 }
 0x3a4   :  { %953 = vmatprep.subr.bf16.mxu0 %v4380_v35  ;;  %3346 = vmatprep.subr.bf16.mxu1 %v5350_v3 }
 0x3a7   :  { %954 = vmatpush1.bf16.msra.mxu0 %v4389_v37  ;;  %3347 = vmatpush3.bf16.msra.mxu1 %v4407_v41 }
 0x3a8   :  { %955 = vmatprep.subr.bf16.mxu0 %v4391_v38  ;;  %3348 = vmatprep.subr.bf16.mxu1 %v5350_v3 }
 0x3ab   :  { %956 = vmatpush1.bf16.msra.mxu0 %v4399_v40  ;;  %3349 = vmatpush3.bf16.msra.mxu1 %v4412_v42 }
 0x3ac   :  { %1048 = vmatprep.subr.bf16.mxu0 %v4314_v13  ;;  %3354 = vmatprep.subr.bf16.mxu1 %v5350_v3 }
 0x461   :  { %v868_v58 = vpop.f32.mrb[28].mxu0  ;;  %v909_v55 = vpop.f32.mrb[20].mxu1 }
 0x462   :  { %v915_v4 = vadd.f32 %v868_v58, %v4482_v9  ;;  %v870_v18 = vpop.f32.mrb[29].mxu0  ;;  %v3332_v49 = vpop.f32.mrb[21].mxu1  ;;  %v929_v46 = vadd.f32 %v4513_v47, %v909_v55 }
 0x463   :  { %v916_v28 = vadd.f32 %v870_v18, %v4484_v12  ;;  %v872_v14 = vpop.f32.mrb[30].mxu0  ;;  %v912_v56 = vpop.f32.mrb[22].mxu1 }
 0x464   :  { %v2973_v52 = vmul.f32 -1.442695, %v915_v4  ;;  %v873_v6 = vpop.f32.mrb[31].mxu0  ;;  %v3333_v60 = vpop.f32.mrb[23].mxu1 }
 0x465   :  { %v2974_v59 = vmul.f32 -1.442695, %v916_v28 }
 0x466   :  { %3862 = vpow2.f32 %v2973_v52 }
 0x467   :  { %3864 = vpow2.f32 %v2974_v59 }
 0x470   :  { %v3863_v0 = vpop.eup %3862 }
 0x471   :  { %v923_v5 = vadd.f32 1.0, %v3863_v0  ;;  %v3865_v13 = vpop.eup %3864 }
 0x472   :  { %v924_v1 = vadd.f32 1.0, %v3865_v13  ;;  %v4704_v13 = vld [vmem:[#allocation4 + $0x1c] ss:$12 sps:$4 sm:$0xff]  }
 0x473   :  { %3866 = vrcp.f32 %v923_v5  ;;  %v4698_v5 = vld [vmem:[#allocation4] ss:$12 sps:$4 sm:$0xff]  }
 0x47d   :  { %v3867_v45 = vpop.eup %3866 }
 0x47e   :  { %v930_v9 = vmul.f32 %v3867_v45, %v929_v46  ;;  %v4711_v46 = vld [vmem:[#allocation4 + $0x18] ss:$12 sps:$4 sm:$0xff]   ;;  %v4714_v45 = vld [vmem:[#allocation4 + $0x20] ss:$12 sps:$4 sm:$0xff]  }
 0x480   :  { %v931_v7 = vadd.f32 %v930_v9, %v4474_v63  ;;  %v4717_v9 = vld [vmem:[#allocation4 + $0x34] ss:$12 sps:$4 sm:$0xff]  }
 0x482   :  { %3868 = vtanh.f32 %v931_v7  ;;  %v4721_v7 = vld [vmem:[#allocation4 + $0x30] ss:$12 sps:$4 sm:$0xff]  }
 0x483   :  { %3870 = vrcp.f32 %v924_v1  ;;  %v4724_v1 = vld [vmem:[#allocation4 + $0x38] ss:$12 sps:$4 sm:$0xff]  }
 0x48c   :  { %v3869_v12 = vpop.eup %3868 }
 0x48d   :  { %v933_v48 = vsub.f32 %v4604_v43, %v3869_v12  ;;  %v3871_v51 = vpop.eup %3870 }
 0x48f   :  { %v934_v53 = vmul.f32 %v3871_v51, %v933_v48  ;;  %v4731_v48 = vld [vmem:[#allocation4 + $0x48] ss:$12 sps:$4 sm:$0xff]   ;;  %v4735_v51 = vld [vmem:[#allocation4 + $0x64] ss:$12 sps:$4 sm:$0xff]  }
 0x491   :  { %v4648_v58 = vadd.f32 %v3869_v12, %v934_v53  ;;  %v4727_v12 = vld [vmem:[#allocation4 + $0x4c] ss:$12 sps:$4 sm:$0xff]  }
 0x492   :  { %v4739_v53 = vld [vmem:[#allocation4 + $0x60] ss:$12 sps:$4 sm:$0xff]  }
 0x493   :  { %v940_v4 = vpack.c.bf16 %v4648_v58, %v4648_v58 }
 0x495   :  { %974 = vmatmul.mubr.bf16.vlgmr.msra.gmra.mrb[32].mxu0 %v940_v4  ;;  %3351 = vmatmul.mubr.bf16.vlgmr.msra.gmra.mrb[24].mxu1 %v940_v4  ;;  %v4743_v4 = vld [vmem:[#allocation4 + $0x7c] ss:$12 sps:$4 sm:$0xff]  }
 0x496   :  { %1049 = vmatpush1.bf16.msra.mxu0 %v4317_v15  ;;  %3355 = vmatpush3.bf16.msra.mxu1 %v4345_v25  ;;  %v4685_v15 = vld [vmem:[#allocation4 + $0x4] ss:$12 sps:$4 sm:$0xff]  }
 0x497   :  { %1050 = vmatprep.subr.bf16.mxu0 %v4320_v17  ;;  %3356 = vmatprep.subr.bf16.mxu1 %v5350_v3 }
 0x498   :  { %1080 = vmatprep.mubr.bf16.mxu0 %v5351_v61  ;;  %3370 = vmatprep.mubr.msk.bf16.mxu1 %vm4170_vm2, %v5350_v3 }
 0x49a   :  { %1051 = vmatpush1.bf16.msra.mxu0 %v4328_v20  ;;  %3357 = vmatpush3.bf16.msra.mxu1 %v4351_v27 }
 0x49b   :  { %1052 = vmatprep.subr.bf16.mxu0 %v4335_v22  ;;  %3358 = vmatprep.subr.bf16.mxu1 %v5350_v3 }
 0x49e   :  { %1053 = vmatpush1.bf16.msra.mxu0 %v4339_v23  ;;  %3359 = vmatpush3.bf16.msra.mxu1 %v4366_v31 }
 0x49f   :  { %1054 = vmatprep.subr.bf16.mxu0 %v4342_v24  ;;  %3360 = vmatprep.subr.bf16.mxu1 %v5350_v3 }
 0x4a2   :  { %1055 = vmatpush1.bf16.msra.mxu0 %v4347_v26  ;;  %3361 = vmatpush3.bf16.msra.mxu1 %v4375_v33 }
 0x4a3   :  { %1056 = vmatprep.subr.bf16.mxu0 %v4359_v29  ;;  %3362 = vmatprep.subr.bf16.mxu1 %v5350_v3 }
 0x4a6   :  { %1057 = vmatpush1.bf16.msra.mxu0 %v4362_v30  ;;  %3363 = vmatpush3.bf16.msra.mxu1 %v4387_v36 }
 0x4a7   :  { %1058 = vmatprep.subr.bf16.mxu0 %v4371_v32  ;;  %3364 = vmatprep.subr.bf16.mxu1 %v5350_v3 }
 0x4aa   :  { %1059 = vmatpush1.bf16.msra.mxu0 %v4377_v34  ;;  %3365 = vmatpush3.bf16.msra.mxu1 %v4397_v39 }
 0x4ab   :  { %1060 = vmatprep.subr.bf16.mxu0 %v4380_v35  ;;  %3366 = vmatprep.subr.bf16.mxu1 %v5350_v3 }
 0x4ae   :  { %1061 = vmatpush1.bf16.msra.mxu0 %v4389_v37  ;;  %3367 = vmatpush3.bf16.msra.mxu1 %v4407_v41 }
 0x4af   :  { %1062 = vmatprep.subr.bf16.mxu0 %v4391_v38  ;;  %3368 = vmatprep.subr.bf16.mxu1 %v5350_v3 }
 0x4b2   :  { %1063 = vmatpush1.bf16.msra.mxu0 %v4399_v40  ;;  %3369 = vmatpush3.bf16.msra.mxu1 %v4412_v42 }
 0x4b3   :  { %1155 = vmatprep.subr.bf16.mxu0 %v4685_v15  ;;  %3374 = vmatprep.subr.bf16.mxu1 %v5350_v3 }
 0x568   :  { %v975_v17 = vpop.f32.mrb[32].mxu0  ;;  %v1016_v20 = vpop.f32.mrb[24].mxu1 }
 0x569   :  { %v1022_v22 = vadd.f32 %v975_v17, %v4494_v54  ;;  %v977_v23 = vpop.f32.mrb[33].mxu0  ;;  %v3352_v24 = vpop.f32.mrb[25].mxu1  ;;  %v1036_v49 = vadd.f32 %v4513_v47, %v1016_v20 }
 0x56a   :  { %v1023_v25 = vadd.f32 %v977_v23, %v4496_v57  ;;  %v979_v26 = vpop.f32.mrb[34].mxu0  ;;  %v1019_v27 = vpop.f32.mrb[26].mxu1 }
 0x56b   :  { %v2975_v29 = vmul.f32 -1.442695, %v1022_v22  ;;  %v980_v30 = vpop.f32.mrb[35].mxu0  ;;  %v3353_v31 = vpop.f32.mrb[27].mxu1 }
 0x56c   :  { %v2976_v32 = vmul.f32 -1.442695, %v1023_v25 }
 0x56d   :  { %3872 = vpow2.f32 %v2975_v29 }
 0x56e   :  { %3874 = vpow2.f32 %v2976_v32 }
 0x577   :  { %v3873_v63 = vpop.eup %3872 }
 0x578   :  { %v1030_v55 = vadd.f32 1.0, %v3873_v63  ;;  %v3875_v18 = vpop.eup %3874 }
 0x579   :  { %v1031_v56 = vadd.f32 1.0, %v3875_v18  ;;  %v4008_v18 = vld [vmem:[#allocation4 + $0x78] ss:$12 sps:$4 sm:$0xff]  }
 0x57a   :  { %3876 = vrcp.f32 %v1030_v55  ;;  %v4007_v55 = vld [vmem:[#allocation4 + $0x68] ss:$12 sps:$4 sm:$0xff]  }
 0x584   :  { %v3877_v28 = vpop.eup %3876 }
 0x585   :  { %v1037_v54 = vmul.f32 %v3877_v28, %v1036_v49  ;;  %v4009_v49 = vld [vmem:[#allocation4 + $0x80] ss:$12 sps:$4 sm:$0xff]  }
 0x586   :  { %v4010_v28 = vld [vmem:[#allocation4 + $0x94] ss:$12 sps:$4 sm:$0xff]  }
 0x587   :  { %v1038_v14 = vadd.f32 %v1037_v54, %v4488_v19  ;;  %v4701_v19 = vld [vmem:[#allocation4 + $0x8] ss:$12 sps:$4 sm:$0xff]   ;;  %v4011_v54 = vld [vmem:[#allocation4 + $0x90] ss:$12 sps:$4 sm:$0xff]  }
 0x589   :  { %3878 = vtanh.f32 %v1038_v14  ;;  %v4012_v14 = vld [vmem:[#allocation4 + $0x98] ss:$12 sps:$4 sm:$0xff]  }
 0x58a   :  { %3880 = vrcp.f32 %v1031_v56  ;;  %v4013_v56 = vld [vmem:[#allocation4 + $0xac] ss:$12 sps:$4 sm:$0xff]  }
 0x593   :  { %v3879_v57 = vpop.eup %3878 }
 0x594   :  { %v1040_v52 = vsub.f32 %v4648_v58, %v3879_v57  ;;  %v3881_v6 = vpop.eup %3880 }
 0x596   :  { %v1041_v60 = vmul.f32 %v3881_v6, %v1040_v52  ;;  %v4015_v52 = vld [vmem:[#allocation4 + $0xb0] ss:$12 sps:$4 sm:$0xff]  }
 0x597   :  { %v3770_v6 = vld [vmem:[#allocation7 + $0x4] ss:$12 sps:$4 sm:$0xff]  }
 0x598   :  { %v4694_v59 = vadd.f32 %v3879_v57, %v1041_v60  ;;  %v4014_v57 = vld [vmem:[#allocation4 + $0xa8] ss:$12 sps:$4 sm:$0xff]  }
 0x599   :  { %v3771_v60 = vld [vmem:[#allocation7 + $0x8] ss:$12 sps:$4 sm:$0xff]  }
 0x59a   :  { %v1047_v0 = vpack.c.bf16 %v4694_v59, %v4694_v59 }
 0x59c   :  { %1081 = vmatmul.mubr.bf16.vlgmr.msra.gmra.mrb[36].mxu0 %v1047_v0  ;;  %3371 = vmatmul.mubr.bf16.vlgmr.msra.gmra.mrb[28].mxu1 %v1047_v0 }
 0x59d   :  { %1156 = vmatpush1.bf16.msra.mxu0 %v4698_v5  ;;  %3375 = vmatpush3.bf16.msra.mxu1 %v4701_v19 }
 0x59e   :  { %1157 = vmatprep.subr.bf16.mxu0 %v4704_v13  ;;  %3376 = vmatprep.subr.bf16.mxu1 %v5350_v3 }
 0x59f   :  { %1187 = vmatprep.mubr.bf16.mxu0 %v5351_v61  ;;  %3390 = vmatprep.mubr.msk.bf16.mxu1 %vm4170_vm2, %v5350_v3 }
 0x5a1   :  { %1158 = vmatpush1.bf16.msra.mxu0 %v4711_v46  ;;  %3377 = vmatpush3.bf16.msra.mxu1 %v4714_v45 }
 0x5a2   :  { %1159 = vmatprep.subr.bf16.mxu0 %v4717_v9  ;;  %3378 = vmatprep.subr.bf16.mxu1 %v5350_v3 }
 0x5a5   :  { %1160 = vmatpush1.bf16.msra.mxu0 %v4721_v7  ;;  %3379 = vmatpush3.bf16.msra.mxu1 %v4724_v1 }
 0x5a6   :  { %1161 = vmatprep.subr.bf16.mxu0 %v4727_v12  ;;  %3380 = vmatprep.subr.bf16.mxu1 %v5350_v3 }
 0x5a9   :  { %1162 = vmatpush1.bf16.msra.mxu0 %v4731_v48  ;;  %3381 = vmatpush3.bf16.msra.mxu1 %v4375_v33 }
 0x5aa   :  { %1163 = vmatprep.subr.bf16.mxu0 %v4735_v51  ;;  %3382 = vmatprep.subr.bf16.mxu1 %v5350_v3 }
 0x5ad   :  { %1164 = vmatpush1.bf16.msra.mxu0 %v4739_v53  ;;  %3383 = vmatpush3.bf16.msra.mxu1 %v4387_v36 }
 0x5ae   :  { %1165 = vmatprep.subr.bf16.mxu0 %v4743_v4  ;;  %3384 = vmatprep.subr.bf16.mxu1 %v5350_v3 }
 0x5b1   :  { %1166 = vmatpush1.bf16.msra.mxu0 %v4377_v34  ;;  %3385 = vmatpush3.bf16.msra.mxu1 %v4397_v39 }
 0x5b2   :  { %1167 = vmatprep.subr.bf16.mxu0 %v4380_v35  ;;  %3386 = vmatprep.subr.bf16.mxu1 %v5350_v3 }
 0x5b5   :  { %1168 = vmatpush1.bf16.msra.mxu0 %v4389_v37  ;;  %3387 = vmatpush3.bf16.msra.mxu1 %v4407_v41 }
 0x5b6   :  { %1169 = vmatprep.subr.bf16.mxu0 %v4391_v38  ;;  %3388 = vmatprep.subr.bf16.mxu1 %v5350_v3 }
 0x5b9   :  { %1170 = vmatpush1.bf16.msra.mxu0 %v4399_v40  ;;  %3389 = vmatpush3.bf16.msra.mxu1 %v4412_v42 }
 0x5ba   :  { %1262 = vmatprep.subr.bf16.mxu0 %v4685_v15  ;;  %3394 = vmatprep.subr.bf16.mxu1 %v5350_v3 }
 0x66f   :  { %v1082_v33 = vpop.f32.mrb[36].mxu0  ;;  %v1123_v34 = vpop.f32.mrb[28].mxu1 }
 0x670   :  { %v1129_v35 = vadd.f32 %v1082_v33, %v4498_v62  ;;  %v1084_v36 = vpop.f32.mrb[37].mxu0  ;;  %v3372_v37 = vpop.f32.mrb[29].mxu1  ;;  %v1143_v24 = vadd.f32 %v4513_v47, %v1123_v34 }
 0x671   :  { %v1130_v39 = vadd.f32 %v1084_v36, %v4500_v2  ;;  %v1086_v41 = vpop.f32.mrb[38].mxu0  ;;  %v1126_v38 = vpop.f32.mrb[30].mxu1  ;;  %v5352_v36 = vld [vmem:[#allocation18_spill] sm:$0xff] }
 0x672   :  { %v2977_v17 = vmul.f32 -1.442695, %v1129_v35  ;;  %v1087_v20 = vpop.f32.mrb[39].mxu0  ;;  %v3373_v22 = vpop.f32.mrb[31].mxu1 }
 0x673   :  { %v2978_v40 = vmul.f32 -1.442695, %v1130_v39  ;;  %v3768_v22 = vld [vmem:[#allocation7] ss:$12 sps:$4 sm:$0xff]  }
 0x674   :  { %3882 = vpow2.f32 %v2977_v17 }
 0x675   :  { %3884 = vpow2.f32 %v2978_v40 }
 0x67e   :  { %v3883_v42 = vpop.eup %3882 }
 0x67f   :  { %v1137_v23 = vadd.f32 1.0, %v3883_v42  ;;  %v3885_v15 = vpop.eup %3884  ;;  %v3774_v42 = vld [vmem:[#allocation7 + $0x1c] ss:$12 sps:$4 sm:$0xff]  }
 0x680   :  { %v1138_v27 = vadd.f32 1.0, %v3885_v15  ;;  %v3772_v15 = vld [vmem:[#allocation7 + $0x18] ss:$12 sps:$4 sm:$0xff]  }
 0x681   :  { %3886 = vrcp.f32 %v1137_v23  ;;  %v1373_v23 = vpack.c.bf16 %v4560_v10, %v4516_v21  ;;  %v3780_v21 = vld [vmem:[#allocation7 + $0x48] ss:$12 sps:$4 sm:$0xff]   ;;  %v3786_v10 = vld [vmem:[#allocation7 + $0x64] ss:$12 sps:$4 sm:$0xff]  }
 0x68b   :  { %v3887_v25 = vpop.eup %3886 }
 0x68c   :  { %v1144_v62 = vmul.f32 %v3887_v25, %v1143_v24  ;;  %v3778_v24 = vld [vmem:[#allocation7 + $0x34] ss:$12 sps:$4 sm:$0xff]   ;;  %v3779_v25 = vld [vmem:[#allocation7 + $0x38] ss:$12 sps:$4 sm:$0xff]  }
 0x68e   :  { %v1145_v26 = vadd.f32 %v1144_v62, %v4492_v50  ;;  %v4006_v50 = vld [vmem:[#allocation4 + $0x50] ss:$12 sps:$4 sm:$0xff]  }
 0x68f   :  { %v3776_v62 = vld [vmem:[#allocation7 + $0x30] ss:$12 sps:$4 sm:$0xff]  }
 0x690   :  { %3888 = vtanh.f32 %v1145_v26  ;;  %v3782_v26 = vld [vmem:[#allocation7 + $0x4c] ss:$12 sps:$4 sm:$0xff]  }
 0x691   :  { %3890 = vrcp.f32 %v1138_v27  ;;  %v3783_v27 = vld [vmem:[#allocation7 + $0x50] ss:$12 sps:$4 sm:$0xff]  }
 0x69a   :  { %v3889_v2 = vpop.eup %3888 }
 0x69b   :  { %v1147_v29 = vsub.f32 %v4694_v59, %v3889_v2  ;;  %v3891_v30 = vpop.eup %3890 }
 0x69d   :  { %v1148_v31 = vmul.f32 %v3891_v30, %v1147_v29  ;;  %v3784_v29 = vld [vmem:[#allocation7 + $0x60] ss:$12 sps:$4 sm:$0xff]   ;;  %v3790_v30 = vld [vmem:[#allocation7 + $0x7c] ss:$12 sps:$4 sm:$0xff]  }
 0x69f   :  { %v4764_v32 = vadd.f32 %v3889_v2, %v1148_v31  ;;  %v3787_v2 = vld [vmem:[#allocation7 + $0x68] ss:$12 sps:$4 sm:$0xff]   ;;  %v3791_v31 = vld [vmem:[#allocation7 + $0x80] ss:$12 sps:$4 sm:$0xff]  }
 0x6a1   :  { %v1154_v63 = vpack.c.bf16 %v4764_v32, %v4764_v32 }
 0x6a3   :  { %1188 = vmatmul.mubr.bf16.vlgmr.msra.gmra.mrb[40].mxu0 %v1154_v63  ;;  %3391 = vmatmul.mubr.bf16.vlgmr.msra.gmra.mrb[32].mxu1 %v1154_v63  ;;  %v3788_v63 = vld [vmem:[#allocation7 + $0x78] ss:$12 sps:$4 sm:$0xff]  }
 0x6a4   :  { %1263 = vmatpush1.bf16.msra.mxu0 %v4698_v5  ;;  %3395 = vmatpush3.bf16.msra.mxu1 %v4701_v19 }
 0x6a5   :  { %1264 = vmatprep.subr.bf16.mxu0 %v4704_v13  ;;  %3396 = vmatprep.subr.bf16.mxu1 %v5350_v3 }
 0x6a6   :  { %1294 = vmatprep.mubr.bf16.mxu0 %v5351_v61  ;;  %3410 = vmatprep.mubr.msk.bf16.mxu1 %vm4170_vm2, %v5350_v3 }
 0x6a8   :  { %1265 = vmatpush1.bf16.msra.mxu0 %v4711_v46  ;;  %3397 = vmatpush3.bf16.msra.mxu1 %v4714_v45 }
 0x6a9   :  { %1266 = vmatprep.subr.bf16.mxu0 %v4717_v9  ;;  %3398 = vmatprep.subr.bf16.mxu1 %v5350_v3 }
 0x6ac   :  { %1267 = vmatpush1.bf16.msra.mxu0 %v4721_v7  ;;  %3399 = vmatpush3.bf16.msra.mxu1 %v4724_v1 }
 0x6ad   :  { %1268 = vmatprep.subr.bf16.mxu0 %v4727_v12  ;;  %3400 = vmatprep.subr.bf16.mxu1 %v5350_v3 }
 0x6b0   :  { %1269 = vmatpush1.bf16.msra.mxu0 %v4731_v48  ;;  %3401 = vmatpush3.bf16.msra.mxu1 %v4006_v50  ;;  %v3794_v50 = vld [vmem:[#allocation7 + $0x94] ss:$12 sps:$4 sm:$0xff]  }
 0x6b1   :  { %1270 = vmatprep.subr.bf16.mxu0 %v4735_v51  ;;  %3402 = vmatprep.subr.bf16.mxu1 %v5350_v3 }
 0x6b4   :  { %1271 = vmatpush1.bf16.msra.mxu0 %v4739_v53  ;;  %3403 = vmatpush3.bf16.msra.mxu1 %v4007_v55  ;;  %v3795_v55 = vld [vmem:[#allocation7 + $0x98] ss:$12 sps:$4 sm:$0xff]  }
 0x6b5   :  { %1272 = vmatprep.subr.bf16.mxu0 %v4743_v4  ;;  %3404 = vmatprep.subr.bf16.mxu1 %v5350_v3 }
 0x6b8   :  { %1273 = vmatpush1.bf16.msra.mxu0 %v4008_v18  ;;  %3405 = vmatpush3.bf16.msra.mxu1 %v4009_v49  ;;  %v3792_v18 = vld [vmem:[#allocation7 + $0x90] ss:$12 sps:$4 sm:$0xff]   ;;  %v3798_v49 = vld [vmem:[#allocation7 + $0xac] ss:$12 sps:$4 sm:$0xff]  }
 0x6b9   :  { %1274 = vmatprep.subr.bf16.mxu0 %v4010_v28  ;;  %3406 = vmatprep.subr.bf16.mxu1 %v5350_v3  ;;  %v3799_v28 = vld [vmem:[#allocation7 + $0xb0] ss:$12 sps:$4 sm:$0xff]  }
 0x6bc   :  { %1275 = vmatpush1.bf16.msra.mxu0 %v4011_v54  ;;  %3407 = vmatpush3.bf16.msra.mxu1 %v4012_v14  ;;  %v3796_v54 = vld [vmem:[#allocation7 + $0xa8] ss:$12 sps:$4 sm:$0xff]   ;;  %v1374_v14 = vpack.c.bf16 %v4648_v58, %v4604_v43  ;;  %v4819_v58 = vld [vmem:[#allocation9 + $0x18] ss:$12 sps:$4 sm:$0xff]  }
 0x6bd   :  { %1276 = vmatprep.subr.bf16.mxu0 %v4013_v56  ;;  %3408 = vmatprep.subr.bf16.mxu1 %v5350_v3  ;;  %v1375_v56 = vpack.c.bf16 %v4764_v32, %v4694_v59  ;;  %v4817_v43 = vld [vmem:[#allocation9 + $0x1c] ss:$12 sps:$4 sm:$0xff]   ;;  %v4823_v59 = vld [vmem:[#allocation9 + $0x34] ss:$12 sps:$4 sm:$0xff]  }
 0x6c0   :  { %1277 = vmatpush1.bf16.msra.mxu0 %v4014_v57  ;;  %3409 = vmatpush3.bf16.msra.mxu1 %v4015_v52  ;;  %v4811_v57 = vld [vmem:[#allocation9 + $0x4] ss:$12 sps:$4 sm:$0xff]   ;;  %v4813_v52 = vld [vmem:[#allocation9] ss:$12 sps:$4 sm:$0xff]  }
 0x6c1   :  { %1587 = vmatprep.subr.bf16.mxu0 %v3770_v6  ;;  %3414 = vmatprep.subr.bf16.mxu1 %v3771_v60  ;;  %v4829_v6 = vld [vmem:[#allocation9 + $0x4c] ss:$12 sps:$4 sm:$0xff]  }
 0x776   :  { %v1189_v0 = vpop.f32.mrb[40].mxu0  ;;  %v1230_v5 = vpop.f32.mrb[32].mxu1 }
 0x777   :  { %v1236_v19 = vadd.f32 %v1189_v0, %v4502_v8  ;;  %v1191_v13 = vpop.f32.mrb[41].mxu0  ;;  %v3392_v46 = vpop.f32.mrb[33].mxu1  ;;  %v1250_v34 = vadd.f32 %v4513_v47, %v1230_v5  ;;  %v3775_v47 = vld [vmem:[#allocation7 + $0x20] ss:$12 sps:$4 sm:$0xff]   ;;  %v4835_v0 = vld [vmem:[#allocation9 + $0x64] ss:$12 sps:$4 sm:$0xff]  }
 0x778   :  { %v1237_v45 = vadd.f32 %v1191_v13, %v4504_v11  ;;  %v1193_v9 = vpop.f32.mrb[42].mxu0  ;;  %v1233_v7 = vpop.f32.mrb[34].mxu1  ;;  %v4837_v5 = vld [vmem:[#allocation9 + $0x60] ss:$12 sps:$4 sm:$0xff]   ;;  %v4843_v13 = vld [vmem:[#allocation9 + $0x78] ss:$12 sps:$4 sm:$0xff]  }
 0x779   :  { %v2979_v1 = vmul.f32 -1.442695, %v1236_v19  ;;  %v1194_v12 = vpop.f32.mrb[43].mxu0  ;;  %v3393_v48 = vpop.f32.mrb[35].mxu1  ;;  %v4841_v19 = vld [vmem:[#allocation9 + $0x7c] ss:$12 sps:$4 sm:$0xff]  }
 0x77a   :  { %v2980_v51 = vmul.f32 -1.442695, %v1237_v45  ;;  %v4847_v46 = vld [vmem:[#allocation9 + $0x94] ss:$12 sps:$4 sm:$0xff]   ;;  %v4851_v9 = vld [vmem:[#allocation9 + $0x90] ss:$12 sps:$4 sm:$0xff]  }
 0x77b   :  { %3892 = vpow2.f32 %v2979_v1  ;;  %v4849_v45 = vld [vmem:[#allocation9 + $0x8] ss:$12 sps:$4 sm:$0xff]   ;;  %v4853_v7 = vld [vmem:[#allocation9 + $0xac] ss:$12 sps:$4 sm:$0xff]  }
 0x77c   :  { %3894 = vpow2.f32 %v2980_v51  ;;  %v4857_v1 = vld [vmem:[#allocation9 + $0x20] ss:$12 sps:$4 sm:$0xff]   ;;  %v4861_v12 = vld [vmem:[#allocation9 + $0xa8] ss:$12 sps:$4 sm:$0xff]   ;;  %v4867_v48 = vld [vmem:[#allocation9 + $0x38] ss:$12 sps:$4 sm:$0xff]  }
 0x77d   :  { %v4871_v51 = vld [vmem:[#allocation9 + $0x50] ss:$12 sps:$4 sm:$0xff]  }
 0x785   :  { %v3893_v53 = vpop.eup %3892 }
 0x786   :  { %v1244_v4 = vadd.f32 1.0, %v3893_v53  ;;  %v3895_v33 = vpop.eup %3894  ;;  %v4875_v53 = vld [vmem:[#allocation9 + $0x68] ss:$12 sps:$4 sm:$0xff]  }
 0x787   :  { %v1245_v39 = vadd.f32 1.0, %v3895_v33  ;;  %v4883_v33 = vld [vmem:[#allocation9 + $0x98] ss:$12 sps:$4 sm:$0xff]  }
 0x788   :  { %3896 = vrcp.f32 %v1244_v4  ;;  %v4879_v4 = vld [vmem:[#allocation9 + $0x80] ss:$12 sps:$4 sm:$0xff]  }
 0x792   :  { %v3897_v35 = vpop.eup %3896 }
 0x793   :  { %v1251_v8 = vmul.f32 %v3897_v35, %v1250_v34  ;;  %v4887_v34 = vld [vmem:[#allocation9 + $0xb0] ss:$12 sps:$4 sm:$0xff]  }
 0x795   :  { %v1252_v37 = vadd.f32 %v1251_v8, %v5352_v36 }
 0x797   :  { %3898 = vtanh.f32 %v1252_v37 }
 0x798   :  { %3900 = vrcp.f32 %v1245_v39 }
 0x7a1   :  { %v3899_v11 = vpop.eup %3898 }
 0x7a2   :  { %v1254_v41 = vsub.f32 %v4764_v32, %v3899_v11  ;;  %v3901_v38 = vpop.eup %3900  ;;  %v4825_v32 = vld [vmem:[#allocation9 + $0x30] ss:$12 sps:$4 sm:$0xff]  }
 0x7a4   :  { %v1255_v17 = vmul.f32 %v3901_v38, %v1254_v41 }
 0x7a6   :  { %v4796_v20 = vadd.f32 %v3899_v11, %v1255_v17 }
 0x7a8   :  { %v1261_v40 = vpack.c.bf16 %v4796_v20, %v4796_v20 }
 0x7aa   :  { %1295 = vmatmul.mubr.bf16.vlgmr.msra.gmra.mrb[44].mxu0 %v1261_v40  ;;  %3411 = vmatmul.mubr.bf16.vlgmr.msra.gmra.mrb[36].mxu1 %v1261_v40 }
 0x7ab   :  { %1588 = vmatpush1.bf16.msra.mxu0 %v3768_v22  ;;  %3415 = vmatpush3.bf16.msra.mxu1 %v3771_v60  ;;  %v4831_v60 = vld [vmem:[#allocation9 + $0x48] ss:$12 sps:$4 sm:$0xff]  }
 0x7ac   :  { %3430 = vmatprep.mubr.bf16.mxu1 %v1373_v23  ;;  %1589 = vmatprep.subr.bf16.mxu0 %v3774_v42 }
 0x7ad   :  { %3416 = vmatprep.subr.bf16.mxu1 %v3775_v47  ;;  %1619 = vmatprep.mubr.bf16.mxu0 %v5351_v61 }
 0x7af   :  { %1590 = vmatpush1.bf16.msra.mxu0 %v3772_v15  ;;  %3417 = vmatpush3.bf16.msra.mxu1 %v3775_v47 }
 0x7b0   :  { %1591 = vmatprep.subr.bf16.mxu0 %v3778_v24  ;;  %3418 = vmatprep.subr.bf16.mxu1 %v3779_v25 }
 0x7b3   :  { %1592 = vmatpush1.bf16.msra.mxu0 %v3776_v62  ;;  %3419 = vmatpush3.bf16.msra.mxu1 %v3779_v25 }
 0x7b4   :  { %1593 = vmatprep.subr.bf16.mxu0 %v3782_v26  ;;  %3420 = vmatprep.subr.bf16.mxu1 %v3783_v27 }
 0x7b7   :  { %1594 = vmatpush1.bf16.msra.mxu0 %v3780_v21  ;;  %3421 = vmatpush3.bf16.msra.mxu1 %v3783_v27 }
 0x7b8   :  { %1595 = vmatprep.subr.bf16.mxu0 %v3786_v10  ;;  %3422 = vmatprep.subr.bf16.mxu1 %v3787_v2 }
 0x7bb   :  { %1596 = vmatpush1.bf16.msra.mxu0 %v3784_v29  ;;  %3423 = vmatpush3.bf16.msra.mxu1 %v3787_v2 }
 0x7bc   :  { %1597 = vmatprep.subr.bf16.mxu0 %v3790_v30  ;;  %3424 = vmatprep.subr.bf16.mxu1 %v3791_v31 }
 0x7bf   :  { %1598 = vmatpush1.bf16.msra.mxu0 %v3788_v63  ;;  %3425 = vmatpush3.bf16.msra.mxu1 %v3791_v31 }
 0x7c0   :  { %1599 = vmatprep.subr.bf16.mxu0 %v3794_v50  ;;  %3426 = vmatprep.subr.bf16.mxu1 %v3795_v55 }
 0x7c3   :  { %1600 = vmatpush1.bf16.msra.mxu0 %v3792_v18  ;;  %3427 = vmatpush3.bf16.msra.mxu1 %v3795_v55 }
 0x7c4   :  { %1601 = vmatprep.subr.bf16.mxu0 %v3798_v49  ;;  %3428 = vmatprep.subr.bf16.mxu1 %v3799_v28 }
 0x7c7   :  { %1602 = vmatpush1.bf16.msra.mxu0 %v3796_v54  ;;  %3429 = vmatpush3.bf16.msra.mxu1 %v3799_v28 }
 0x7c8   :  { %3438 = vmatprep.subr.bf16.mxu1 %v5350_v3  ;;  %1880 = vmatprep.subr.bf16.mxu0 %v4811_v57 }
 0x7ca   :  { %1620 = vmatmul.mubr.bf16.vlgmr.msra.gmra.mrb[48].mxu0 %v1373_v23  ;;  %3431 = vmatmul.mubr.bf16.vlgmr.msra.gmra.mrb[40].mxu1 %v1374_v14 }
 0x7cb   :  { %3434 = vmatprep.mubr.bf16.mxu1 %v1375_v56  ;;  %1629 = vmatprep.mubr.bf16.mxu0 %v5351_v61 }
 0x7cc   :  { %1881 = vmatpush1.bf16.msra.mxu0 %v4813_v52  ;;  %3439 = vmatpush3.bf16.msra.mxu1 %v4849_v45 }
 0x7cd   :  { %1882 = vmatprep.subr.bf16.mxu0 %v4817_v43  ;;  %3440 = vmatprep.subr.bf16.mxu1 %v5350_v3 }
 0x7d0   :  { %1883 = vmatpush1.bf16.msra.mxu0 %v4819_v58  ;;  %3441 = vmatpush3.bf16.msra.mxu1 %v4857_v1 }
 0x7d1   :  { %1884 = vmatprep.subr.bf16.mxu0 %v4823_v59  ;;  %3442 = vmatprep.subr.bf16.mxu1 %v5350_v3 }
 0x7d2   :  { %1630 = vmatmul.mubr.bf16.gmra.mrb[52].mxu0 %v1374_v14 }
 0x7d3   :  { %1639 = vmatprep.mubr.bf16.mxu0 %v5351_v61 }
 0x7d4   :  { %1885 = vmatpush1.bf16.msra.mxu0 %v4825_v32  ;;  %3443 = vmatpush3.bf16.msra.mxu1 %v4867_v48 }
 0x7d5   :  { %1886 = vmatprep.subr.bf16.mxu0 %v4829_v6  ;;  %3444 = vmatprep.subr.bf16.mxu1 %v5350_v3 }
 0x7d8   :  { %1887 = vmatpush1.bf16.msra.mxu0 %v4831_v60  ;;  %3445 = vmatpush3.bf16.msra.mxu1 %v4871_v51 }
 0x7d9   :  { %1888 = vmatprep.subr.bf16.mxu0 %v4835_v0  ;;  %3446 = vmatprep.subr.bf16.mxu1 %v5350_v3 }
 0x7da   :  { %1640 = vmatmul.mubr.bf16.gmra.mrb[56].mxu0 %v1375_v56 }
 0x7db   :  { %1649 = vmatprep.mubr.bf16.mxu0 %v5351_v61 }
 0x7dc   :  { %1889 = vmatpush1.bf16.msra.mxu0 %v4837_v5  ;;  %3447 = vmatpush3.bf16.msra.mxu1 %v4875_v53 }
 0x7dd   :  { %1890 = vmatprep.subr.bf16.mxu0 %v4841_v19  ;;  %3448 = vmatprep.subr.bf16.mxu1 %v5350_v3 }
 0x7e0   :  { %1891 = vmatpush1.bf16.msra.mxu0 %v4843_v13  ;;  %3449 = vmatpush3.bf16.msra.mxu1 %v4879_v4 }
 0x7e1   :  { %1892 = vmatprep.subr.bf16.mxu0 %v4847_v46  ;;  %3450 = vmatprep.subr.bf16.mxu1 %v5350_v3 }
 0x7e4   :  { %1893 = vmatpush1.bf16.msra.mxu0 %v4851_v9  ;;  %3451 = vmatpush3.bf16.msra.mxu1 %v4883_v33 }
 0x7e5   :  { %1894 = vmatprep.subr.bf16.mxu0 %v4853_v7  ;;  %3452 = vmatprep.subr.bf16.mxu1 %v5350_v3 }
 0x7e8   :  { %1895 = vmatpush1.bf16.msra.mxu0 %v4861_v12  ;;  %3453 = vmatpush3.bf16.msra.mxu1 %v4887_v34 }
 0x7e9   :  { %1992 = vmatprep.subr.bf16.mxu0 %v4811_v57  ;;  %3458 = vmatprep.subr.bf16.mxu1 %v5350_v3 }
 0x87d   :  { %v1296_v35 = vpop.f32.mrb[44].mxu0  ;;  %v1337_v8 = vpop.f32.mrb[36].mxu1 }
 0x87e   :  { %v1343_v36 = vadd.f32 %v1296_v35, %v4506_v16  ;;  %v1298_v37 = vpop.f32.mrb[45].mxu0  ;;  %v3412_v39 = vpop.f32.mrb[37].mxu1  ;;  %v4016_v16 = vld [vmem:[%s5329_s4] ss:$0 sm:$0xff] }
 0x87f   :  { %v1344_v11 = vadd.f32 %v1298_v37, %v4508_v44  ;;  %v1300_v41 = vpop.f32.mrb[46].mxu0  ;;  %v1340_v38 = vpop.f32.mrb[38].mxu1  ;;  %v1357_v24 = vadd.f32 %v4016_v16, %v1337_v8  ;;  %v5353_v44 = vld [vmem:[#allocation19_spill] sm:$0xff] }
 0x880   :  { %v2981_v17 = vmul.f32 -1.442695, %v1343_v36  ;;  %v1301_v22 = vpop.f32.mrb[47].mxu0  ;;  %v3413_v40 = vpop.f32.mrb[39].mxu1 }
 0x881   :  { %v2982_v42 = vmul.f32 -1.442695, %v1344_v11 }
 0x882   :  { %3902 = vpow2.f32 %v2981_v17 }
 0x883   :  { %3904 = vpow2.f32 %v2982_v42 }
 0x88c   :  { %v3903_v47 = vpop.eup %3902 }
 0x88d   :  { %v1351_v23 = vadd.f32 1.0, %v3903_v47  ;;  %v3905_v15 = vpop.eup %3904 }
 0x88e   :  { %v1352_v27 = vadd.f32 1.0, %v3905_v15 }
 0x88f   :  { %3906 = vrcp.f32 %v1351_v23  ;;  %v5360_v23 = vld [vmem:[#allocation17_spill] sm:$0xff] }
 0x890   :  { %v5361_v15 = vsub.s32 0, %v5360_v23 }
 0x899   :  { %v3907_v25 = vpop.eup %3906 }
 0x89a   :  { %v1358_v62 = vmul.f32 %v3907_v25, %v1357_v24 }
 0x89c   :  { %v1359_v26 = vadd.f32 %v1358_v62, %v5353_v44  ;;  %v5363_v62 = vsub.s32 1, %v5360_v23 }
 0x89d   :  { %v4898_v21 = vpop.f32.mrb[48].mxu0  ;;  %v4900_v10 = vpop.f32.mrb[40].mxu1 }
 0x89e   :  { %3908 = vtanh.f32 %v1359_v26  ;;  %v4902_v2 = vpop.f32.mrb[49].mxu0  ;;  %v4904_v29 = vpop.f32.mrb[41].mxu1 }
 0x89f   :  { %v4906_v30 = vpop.f32.mrb[50].mxu0  ;;  %v4908_v31 = vpop.f32.mrb[42].mxu1  ;;  %3910 = vrcp.f32 %v1352_v27 }
 0x8a0   :  { %v4910_v63 = vpop.f32.mrb[51].mxu0  ;;  %v4912_v50 = vpop.f32.mrb[43].mxu1 }
 0x8a5   :  { %v4914_v55 = vpop.f32.mrb[52].mxu0 }
 0x8a6   :  { %v4916_v18 = vpop.f32.mrb[53].mxu0 }
 0x8a7   :  { %v4918_v49 = vpop.f32.mrb[54].mxu0 }
 0x8a8   :  { %v3909_v28 = vpop.eup %3908  ;;  %v4920_v54 = vpop.f32.mrb[55].mxu0 }
 0x8a9   :  { %v1361_v14 = vsub.f32 %v4796_v20, %v3909_v28  ;;  %v3911_v56 = vpop.eup %3910 }
 0x8ab   :  { %v1362_v35 = vmul.f32 %v3911_v56, %v1361_v14 }
 0x8ad   :  { %v4923_v8 = vpop.f32.mrb[56].mxu0  ;;  %v4925_v36 = vadd.f32 %v3909_v28, %v1362_v35 }
 0x8ae   :  { %v4927_v37 = vpop.f32.mrb[57].mxu0 }
 0x8af   :  { %5354 = vst [vmem:[#allocation18_spill] sm:$0xff] %v4925_v36  ;;  %v4929_v39 = vpop.f32.mrb[58].mxu0  ;;  %v1376_v11 = vpack.c.bf16 %v4925_v36, %v4796_v20  ;;  %v1441_v20 = vld [vmem:[%s5332_s7] sm:$0x7] }
 0x8b0   :  { %v4933_v41 = vpop.f32.mrb[59].mxu0  ;;  %v4992_v16 = vrot.slane %v1441_v20, %v5361_v15  ;;  %v5000_v44 = vrot.slane %v1441_v20, %v5363_v62 }
 0x8b1   :  { %1650 = vmatmul.mubr.bf16.gmra.mrb[60].mxu0 %v1376_v11  ;;  %3435 = vmatmul.mubr.bf16.gmra.mrb[44].mxu1 %v1376_v11 }
 0x8b2   :  { %1912 = vmatprep.mubr.bf16.mxu0 %v5351_v61  ;;  %3454 = vmatprep.mubr.msk.bf16.mxu1 %vm4170_vm2, %v5350_v3  ;;  %v1622_v26 = vadd.f32 %v4898_v21, %v4992_v16  ;;  %v1624_v27 = vadd.f32 %v4902_v2, %v5000_v44  ;;  %v5009_v21 = vld [vmem:[%s5333_s8] ss:$0 sm:$0xff]  ;;  %v5364_v2 = vsub.s32 2, %v5360_v23  ;;  %v1628_v23 = vadd.f32 %v4910_v63, %v5000_v44 }
 0x8b9   :  { %1913 = vmatmul.mubr.bf16.vlgmr.msra.gmra.mrb[64].mxu0 %v5351_v61  ;;  %3455 = vmatmul.mubr.bf16.vlgmr.msra.gmra.mrb[48].mxu1 %v5351_v61 }
 0x8ba   :  { %1993 = vmatpush1.bf16.msra.mxu0 %v4813_v52  ;;  %3459 = vmatpush3.bf16.msra.mxu1 %v4849_v45 }
 0x8bb   :  { %1994 = vmatprep.subr.bf16.mxu0 %v4817_v43  ;;  %3460 = vmatprep.subr.bf16.mxu1 %v5350_v3 }
 0x8bc   :  { %2024 = vmatprep.mubr.bf16.mxu0 %v5351_v61  ;;  %3474 = vmatprep.mubr.msk.bf16.mxu1 %vm4170_vm2, %v5350_v3 }
 0x8be   :  { %1995 = vmatpush1.bf16.msra.mxu0 %v4819_v58  ;;  %3461 = vmatpush3.bf16.msra.mxu1 %v4857_v1 }
 0x8bf   :  { %1996 = vmatprep.subr.bf16.mxu0 %v4823_v59  ;;  %3462 = vmatprep.subr.bf16.mxu1 %v5350_v3 }
 0x8c2   :  { %1997 = vmatpush1.bf16.msra.mxu0 %v4825_v32  ;;  %3463 = vmatpush3.bf16.msra.mxu1 %v4867_v48 }
 0x8c3   :  { %1998 = vmatprep.subr.bf16.mxu0 %v4829_v6  ;;  %3464 = vmatprep.subr.bf16.mxu1 %v5350_v3 }
 0x8c6   :  { %1999 = vmatpush1.bf16.msra.mxu0 %v4831_v60  ;;  %3465 = vmatpush3.bf16.msra.mxu1 %v4871_v51 }
 0x8c7   :  { %2000 = vmatprep.subr.bf16.mxu0 %v4835_v0  ;;  %3466 = vmatprep.subr.bf16.mxu1 %v5350_v3 }
 0x8ca   :  { %2001 = vmatpush1.bf16.msra.mxu0 %v4837_v5  ;;  %3467 = vmatpush3.bf16.msra.mxu1 %v4875_v53 }
 0x8cb   :  { %2002 = vmatprep.subr.bf16.mxu0 %v4841_v19  ;;  %3468 = vmatprep.subr.bf16.mxu1 %v5350_v3 }
 0x8ce   :  { %2003 = vmatpush1.bf16.msra.mxu0 %v4843_v13  ;;  %3469 = vmatpush3.bf16.msra.mxu1 %v4879_v4 }
 0x8cf   :  { %2004 = vmatprep.subr.bf16.mxu0 %v4847_v46  ;;  %3470 = vmatprep.subr.bf16.mxu1 %v5350_v3 }
 0x8d2   :  { %2005 = vmatpush1.bf16.msra.mxu0 %v4851_v9  ;;  %3471 = vmatpush3.bf16.msra.mxu1 %v4883_v33 }
 0x8d3   :  { %2006 = vmatprep.subr.bf16.mxu0 %v4853_v7  ;;  %3472 = vmatprep.subr.bf16.mxu1 %v5350_v3 }
 0x8d6   :  { %2007 = vmatpush1.bf16.msra.mxu0 %v4861_v12  ;;  %3473 = vmatpush3.bf16.msra.mxu1 %v4887_v34 }
 0x8d7   :  { %2098 = vmatprep.subr.bf16.mxu0 %v4811_v57  ;;  %3478 = vmatprep.subr.bf16.mxu1 %v5350_v3 }
 0x984   :  { %v4978_v38 = vpop.f32.mrb[60].mxu0  ;;  %v4980_v17 = vpop.f32.mrb[44].mxu1 }
 0x985   :  { %5355 = vst [vmem:[#allocation19_spill] sm:$0xff] %v4978_v38  ;;  %5356 = vst [vmem:[#allocation20_spill] sm:$0xff] %v4980_v17  ;;  %v4982_v22 = vpop.f32.mrb[61].mxu0  ;;  %v4984_v40 = vpop.f32.mrb[45].mxu1 }
 0x986   :  { %5357 = vst [vmem:[#allocation21_spill] sm:$0xff] %v4982_v22  ;;  %v4986_v42 = vpop.f32.mrb[62].mxu0  ;;  %v4988_v47 = vpop.f32.mrb[46].mxu1 }
 0x987   :  { %5358 = vst [vmem:[#allocation22_spill] sm:$0xff] %v4986_v42  ;;  %5359 = vst [vmem:[#allocation23_spill] sm:$0xff] %v4988_v47  ;;  %v4994_v24 = vpop.f32.mrb[63].mxu0  ;;  %v4996_v25 = vpop.f32.mrb[47].mxu1 }
 0x988   :  { %5362 = vst [vmem:[#allocation17_spill] sm:$0xff] %v4994_v24 }
 0x98c   :  { %v1914_v28 = vpop.f32.mrb[64].mxu0  ;;  %v1955_v14 = vpop.f32.mrb[48].mxu1 }
 0x98d   :  { %v1961_v56 = vadd.f32 %v1914_v28, %v1622_v26  ;;  %v1916_v35 = vpop.f32.mrb[65].mxu0  ;;  %v3456_v11 = vpop.f32.mrb[49].mxu1  ;;  %v5013_v26 = vrot.slane %v1441_v20, %v5364_v2 }
 0x98e   :  { %v1962_v15 = vadd.f32 %v1916_v35, %v1624_v27  ;;  %v1918_v47 = vpop.f32.mrb[66].mxu0  ;;  %v1958_v24 = vpop.f32.mrb[50].mxu1 }
 0x98f   :  { %v3031_v42 = vmul.f32 -1.442695, %v1961_v56  ;;  %v1919_v36 = vpop.f32.mrb[67].mxu0  ;;  %v3457_v17 = vpop.f32.mrb[51].mxu1  ;;  %v1981_v47 = vadd.f32 %v5009_v21, %v1955_v14 }
 0x990   :  { %v3032_v62 = vmul.f32 -1.442695, %v1962_v15  ;;  %v1695_v17 = vadd.f32 %v4904_v29, %v5013_v26  ;;  %v1626_v29 = vadd.f32 %v4906_v30, %v4992_v16 }
 0x991   :  { %3912 = vpow2.f32 %v3031_v42 }
 0x992   :  { %3914 = vpow2.f32 %v3032_v62 }
 0x99b   :  { %v3913_v22 = vpop.eup %3912 }
 0x99c   :  { %v1969_v38 = vadd.f32 1.0, %v3913_v22  ;;  %v3915_v24 = vpop.eup %3914 }
 0x99d   :  { %v1970_v22 = vadd.f32 1.0, %v3915_v24 }
 0x99e   :  { %3916 = vrcp.f32 %v1969_v38 }
 0x9a8   :  { %v3917_v36 = vpop.eup %3916 }
 0x9a9   :  { %v1982_v42 = vmul.f32 %v3917_v36, %v1981_v47 }
 0x9ab   :  { %v1983_v27 = vadd.f32 %v1982_v42, %v1695_v17 }
 0x9ad   :  { %3918 = vtanh.f32 %v1983_v27 }
 0x9ae   :  { %3920 = vrcp.f32 %v1970_v22 }
 0x9b7   :  { %v3919_v38 = vpop.eup %3918 }
 0x9b8   :  { %v1985_v28 = vsub.f32 0.0, %v3919_v38  ;;  %v3921_v56 = vpop.eup %3920 }
 0x9ba   :  { %v1986_v35 = vmul.f32 %v3921_v56, %v1985_v28 }
 0x9bc   :  { %v5018_v11 = vadd.f32 %v3919_v38, %v1986_v35 }
 0x9be   :  { %v1991_v20 = vpack.c.bf16 %v5018_v11, %v5018_v11 }
 0x9c0   :  { %2025 = vmatmul.mubr.bf16.vlgmr.msra.gmra.mrb[68].mxu0 %v1991_v20  ;;  %3475 = vmatmul.mubr.bf16.vlgmr.msra.gmra.mrb[52].mxu1 %v1991_v20  ;;  %v1698_v20 = vadd.f32 %v4912_v50, %v5013_v26  ;;  %v1632_v50 = vadd.f32 %v4914_v55, %v4992_v16 }
 0x9c1   :  { %2099 = vmatpush1.bf16.msra.mxu0 %v4813_v52  ;;  %3479 = vmatpush3.bf16.msra.mxu1 %v4849_v45 }
 0x9c2   :  { %2100 = vmatprep.subr.bf16.mxu0 %v4817_v43  ;;  %3480 = vmatprep.subr.bf16.mxu1 %v5350_v3 }
 0x9c3   :  { %2130 = vmatprep.mubr.bf16.mxu0 %v5351_v61  ;;  %3494 = vmatprep.mubr.msk.bf16.mxu1 %vm4170_vm2, %v5350_v3 }
 0x9c5   :  { %2101 = vmatpush1.bf16.msra.mxu0 %v4819_v58  ;;  %3481 = vmatpush3.bf16.msra.mxu1 %v4857_v1 }
 0x9c6   :  { %2102 = vmatprep.subr.bf16.mxu0 %v4823_v59  ;;  %3482 = vmatprep.subr.bf16.mxu1 %v5350_v3 }
 0x9c9   :  { %2103 = vmatpush1.bf16.msra.mxu0 %v4825_v32  ;;  %3483 = vmatpush3.bf16.msra.mxu1 %v4867_v48 }
 0x9ca   :  { %2104 = vmatprep.subr.bf16.mxu0 %v4829_v6  ;;  %3484 = vmatprep.subr.bf16.mxu1 %v5350_v3 }
 0x9cd   :  { %2105 = vmatpush1.bf16.msra.mxu0 %v4831_v60  ;;  %3485 = vmatpush3.bf16.msra.mxu1 %v4871_v51 }
 0x9ce   :  { %2106 = vmatprep.subr.bf16.mxu0 %v4835_v0  ;;  %3486 = vmatprep.subr.bf16.mxu1 %v5350_v3 }
 0x9d1   :  { %2107 = vmatpush1.bf16.msra.mxu0 %v4837_v5  ;;  %3487 = vmatpush3.bf16.msra.mxu1 %v4875_v53 }
 0x9d2   :  { %2108 = vmatprep.subr.bf16.mxu0 %v4841_v19  ;;  %3488 = vmatprep.subr.bf16.mxu1 %v5350_v3 }
 0x9d5   :  { %2109 = vmatpush1.bf16.msra.mxu0 %v4843_v13  ;;  %3489 = vmatpush3.bf16.msra.mxu1 %v4879_v4 }
 0x9d6   :  { %2110 = vmatprep.subr.bf16.mxu0 %v4847_v46  ;;  %3490 = vmatprep.subr.bf16.mxu1 %v5350_v3 }
 0x9d9   :  { %2111 = vmatpush1.bf16.msra.mxu0 %v4851_v9  ;;  %3491 = vmatpush3.bf16.msra.mxu1 %v4883_v33 }
 0x9da   :  { %2112 = vmatprep.subr.bf16.mxu0 %v4853_v7  ;;  %3492 = vmatprep.subr.bf16.mxu1 %v5350_v3 }
 0x9dd   :  { %2113 = vmatpush1.bf16.msra.mxu0 %v4861_v12  ;;  %3493 = vmatpush3.bf16.msra.mxu1 %v4887_v34 }
 0x9de   :  { %2204 = vmatprep.subr.bf16.mxu0 %v4811_v57  ;;  %3498 = vmatprep.subr.bf16.mxu1 %v5350_v3 }
 0xa93   :  { %v2026_v14 = vpop.f32.mrb[68].mxu0  ;;  %v2067_v15 = vpop.f32.mrb[52].mxu1 }
 0xa94   :  { %v2073_v62 = vadd.f32 %v2026_v14, %v1626_v29  ;;  %v2028_v2 = vpop.f32.mrb[69].mxu0  ;;  %v3476_v47 = vpop.f32.mrb[53].mxu1  ;;  %v2087_v63 = vadd.f32 %v5009_v21, %v2067_v15 }
 0xa95   :  { %v2074_v24 = vadd.f32 %v2028_v2, %v1628_v23  ;;  %v2030_v36 = vpop.f32.mrb[70].mxu0  ;;  %v2070_v17 = vpop.f32.mrb[54].mxu1 }
 0xa96   :  { %v3034_v42 = vmul.f32 -1.442695, %v2073_v62  ;;  %v2031_v22 = vpop.f32.mrb[71].mxu0  ;;  %v3477_v27 = vpop.f32.mrb[55].mxu1 }
 0xa97   :  { %v3035_v38 = vmul.f32 -1.442695, %v2074_v24 }
 0xa98   :  { %3922 = vpow2.f32 %v3034_v42 }
 0xa99   :  { %3924 = vpow2.f32 %v3035_v38 }
 0xaa2   :  { %v3923_v28 = vpop.eup %3922 }
 0xaa3   :  { %v2081_v56 = vadd.f32 1.0, %v3923_v28  ;;  %v3925_v30 = vpop.eup %3924 }
 0xaa4   :  { %v2082_v14 = vadd.f32 1.0, %v3925_v30 }
 0xaa5   :  { %3926 = vrcp.f32 %v2081_v56 }
 0xaaf   :  { %v3927_v35 = vpop.eup %3926 }
 0xab0   :  { %v2088_v29 = vmul.f32 %v3927_v35, %v2087_v63 }
 0xab2   :  { %v2089_v23 = vadd.f32 %v2088_v29, %v1698_v20 }
 0xab4   :  { %3928 = vtanh.f32 %v2089_v23 }
 0xab5   :  { %3930 = vrcp.f32 %v2082_v14 }
 0xabe   :  { %v3929_v62 = vpop.eup %3928 }
 0xabf   :  { %v2091_v2 = vsub.f32 %v5018_v11, %v3929_v62  ;;  %v3931_v47 = vpop.eup %3930  ;;  %v1634_v11 = vadd.f32 %v4916_v18, %v5000_v44 }
 0xac1   :  { %v2092_v24 = vmul.f32 %v3931_v47, %v2091_v2  ;;  %v1703_v2 = vadd.f32 %v4900_v10, %v5013_v26  ;;  %v1636_v10 = vadd.f32 %v4918_v49, %v4992_v16 }
 0xac3   :  { %v5065_v36 = vadd.f32 %v3929_v62, %v2092_v24 }
 0xac5   :  { %v2097_v17 = vpack.c.bf16 %v5065_v36, %v5065_v36 }
 0xac7   :  { %2131 = vmatmul.mubr.bf16.vlgmr.msra.gmra.mrb[72].mxu0 %v2097_v17  ;;  %3495 = vmatmul.mubr.bf16.vlgmr.msra.gmra.mrb[56].mxu1 %v2097_v17 }
 0xac8   :  { %2205 = vmatpush1.bf16.msra.mxu0 %v4813_v52  ;;  %3499 = vmatpush3.bf16.msra.mxu1 %v4849_v45 }
 0xac9   :  { %2206 = vmatprep.subr.bf16.mxu0 %v4817_v43  ;;  %3500 = vmatprep.subr.bf16.mxu1 %v5350_v3 }
 0xaca   :  { %2236 = vmatprep.mubr.bf16.mxu0 %v5351_v61  ;;  %3514 = vmatprep.mubr.msk.bf16.mxu1 %vm4170_vm2, %v5350_v3 }
 0xacc   :  { %2207 = vmatpush1.bf16.msra.mxu0 %v4819_v58  ;;  %3501 = vmatpush3.bf16.msra.mxu1 %v4857_v1 }
 0xacd   :  { %2208 = vmatprep.subr.bf16.mxu0 %v4823_v59  ;;  %3502 = vmatprep.subr.bf16.mxu1 %v5350_v3 }
 0xad0   :  { %2209 = vmatpush1.bf16.msra.mxu0 %v4825_v32  ;;  %3503 = vmatpush3.bf16.msra.mxu1 %v4867_v48 }
 0xad1   :  { %2210 = vmatprep.subr.bf16.mxu0 %v4829_v6  ;;  %3504 = vmatprep.subr.bf16.mxu1 %v5350_v3 }
 0xad4   :  { %2211 = vmatpush1.bf16.msra.mxu0 %v4831_v60  ;;  %3505 = vmatpush3.bf16.msra.mxu1 %v4871_v51 }
 0xad5   :  { %2212 = vmatprep.subr.bf16.mxu0 %v4835_v0  ;;  %3506 = vmatprep.subr.bf16.mxu1 %v5350_v3 }
 0xad8   :  { %2213 = vmatpush1.bf16.msra.mxu0 %v4837_v5  ;;  %3507 = vmatpush3.bf16.msra.mxu1 %v4875_v53 }
 0xad9   :  { %2214 = vmatprep.subr.bf16.mxu0 %v4841_v19  ;;  %3508 = vmatprep.subr.bf16.mxu1 %v5350_v3 }
 0xadc   :  { %2215 = vmatpush1.bf16.msra.mxu0 %v4843_v13  ;;  %3509 = vmatpush3.bf16.msra.mxu1 %v4879_v4 }
 0xadd   :  { %2216 = vmatprep.subr.bf16.mxu0 %v4847_v46  ;;  %3510 = vmatprep.subr.bf16.mxu1 %v5350_v3 }
 0xae0   :  { %2217 = vmatpush1.bf16.msra.mxu0 %v4851_v9  ;;  %3511 = vmatpush3.bf16.msra.mxu1 %v4883_v33 }
 0xae1   :  { %2218 = vmatprep.subr.bf16.mxu0 %v4853_v7  ;;  %3512 = vmatprep.subr.bf16.mxu1 %v5350_v3 }
 0xae4   :  { %2219 = vmatpush1.bf16.msra.mxu0 %v4861_v12  ;;  %3513 = vmatpush3.bf16.msra.mxu1 %v4887_v34 }
 0xae5   :  { %2310 = vmatprep.subr.bf16.mxu0 %v4811_v57  ;;  %3518 = vmatprep.subr.bf16.mxu1 %v5350_v3 }
 0xb9a   :  { %v2132_v15 = vpop.f32.mrb[72].mxu0  ;;  %v2173_v42 = vpop.f32.mrb[56].mxu1 }
 0xb9b   :  { %v2179_v22 = vadd.f32 %v2132_v15, %v1632_v50  ;;  %v2134_v27 = vpop.f32.mrb[73].mxu0  ;;  %v3496_v38 = vpop.f32.mrb[57].mxu1  ;;  %v2193_v18 = vadd.f32 %v5009_v21, %v2173_v42 }
 0xb9c   :  { %v2180_v28 = vadd.f32 %v2134_v27, %v1634_v11  ;;  %v2136_v56 = vpop.f32.mrb[74].mxu0  ;;  %v2176_v30 = vpop.f32.mrb[58].mxu1 }
 0xb9d   :  { %v3036_v63 = vmul.f32 -1.442695, %v2179_v22  ;;  %v2137_v35 = vpop.f32.mrb[75].mxu0  ;;  %v3497_v20 = vpop.f32.mrb[59].mxu1 }
 0xb9e   :  { %v3037_v29 = vmul.f32 -1.442695, %v2180_v28 }
 0xb9f   :  { %3932 = vpow2.f32 %v3036_v63 }
 0xba0   :  { %3934 = vpow2.f32 %v3037_v29 }
 0xba9   :  { %v3933_v23 = vpop.eup %3932 }
 0xbaa   :  { %v2187_v14 = vadd.f32 1.0, %v3933_v23  ;;  %v3935_v55 = vpop.eup %3934 }
 0xbab   :  { %v2188_v17 = vadd.f32 1.0, %v3935_v55 }
 0xbac   :  { %3936 = vrcp.f32 %v2187_v14 }
 0xbb6   :  { %v3937_v62 = vpop.eup %3936 }
 0xbb7   :  { %v2194_v47 = vmul.f32 %v3937_v62, %v2193_v18 }
 0xbb9   :  { %v2195_v24 = vadd.f32 %v2194_v47, %v1703_v2 }
 0xbbb   :  { %3938 = vtanh.f32 %v2195_v24  ;;  %v1706_v24 = vadd.f32 %v4908_v31, %v5013_v26  ;;  %v1642_v31 = vadd.f32 %v4923_v8, %v4992_v16 }
 0xbbc   :  { %3940 = vrcp.f32 %v2188_v17 }
 0xbc5   :  { %v3939_v50 = vpop.eup %3938 }
 0xbc6   :  { %v2197_v11 = vsub.f32 %v5065_v36, %v3939_v50  ;;  %v3941_v15 = vpop.eup %3940  ;;  %v1638_v36 = vadd.f32 %v4920_v54, %v5000_v44 }
 0xbc8   :  { %v2198_v22 = vmul.f32 %v3941_v15, %v2197_v11 }
 0xbca   :  { %v5112_v27 = vadd.f32 %v3939_v50, %v2198_v22 }
 0xbcc   :  { %v2203_v38 = vpack.c.bf16 %v5112_v27, %v5112_v27 }
 0xbce   :  { %2237 = vmatmul.mubr.bf16.vlgmr.msra.gmra.mrb[76].mxu0 %v2203_v38  ;;  %3515 = vmatmul.mubr.bf16.vlgmr.msra.gmra.mrb[60].mxu1 %v2203_v38 }
 0xbcf   :  { %2311 = vmatpush1.bf16.msra.mxu0 %v4813_v52  ;;  %3519 = vmatpush3.bf16.msra.mxu1 %v4849_v45 }
 0xbd0   :  { %2312 = vmatprep.subr.bf16.mxu0 %v4817_v43  ;;  %3520 = vmatprep.subr.bf16.mxu1 %v5350_v3 }
 0xbd1   :  { %2342 = vmatprep.mubr.bf16.mxu0 %v5351_v61  ;;  %3534 = vmatprep.mubr.msk.bf16.mxu1 %vm4170_vm2, %v5350_v3 }
 0xbd3   :  { %2313 = vmatpush1.bf16.msra.mxu0 %v4819_v58  ;;  %3521 = vmatpush3.bf16.msra.mxu1 %v4857_v1 }
 0xbd4   :  { %2314 = vmatprep.subr.bf16.mxu0 %v4823_v59  ;;  %3522 = vmatprep.subr.bf16.mxu1 %v5350_v3 }
 0xbd7   :  { %2315 = vmatpush1.bf16.msra.mxu0 %v4825_v32  ;;  %3523 = vmatpush3.bf16.msra.mxu1 %v4867_v48 }
 0xbd8   :  { %2316 = vmatprep.subr.bf16.mxu0 %v4829_v6  ;;  %3524 = vmatprep.subr.bf16.mxu1 %v5350_v3 }
 0xbdb   :  { %2317 = vmatpush1.bf16.msra.mxu0 %v4831_v60  ;;  %3525 = vmatpush3.bf16.msra.mxu1 %v4871_v51 }
 0xbdc   :  { %2318 = vmatprep.subr.bf16.mxu0 %v4835_v0  ;;  %3526 = vmatprep.subr.bf16.mxu1 %v5350_v3 }
 0xbdf   :  { %2319 = vmatpush1.bf16.msra.mxu0 %v4837_v5  ;;  %3527 = vmatpush3.bf16.msra.mxu1 %v4875_v53 }
 0xbe0   :  { %2320 = vmatprep.subr.bf16.mxu0 %v4841_v19  ;;  %3528 = vmatprep.subr.bf16.mxu1 %v5350_v3 }
 0xbe3   :  { %2321 = vmatpush1.bf16.msra.mxu0 %v4843_v13  ;;  %3529 = vmatpush3.bf16.msra.mxu1 %v4879_v4 }
 0xbe4   :  { %2322 = vmatprep.subr.bf16.mxu0 %v4847_v46  ;;  %3530 = vmatprep.subr.bf16.mxu1 %v5350_v3 }
 0xbe7   :  { %2323 = vmatpush1.bf16.msra.mxu0 %v4851_v9  ;;  %3531 = vmatpush3.bf16.msra.mxu1 %v4883_v33 }
 0xbe8   :  { %2324 = vmatprep.subr.bf16.mxu0 %v4853_v7  ;;  %3532 = vmatprep.subr.bf16.mxu1 %v5350_v3 }
 0xbeb   :  { %2325 = vmatpush1.bf16.msra.mxu0 %v4861_v12  ;;  %3533 = vmatpush3.bf16.msra.mxu1 %v4887_v34 }
 0xbec   :  { %2416 = vmatprep.subr.bf16.mxu0 %v4811_v57  ;;  %3538 = vmatprep.subr.bf16.mxu1 %v5350_v3 }
 0xca1   :  { %v2238_v42 = vpop.f32.mrb[76].mxu0  ;;  %v2279_v28 = vpop.f32.mrb[60].mxu1 }
 0xca2   :  { %v2285_v56 = vadd.f32 %v2238_v42, %v1636_v10  ;;  %v2240_v30 = vpop.f32.mrb[77].mxu0  ;;  %v3516_v63 = vpop.f32.mrb[61].mxu1  ;;  %v2299_v54 = vadd.f32 %v5009_v21, %v2279_v28 }
 0xca3   :  { %v2286_v35 = vadd.f32 %v2240_v30, %v1638_v36  ;;  %v2242_v20 = vpop.f32.mrb[78].mxu0  ;;  %v2282_v29 = vpop.f32.mrb[62].mxu1 }
 0xca4   :  { %v3038_v23 = vmul.f32 -1.442695, %v2285_v56  ;;  %v2243_v14 = vpop.f32.mrb[79].mxu0  ;;  %v3517_v55 = vpop.f32.mrb[63].mxu1 }
 0xca5   :  { %v3039_v18 = vmul.f32 -1.442695, %v2286_v35 }
 0xca6   :  { %3942 = vpow2.f32 %v3038_v23 }
 0xca7   :  { %3944 = vpow2.f32 %v3039_v18 }
 0xcb0   :  { %v3943_v62 = vpop.eup %3942 }
 0xcb1   :  { %v2293_v2 = vadd.f32 1.0, %v3943_v62  ;;  %v3945_v49 = vpop.eup %3944 }
 0xcb2   :  { %v2294_v11 = vadd.f32 1.0, %v3945_v49 }
 0xcb3   :  { %3946 = vrcp.f32 %v2293_v2 }
 0xcbd   :  { %v3947_v47 = vpop.eup %3946 }
 0xcbe   :  { %v2300_v17 = vmul.f32 %v3947_v47, %v2299_v54  ;;  %v1711_v47 = vadd.f32 %v4984_v40, %v5013_v26 }
 0xcc0   :  { %v2301_v50 = vadd.f32 %v2300_v17, %v1706_v24 }
 0xcc2   :  { %3948 = vtanh.f32 %v2301_v50 }
 0xcc3   :  { %3950 = vrcp.f32 %v2294_v11 }
 0xccc   :  { %v3949_v15 = vpop.eup %3948 }
 0xccd   :  { %v2303_v22 = vsub.f32 %v5112_v27, %v3949_v15  ;;  %v3951_v38 = vpop.eup %3950  ;;  %v1644_v27 = vadd.f32 %v4927_v37, %v5000_v44 }
 0xccf   :  { %v2304_v10 = vmul.f32 %v3951_v38, %v2303_v22 }
 0xcd1   :  { %v5159_v36 = vadd.f32 %v3949_v15, %v2304_v10 }
 0xcd3   :  { %v2309_v42 = vpack.c.bf16 %v5159_v36, %v5159_v36 }
 0xcd5   :  { %2343 = vmatmul.mubr.bf16.vlgmr.msra.gmra.mrb[80].mxu0 %v2309_v42  ;;  %3535 = vmatmul.mubr.bf16.vlgmr.msra.gmra.mrb[64].mxu1 %v2309_v42 }
 0xcd6   :  { %2417 = vmatpush1.bf16.msra.mxu0 %v4813_v52  ;;  %3539 = vmatpush3.bf16.msra.mxu1 %v4849_v45 }
 0xcd7   :  { %2418 = vmatprep.subr.bf16.mxu0 %v4817_v43  ;;  %3540 = vmatprep.subr.bf16.mxu1 %v5350_v3 }
 0xcd8   :  { %2448 = vmatprep.mubr.bf16.mxu0 %v5351_v61  ;;  %3554 = vmatprep.mubr.msk.bf16.mxu1 %vm4170_vm2, %v5350_v3 }
 0xcda   :  { %2419 = vmatpush1.bf16.msra.mxu0 %v4819_v58  ;;  %3541 = vmatpush3.bf16.msra.mxu1 %v4857_v1 }
 0xcdb   :  { %2420 = vmatprep.subr.bf16.mxu0 %v4823_v59  ;;  %3542 = vmatprep.subr.bf16.mxu1 %v5350_v3 }
 0xcde   :  { %2421 = vmatpush1.bf16.msra.mxu0 %v4825_v32  ;;  %3543 = vmatpush3.bf16.msra.mxu1 %v4867_v48 }
 0xcdf   :  { %2422 = vmatprep.subr.bf16.mxu0 %v4829_v6  ;;  %3544 = vmatprep.subr.bf16.mxu1 %v5350_v3 }
 0xce2   :  { %2423 = vmatpush1.bf16.msra.mxu0 %v4831_v60  ;;  %3545 = vmatpush3.bf16.msra.mxu1 %v4871_v51 }
 0xce3   :  { %2424 = vmatprep.subr.bf16.mxu0 %v4835_v0  ;;  %3546 = vmatprep.subr.bf16.mxu1 %v5350_v3 }
 0xce6   :  { %2425 = vmatpush1.bf16.msra.mxu0 %v4837_v5  ;;  %3547 = vmatpush3.bf16.msra.mxu1 %v4875_v53 }
 0xce7   :  { %2426 = vmatprep.subr.bf16.mxu0 %v4841_v19  ;;  %3548 = vmatprep.subr.bf16.mxu1 %v5350_v3 }
 0xcea   :  { %2427 = vmatpush1.bf16.msra.mxu0 %v4843_v13  ;;  %3549 = vmatpush3.bf16.msra.mxu1 %v4879_v4 }
 0xceb   :  { %2428 = vmatprep.subr.bf16.mxu0 %v4847_v46  ;;  %3550 = vmatprep.subr.bf16.mxu1 %v5350_v3 }
 0xcee   :  { %2429 = vmatpush1.bf16.msra.mxu0 %v4851_v9  ;;  %3551 = vmatpush3.bf16.msra.mxu1 %v4883_v33 }
 0xcef   :  { %2430 = vmatprep.subr.bf16.mxu0 %v4853_v7  ;;  %3552 = vmatprep.subr.bf16.mxu1 %v5350_v3 }
 0xcf2   :  { %2431 = vmatpush1.bf16.msra.mxu0 %v4861_v12  ;;  %3553 = vmatpush3.bf16.msra.mxu1 %v4887_v34 }
 0xcf3   :  { %2522 = vmatprep.subr.bf16.mxu0 %v4811_v57  ;;  %3558 = vmatprep.subr.bf16.mxu1 %v5350_v3 }
 0xda8   :  { %v2344_v28 = vpop.f32.mrb[80].mxu0  ;;  %v2385_v56 = vpop.f32.mrb[64].mxu1 }
 0xda9   :  { %v2391_v30 = vadd.f32 %v2344_v28, %v1642_v31  ;;  %v2346_v63 = vpop.f32.mrb[81].mxu0  ;;  %v3536_v35 = vpop.f32.mrb[65].mxu1  ;;  %v2405_v37 = vadd.f32 %v5009_v21, %v2385_v56  ;;  %v4019_v28 = vld [vmem:[#allocation9 + $0x1c] ss:$12 sps:$4 sm:$0xff]   ;;  %v4020_v56 = vld [vmem:[#allocation9 + $0x20] ss:$12 sps:$4 sm:$0xff]  }
 0xdaa   :  { %v2392_v20 = vadd.f32 %v2346_v63, %v1644_v27  ;;  %v2348_v29 = vpop.f32.mrb[82].mxu0  ;;  %v2388_v23 = vpop.f32.mrb[66].mxu1  ;;  %v4017_v27 = vld [vmem:[#allocation9 + $0x8] ss:$12 sps:$4 sm:$0xff]   ;;  %v4023_v35 = vld [vmem:[#allocation9 + $0x38] ss:$12 sps:$4 sm:$0xff]  }
 0xdab   :  { %v3040_v14 = vmul.f32 -1.442695, %v2391_v30  ;;  %v2349_v55 = vpop.f32.mrb[83].mxu0  ;;  %v3537_v18 = vpop.f32.mrb[67].mxu1  ;;  %v4021_v30 = vld [vmem:[#allocation9 + $0x18] ss:$12 sps:$4 sm:$0xff]  }
 0xdac   :  { %v3041_v62 = vmul.f32 -1.442695, %v2392_v20  ;;  %v4022_v63 = vld [vmem:[#allocation9 + $0x34] ss:$12 sps:$4 sm:$0xff]   ;;  %v4024_v20 = vld [vmem:[#allocation9 + $0x30] ss:$12 sps:$4 sm:$0xff]  }
 0xdad   :  { %3952 = vpow2.f32 %v3040_v14  ;;  %v4025_v29 = vld [vmem:[#allocation9 + $0x4c] ss:$12 sps:$4 sm:$0xff]   ;;  %v4027_v23 = vld [vmem:[#allocation9 + $0x48] ss:$12 sps:$4 sm:$0xff]   ;;  %v4028_v14 = vld [vmem:[#allocation9 + $0x64] ss:$12 sps:$4 sm:$0xff]  }
 0xdae   :  { %3954 = vpow2.f32 %v3041_v62  ;;  %v4029_v55 = vld [vmem:[#allocation9 + $0x68] ss:$12 sps:$4 sm:$0xff]   ;;  %v4030_v18 = vld [vmem:[#allocation9 + $0x60] ss:$12 sps:$4 sm:$0xff]  }
 0xdaf   :  { %v4031_v62 = vld [vmem:[#allocation9 + $0x7c] ss:$12 sps:$4 sm:$0xff]  }
 0xdb7   :  { %v3953_v2 = vpop.eup %3952 }
 0xdb8   :  { %v2399_v49 = vadd.f32 1.0, %v3953_v2  ;;  %v3955_v8 = vpop.eup %3954  ;;  %v4032_v2 = vld [vmem:[#allocation9 + $0x80] ss:$12 sps:$4 sm:$0xff]  }
 0xdb9   :  { %v2400_v50 = vadd.f32 1.0, %v3955_v8  ;;  %v4034_v8 = vld [vmem:[#allocation9 + $0x94] ss:$12 sps:$4 sm:$0xff]  }
 0xdba   :  { %3956 = vrcp.f32 %v2399_v49  ;;  %v4033_v49 = vld [vmem:[#allocation9 + $0x78] ss:$12 sps:$4 sm:$0xff]  }
 0xdc4   :  { %v3957_v54 = vpop.eup %3956 }
 0xdc5   :  { %v2406_v24 = vmul.f32 %v3957_v54, %v2405_v37  ;;  %v4035_v37 = vld [vmem:[#allocation9 + $0x98] ss:$12 sps:$4 sm:$0xff]   ;;  %v4036_v54 = vld [vmem:[#allocation9 + $0x90] ss:$12 sps:$4 sm:$0xff]  }
 0xdc7   :  { %v2407_v17 = vadd.f32 %v2406_v24, %v1711_v47  ;;  %v4037_v47 = vld [vmem:[#allocation9 + $0xac] ss:$12 sps:$4 sm:$0xff]   ;;  %v4038_v24 = vld [vmem:[#allocation9 + $0xb0] ss:$12 sps:$4 sm:$0xff]  }
 0xdc9   :  { %3958 = vtanh.f32 %v2407_v17  ;;  %v4039_v17 = vld [vmem:[#allocation9 + $0xa8] ss:$12 sps:$4 sm:$0xff]  }
 0xdca   :  { %3960 = vrcp.f32 %v2400_v50  ;;  %v4171_v50 = vmov 0.0|0.0  }
 0xdd3   :  { %v3959_v11 = vpop.eup %3958 }
 0xdd4   :  { %v2409_v15 = vsub.f32 %v5159_v36, %v3959_v11  ;;  %v3961_v22 = vpop.eup %3960 }
 0xdd6   :  { %v2410_v38 = vmul.f32 %v3961_v22, %v2409_v15  ;;  %v5366_v22 = vld [vmem:[#allocation21_spill] sm:$0xff] }
 0xdd8   :  { %v5206_v10 = vadd.f32 %v3959_v11, %v2410_v38  ;;  %v5365_v11 = vld [vmem:[#allocation19_spill] sm:$0xff]  ;;  %v1654_v38 = vadd.f32 %v5366_v22, %v5000_v44 }
 0xdd9   :  { %v1652_v15 = vadd.f32 %v5365_v11, %v4992_v16  ;;  %v2749_v11 = vld [vmem:[#allocation10 + $0x90] sm:$0xff] }
 0xdda   :  { %v2415_v42 = vpack.c.bf16 %v5206_v10, %v5206_v10 }
 0xddc   :  { %2449 = vmatmul.mubr.bf16.vlgmr.msra.gmra.mrb[84].mxu0 %v2415_v42  ;;  %3555 = vmatmul.mubr.bf16.vlgmr.msra.gmra.mrb[68].mxu1 %v2415_v42 }
 0xddd   :  { %2523 = vmatpush1.bf16.msra.mxu0 %v4813_v52  ;;  %3559 = vmatpush3.bf16.msra.mxu1 %v4849_v45  ;;  %v1646_v52 = vadd.f32 %v4929_v39, %v4992_v16 }
 0xdde   :  { %2524 = vmatprep.subr.bf16.mxu0 %v4817_v43  ;;  %3560 = vmatprep.subr.bf16.mxu1 %v5350_v3  ;;  %v1648_v43 = vadd.f32 %v4933_v41, %v5000_v44 }
 0xddf   :  { %2554 = vmatprep.mubr.bf16.mxu0 %v5351_v61  ;;  %3574 = vmatprep.mubr.msk.bf16.mxu1 %vm4170_vm2, %v5350_v3 }
 0xde1   :  { %2525 = vmatpush1.bf16.msra.mxu0 %v4819_v58  ;;  %3561 = vmatpush3.bf16.msra.mxu1 %v4857_v1 }
 0xde2   :  { %2526 = vmatprep.subr.bf16.mxu0 %v4823_v59  ;;  %3562 = vmatprep.subr.bf16.mxu1 %v5350_v3 }
 0xde5   :  { %2527 = vmatpush1.bf16.msra.mxu0 %v4825_v32  ;;  %3563 = vmatpush3.bf16.msra.mxu1 %v4867_v48 }
 0xde6   :  { %2528 = vmatprep.subr.bf16.mxu0 %v4829_v6  ;;  %3564 = vmatprep.subr.bf16.mxu1 %v5350_v3 }
 0xde9   :  { %2529 = vmatpush1.bf16.msra.mxu0 %v4831_v60  ;;  %3565 = vmatpush3.bf16.msra.mxu1 %v4871_v51  ;;  %v1714_v51 = vadd.f32 %v4996_v25, %v5013_v26  ;;  %v4018_v25 = vld [vmem:[#allocation9] ss:$12 sps:$4 sm:$0xff]  }
 0xdea   :  { %2530 = vmatprep.subr.bf16.mxu0 %v4835_v0  ;;  %3566 = vmatprep.subr.bf16.mxu1 %v5350_v3 }
 0xded   :  { %2531 = vmatpush1.bf16.msra.mxu0 %v4837_v5  ;;  %3567 = vmatpush3.bf16.msra.mxu1 %v4875_v53 }
 0xdee   :  { %2532 = vmatprep.subr.bf16.mxu0 %v4841_v19  ;;  %3568 = vmatprep.subr.bf16.mxu1 %v5350_v3 }
 0xdf1   :  { %2533 = vmatpush1.bf16.msra.mxu0 %v4843_v13  ;;  %3569 = vmatpush3.bf16.msra.mxu1 %v4879_v4 }
 0xdf2   :  { %2534 = vmatprep.subr.bf16.mxu0 %v4847_v46  ;;  %3570 = vmatprep.subr.bf16.mxu1 %v5350_v3 }
 0xdf5   :  { %2535 = vmatpush1.bf16.msra.mxu0 %v4851_v9  ;;  %3571 = vmatpush3.bf16.msra.mxu1 %v4883_v33 }
 0xdf6   :  { %2536 = vmatprep.subr.bf16.mxu0 %v4853_v7  ;;  %3572 = vmatprep.subr.bf16.mxu1 %v5350_v3 }
 0xdf9   :  { %2537 = vmatpush1.bf16.msra.mxu0 %v4861_v12  ;;  %3573 = vmatpush3.bf16.msra.mxu1 %v4887_v34 }
 0xdfa   :  { %3578 = vmatprep.subr.bf16.mxu1 %v5350_v3  ;;  %2628 = vmatprep.subr.bf16.mxu0 %v4811_v57 }
 0xeaf   :  { %v2450_v58 = vpop.f32.mrb[84].mxu0  ;;  %v2491_v59 = vpop.f32.mrb[68].mxu1 }
 0xeb0   :  { %v2497_v32 = vadd.f32 %v2450_v58, %v1646_v52  ;;  %v2452_v6 = vpop.f32.mrb[85].mxu0  ;;  %v3556_v60 = vpop.f32.mrb[69].mxu1  ;;  %v2511_v12 = vadd.f32 %v5009_v21, %v2491_v59 }
 0xeb1   :  { %v2498_v0 = vadd.f32 %v2452_v6, %v1648_v43  ;;  %v2454_v5 = vpop.f32.mrb[86].mxu0  ;;  %v2494_v19 = vpop.f32.mrb[70].mxu1 }
 0xeb2   :  { %v3042_v13 = vmul.f32 -1.442695, %v2497_v32  ;;  %v2455_v46 = vpop.f32.mrb[87].mxu0  ;;  %v3557_v45 = vpop.f32.mrb[71].mxu1 }
 0xeb3   :  { %v3043_v9 = vmul.f32 -1.442695, %v2498_v0 }
 0xeb4   :  { %3962 = vpow2.f32 %v3042_v13 }
 0xeb5   :  { %3964 = vpow2.f32 %v3043_v9 }
 0xebe   :  { %v3963_v57 = vpop.eup %3962 }
 0xebf   :  { %v2505_v7 = vadd.f32 1.0, %v3963_v57  ;;  %v3965_v1 = vpop.eup %3964 }
 0xec0   :  { %v2506_v33 = vadd.f32 1.0, %v3965_v1 }
 0xec1   :  { %3966 = vrcp.f32 %v2505_v7  ;;  %v5367_v7 = vld [vmem:[#allocation20_spill] sm:$0xff] }
 0xec2   :  { %v1719_v1 = vadd.f32 %v5367_v7, %v5013_v26  ;;  %v5369_v7 = vld [vmem:[#allocation22_spill] sm:$0xff] }
 0xecb   :  { %v3967_v48 = vpop.eup %3966 }
 0xecc   :  { %v2512_v53 = vmul.f32 %v3967_v48, %v2511_v12 }
 0xece   :  { %v2513_v4 = vadd.f32 %v2512_v53, %v1714_v51 }
 0xed0   :  { %3968 = vtanh.f32 %v2513_v4 }
 0xed1   :  { %3970 = vrcp.f32 %v2506_v33 }
 0xeda   :  { %v3969_v34 = vpop.eup %3968 }
 0xedb   :  { %v2515_v39 = vsub.f32 %v5206_v10, %v3969_v34  ;;  %v3971_v41 = vpop.eup %3970 }
 0xedd   :  { %v2516_v40 = vmul.f32 %v3971_v41, %v2515_v39  ;;  %v2730_v39 = vld [vmem:[#allocation10] sm:$0xff]  ;;  %v2731_v41 = vld [vmem:[#allocation10 + $0x8] sm:$0xff] }
 0xedf   :  { %v5253_v36 = vadd.f32 %v3969_v34, %v2516_v40 }
 0xee1   :  { %v2521_v31 = vpack.c.bf16 %v5253_v36, %v5253_v36 }
 0xee3   :  { %2555 = vmatmul.mubr.bf16.vlgmr.msra.gmra.mrb[88].mxu0 %v2521_v31  ;;  %3575 = vmatmul.mubr.bf16.vlgmr.msra.gmra.mrb[72].mxu1 %v2521_v31  ;;  %v3693_v31 = vpack.c.bf16 %v2731_v41, %v2730_v39 }
 0xee4   :  { %3579 = vmatpush3.bf16.msra.mxu1 %v4017_v27  ;;  %2629 = vmatpush1.bf16.msra.mxu0 %v4018_v25  ;;  %v2732_v27 = vld [vmem:[#allocation10 + $0x10] sm:$0xff]  ;;  %v2733_v25 = vld [vmem:[#allocation10 + $0x18] sm:$0xff] }
 0xee5   :  { %3580 = vmatprep.subr.bf16.mxu1 %v5350_v3  ;;  %2630 = vmatprep.subr.bf16.mxu0 %v4019_v28  ;;  %v3696_v28 = vpack.c.bf16 %v2733_v25, %v2732_v27 }
 0xee6   :  { %2660 = vmatprep.mubr.bf16.mxu0 %v5351_v61  ;;  %3594 = vmatprep.mubr.msk.bf16.mxu1 %vm4170_vm2, %v5350_v3  ;;  %v4026_v61 = vld [vmem:[#allocation9 + $0x50] ss:$12 sps:$4 sm:$0xff]  }
 0xee8   :  { %3581 = vmatpush3.bf16.msra.mxu1 %v4020_v56  ;;  %2631 = vmatpush1.bf16.msra.mxu0 %v4021_v30  ;;  %v2735_v56 = vld [vmem:[#allocation10 + $0x28] sm:$0xff] }
 0xee9   :  { %3582 = vmatprep.subr.bf16.mxu1 %v5350_v3  ;;  %2632 = vmatprep.subr.bf16.mxu0 %v4022_v63  ;;  %v2736_v63 = vld [vmem:[#allocation10 + $0x30] sm:$0xff] }
 0xeec   :  { %3583 = vmatpush3.bf16.msra.mxu1 %v4023_v35  ;;  %2633 = vmatpush1.bf16.msra.mxu0 %v4024_v20  ;;  %v2737_v35 = vld [vmem:[#allocation10 + $0x38] sm:$0xff] }
 0xeed   :  { %3584 = vmatprep.subr.bf16.mxu1 %v5350_v3  ;;  %2634 = vmatprep.subr.bf16.mxu0 %v4025_v29  ;;  %v3702_v20 = vpack.c.bf16 %v2737_v35, %v2736_v63  ;;  %v2738_v29 = vld [vmem:[#allocation10 + $0x40] sm:$0xff]  ;;  %v5371_v63 = vld [vmem:[#allocation23_spill] sm:$0xff] }
 0xeee   :  { %v1722_v35 = vadd.f32 %v5371_v63, %v5013_v26 }
 0xef0   :  { %3585 = vmatpush3.bf16.msra.mxu1 %v4026_v61  ;;  %2635 = vmatpush1.bf16.msra.mxu0 %v4027_v23  ;;  %v2739_v61 = vld [vmem:[#allocation10 + $0x48] sm:$0xff] }
 0xef1   :  { %3586 = vmatprep.subr.bf16.mxu1 %v5350_v3  ;;  %2636 = vmatprep.subr.bf16.mxu0 %v4028_v14  ;;  %v3705_v23 = vpack.c.bf16 %v2739_v61, %v2738_v29  ;;  %v2740_v14 = vld [vmem:[#allocation10 + $0x50] sm:$0xff] }
 0xef4   :  { %3587 = vmatpush3.bf16.msra.mxu1 %v4029_v55  ;;  %2637 = vmatpush1.bf16.msra.mxu0 %v4030_v18  ;;  %v2741_v55 = vld [vmem:[#allocation10 + $0x58] sm:$0xff]  ;;  %v2742_v18 = vld [vmem:[#allocation10 + $0x60] sm:$0xff] }
 0xef5   :  { %3588 = vmatprep.subr.bf16.mxu1 %v5350_v3  ;;  %2638 = vmatprep.subr.bf16.mxu0 %v4031_v62  ;;  %v2743_v62 = vld [vmem:[#allocation10 + $0x68] sm:$0xff] }
 0xef8   :  { %3589 = vmatpush3.bf16.msra.mxu1 %v4032_v2  ;;  %2639 = vmatpush1.bf16.msra.mxu0 %v4033_v49  ;;  %v3711_v2 = vpack.c.bf16 %v2743_v62, %v2742_v18  ;;  %v2744_v49 = vld [vmem:[#allocation10 + $0x70] sm:$0xff] }
 0xef9   :  { %3590 = vmatprep.subr.bf16.mxu1 %v5350_v3  ;;  %2640 = vmatprep.subr.bf16.mxu0 %v4034_v8  ;;  %v2745_v8 = vld [vmem:[#allocation10 + $0x78] sm:$0xff] }
 0xefc   :  { %3591 = vmatpush3.bf16.msra.mxu1 %v4035_v37  ;;  %2641 = vmatpush1.bf16.msra.mxu0 %v4036_v54  ;;  %v3714_v37 = vpack.c.bf16 %v2745_v8, %v2744_v49  ;;  %v5368_v54 = vld [vmem:[#allocation18_spill] sm:$0xff]  ;;  %v3048_v8 = vld [vmem:[%s5335_s10] ss:$0 sm:$0xff] }
 0xefd   :  { %3592 = vmatprep.subr.bf16.mxu1 %v5350_v3  ;;  %2642 = vmatprep.subr.bf16.mxu0 %v4037_v47  ;;  %v2747_v47 = vld [vmem:[#allocation10 + $0x80] sm:$0xff] }
 0xf00   :  { %3593 = vmatpush3.bf16.msra.mxu1 %v4038_v24  ;;  %2643 = vmatpush1.bf16.msra.mxu0 %v4039_v17  ;;  %v2748_v24 = vld [vmem:[#allocation10 + $0x88] sm:$0xff] }
 0xf01   :  { %3692 = vmatprep.subr.bf16.mxu1 %v4171_v50  ;;  %3668 = vmatprep.subr.bf16.mxu0 %v4171_v50  ;;  %v3669_v17 = vpack.c.bf16 %v2748_v24, %v2747_v47 }
 0xfb6   :  { %v2556_v10 = vpop.f32.mrb[88].mxu0  ;;  %v2597_v42 = vpop.f32.mrb[72].mxu1 }
 0xfb7   :  { %v2603_v52 = vadd.f32 %v2556_v10, %v1652_v15  ;;  %v2558_v43 = vpop.f32.mrb[89].mxu0  ;;  %v3576_v58 = vpop.f32.mrb[73].mxu1  ;;  %v2617_v9 = vadd.f32 %v5009_v21, %v2597_v42  ;;  %v2750_v15 = vld [vmem:[#allocation10 + $0x98] sm:$0xff]  ;;  %v2752_v10 = vld [vmem:[#allocation10 + $0xa8] sm:$0xff] }
 0xfb8   :  { %v2604_v59 = vadd.f32 %v2558_v43, %v1654_v38  ;;  %v2560_v32 = vpop.f32.mrb[90].mxu0  ;;  %v2600_v6 = vpop.f32.mrb[74].mxu1  ;;  %v3672_v22 = vpack.c.bf16 %v2750_v15, %v2749_v11  ;;  %v2751_v38 = vld [vmem:[#allocation10 + $0xa0] sm:$0xff]  ;;  %v2754_v43 = vld [vmem:[#allocation10 + $0xb8] sm:$0xff] }
 0xfb9   :  { %v3044_v60 = vmul.f32 -1.442695, %v2603_v52  ;;  %v2561_v0 = vpop.f32.mrb[91].mxu0  ;;  %v3577_v5 = vpop.f32.mrb[75].mxu1  ;;  %v3675_v42 = vpack.c.bf16 %v2752_v10, %v2751_v38  ;;  %v2753_v52 = vld [vmem:[#allocation10 + $0xb0] sm:$0xff]  ;;  %v2756_v32 = vld [vmem:[#allocation10 + $0xc8] sm:$0xff] }
 0xfba   :  { %v3045_v19 = vmul.f32 -1.442695, %v2604_v59  ;;  %v3678_v58 = vpack.c.bf16 %v2754_v43, %v2753_v52  ;;  %v2755_v59 = vld [vmem:[#allocation10 + $0xc0] sm:$0xff]  ;;  %v2757_v6 = vld [vmem:[#allocation10 + $0xd0] sm:$0xff]  ;;  %v2758_v0 = vld [vmem:[#allocation10 + $0xd8] sm:$0xff] }
 0xfbb   :  { %3972 = vpow2.f32 %v3044_v60  ;;  %v3681_v60 = vpack.c.bf16 %v2756_v32, %v2755_v59  ;;  %v3684_v5 = vpack.c.bf16 %v2758_v0, %v2757_v6 }
 0xfbc   :  { %3974 = vpow2.f32 %v3045_v19  ;;  %v2759_v19 = vld [vmem:[#allocation10 + $0xe0] sm:$0xff] }
 0xfc5   :  { %v3973_v13 = vpop.eup %3972 }
 0xfc6   :  { %v2611_v46 = vadd.f32 1.0, %v3973_v13  ;;  %v3975_v45 = vpop.eup %3974  ;;  %v2760_v13 = vld [vmem:[#allocation10 + $0xe8] sm:$0xff] }
 0xfc7   :  { %v2612_v51 = vadd.f32 1.0, %v3975_v45  ;;  %v2761_v45 = vld [vmem:[#allocation10 + $0xf0] sm:$0xff] }
 0xfc8   :  { %3976 = vrcp.f32 %v2611_v46  ;;  %v3687_v46 = vpack.c.bf16 %v2760_v13, %v2759_v19 }
 0xfd2   :  { %v3977_v57 = vpop.eup %3976 }
 0xfd3   :  { %v2618_v12 = vmul.f32 %v3977_v57, %v2617_v9  ;;  %v2762_v9 = vld [vmem:[#allocation10 + $0xf8] sm:$0xff] }
 0xfd4   :  { %v3690_v57 = vpack.c.bf16 %v2762_v9, %v2761_v45 }
 0xfd5   :  { %v2619_v48 = vadd.f32 %v2618_v12, %v1719_v1  ;;  %v1656_v1 = vadd.f32 %v5369_v7, %v4992_v16  ;;  %v5370_v12 = vld [vmem:[#allocation17_spill] sm:$0xff] }
 0xfd7   :  { %3978 = vtanh.f32 %v2619_v48  ;;  %v1658_v48 = vadd.f32 %v5370_v12, %v5000_v44  ;;  %v4040_v44 = vld [vmem:[%s5333_s8] ss:$0 sm:$0xff] }
 0xfd8   :  { %3980 = vrcp.f32 %v2612_v51 }
 0xfe1   :  { %v3979_v53 = vpop.eup %3978 }
 0xfe2   :  { %v2621_v4 = vsub.f32 %v5253_v36, %v3979_v53  ;;  %v3981_v33 = vpop.eup %3980  ;;  %v2734_v36 = vld [vmem:[#allocation10 + $0x20] sm:$0xff] }
 0xfe3   :  { %v3699_v30 = vpack.c.bf16 %v2735_v56, %v2734_v36 }
 0xfe4   :  { %v2622_v34 = vmul.f32 %v3981_v33, %v2621_v4 }
 0xfe6   :  { %v5277_v40 = vadd.f32 %v3979_v53, %v2622_v34 }
 0xfe8   :  { %v2627_v21 = vpack.c.bf16 %v5277_v40, %v5277_v40 }
 0xfea   :  { %2661 = vmatmul.mubr.bf16.vlgmr.msra.gmra.mrb[92].mxu0 %v2627_v21  ;;  %3595 = vmatmul.mubr.bf16.vlgmr.msra.gmra.mrb[76].mxu1 %v2627_v21 }
 0xfeb   :  { %3694 = vmatpush3.bf16.msra.mxu1 %v3693_v31  ;;  %3665 = vmatprep.mubr.msk.f32.mxu1 %vm4170_vm2, %v5350_v3 }
 0xfec   :  { %3695 = vmatprep.subr.bf16.mxu1 %v4171_v50  ;;  %3630 = vmatprep.mubr.msk.f32.mxu0 %vm4170_vm2, %v5350_v3  ;;  %v3708_v3 = vpack.c.bf16 %v2741_v55, %v2740_v14 }
 0xfed   :  { %3670 = vmatpush3.bf16.msra.mxu0 %v3669_v17 }
 0xfee   :  { %3671 = vmatprep.subr.bf16.mxu0 %v4171_v50 }
 0xfef   :  { %3697 = vmatpush3.bf16.msra.mxu1 %v3696_v28 }
 0xff0   :  { %3698 = vmatprep.subr.bf16.mxu1 %v4171_v50 }
 0xff1   :  { %3673 = vmatpush3.bf16.msra.mxu0 %v3672_v22 }
 0xff2   :  { %3674 = vmatprep.subr.bf16.mxu0 %v4171_v50 }
 0xff3   :  { %3700 = vmatpush3.bf16.msra.mxu1 %v3699_v30 }
 0xff4   :  { %3701 = vmatprep.subr.bf16.mxu1 %v4171_v50 }
 0xff5   :  { %3676 = vmatpush3.bf16.msra.mxu0 %v3675_v42 }
 0xff6   :  { %3677 = vmatprep.subr.bf16.mxu0 %v4171_v50 }
 0xff7   :  { %3703 = vmatpush3.bf16.msra.mxu1 %v3702_v20 }
 0xff8   :  { %3704 = vmatprep.subr.bf16.mxu1 %v4171_v50 }
 0xff9   :  { %3679 = vmatpush3.bf16.msra.mxu0 %v3678_v58 }
 0xffa   :  { %3680 = vmatprep.subr.bf16.mxu0 %v4171_v50 }
 0xffb   :  { %3706 = vmatpush3.bf16.msra.mxu1 %v3705_v23 }
 0xffc   :  { %3707 = vmatprep.subr.bf16.mxu1 %v4171_v50 }
 0xffd   :  { %3682 = vmatpush3.bf16.msra.mxu0 %v3681_v60 }
 0xffe   :  { %3683 = vmatprep.subr.bf16.mxu0 %v4171_v50 }
 0xfff   :  { %3709 = vmatpush3.bf16.msra.mxu1 %v3708_v3 }
0x1000   :  { %3710 = vmatprep.subr.bf16.mxu1 %v4171_v50 }
0x1001   :  { %3685 = vmatpush3.bf16.msra.mxu0 %v3684_v5 }
0x1002   :  { %3686 = vmatprep.subr.bf16.mxu0 %v4171_v50 }
0x1003   :  { %3712 = vmatpush3.bf16.msra.mxu1 %v3711_v2 }
0x1004   :  { %3713 = vmatprep.subr.bf16.mxu1 %v4171_v50 }
0x1005   :  { %3688 = vmatpush3.bf16.msra.mxu0 %v3687_v46 }
0x1006   :  { %3689 = vmatprep.subr.bf16.mxu0 %v4171_v50 }
0x1007   :  { %3715 = vmatpush3.bf16.msra.mxu1 %v3714_v37 }
0x1009   :  { %3691 = vmatpush3.bf16.msra.mxu0 %v3690_v57 }
0x100a   :  { %3666 = vmatmul.mubr.f32.vlgmr.msra.gmra.mrb[80].mxu1 %v5368_v54 }
0x10bd   :  { %v2662_v51 = vpop.f32.mrb[92].mxu0  ;;  %v2703_v53 = vpop.f32.mrb[76].mxu1 }
0x10be   :  { %v2709_v4 = vadd.f32 %v2662_v51, %v1656_v1  ;;  %v2664_v33 = vpop.f32.mrb[93].mxu0  ;;  %v3596_v34 = vpop.f32.mrb[77].mxu1  ;;  %v2723_v56 = vadd.f32 %v4040_v44, %v2703_v53 }
0x10bf   :  { %v2710_v39 = vadd.f32 %v2664_v33, %v1658_v48  ;;  %v2666_v41 = vpop.f32.mrb[94].mxu0  ;;  %v2706_v31 = vpop.f32.mrb[78].mxu1 }
0x10c0   :  { %v3046_v21 = vmul.f32 -1.442695, %v2709_v4  ;;  %v2667_v27 = vpop.f32.mrb[95].mxu0  ;;  %v3597_v25 = vpop.f32.mrb[79].mxu1 }
0x10c1   :  { %v3047_v50 = vmul.f32 -1.442695, %v2710_v39 }
0x10c2   :  { %3982 = vpow2.f32 %v3046_v21 }
0x10c3   :  { %3984 = vpow2.f32 %v3047_v50 }
0x10cc   :  { %v3983_v28 = vpop.eup %3982 }
0x10cd   :  { %v2717_v36 = vadd.f32 1.0, %v3983_v28  ;;  %v3985_v16 = vpop.eup %3984 }
0x10ce   :  { %v2718_v61 = vadd.f32 1.0, %v3985_v16 }
0x10cf   :  { %3986 = vrcp.f32 %v2717_v36 }
0x10d9   :  { %v3987_v30 = vpop.eup %3986 }
0x10da   :  { %v2724_v20 = vmul.f32 %v3987_v30, %v2723_v56 }
0x10dc   :  { %v2725_v29 = vadd.f32 %v2724_v20, %v1722_v35 }
0x10dd   :  { %v2899_v23 = vpop.f32.mrb[80].mxu1 }
0x10de   :  { %3988 = vtanh.f32 %v2725_v29  ;;  %v3667_v14 = vpop.f32.mrb[81].mxu1 }
0x10df   :  { %3990 = vrcp.f32 %v2718_v61 }
0x10e8   :  { %v3989_v55 = vpop.eup %3988 }
0x10e9   :  { %v2727_v3 = vsub.f32 %v5277_v40, %v3989_v55  ;;  %v3991_v18 = vpop.eup %3990 }
0x10eb   :  { %v2728_v62 = vmul.f32 %v3991_v18, %v2727_v3 }
0x10ed   :  { %v2729_v2 = vadd.f32 %v3989_v55, %v2728_v62 }
0x10ef   :  { %3631 = vmatmul.mubr.f32.vlgmr.msra.gmra.mrb[96].mxu0 %v2729_v2 }
0x11c2   :  { %v2829_v49 = vpop.f32.mrb[96].mxu0 }
0x11c3   :  { %v2900_v26 = vadd.f32 %v2899_v23, %v2829_v49  ;;  %v3632_v37 = vpop.f32.mrb[97].mxu0 }
0x11c5   :  { %v2910_v54 = vadd.f32 %v3048_v8, %v2900_v26 }
0x11c7   :  { %2911 = vst [vmem:[#allocation12] sm:$0xff] %v2910_v54 }
0x11c8   :  { %4140 = shalt.err (!%p4137_p8)
}
0x11c9   :  { %s4141_s12 = scalar_lea.hbm %s5336_s11, 128 }
0x11ca   :  { %p4142_p9 = scmp.ne.s32.totalorder %s5336_s11, %s4141_s12  ;;  %p4145_p10 = scmp.lt.u32.totalorder %s4141_s12, %s5336_s11 }
0x11cc   :  { %p4147_p11 = pnand %p4145_p10, %p4142_p9 }
0x11ce   :  { %4150 = shalt.err (!%p4147_p11)
}
0x11cf   :  { %2921 = dma.vmem_to_hbm [thread:$0]  %s2919_s6, 128, %s5336_s11, [#allocation6]  }
0x11d0   :  { %4157 = dma.done.wait [#allocation6], 128  }
0x11d1   :  { %4158 = vsyncadd [#allocation6], 4294967168 }
0x11d2   :  { %2925 = vsyncpa [#allocation5], 1 }
0x11d3   :  { %2926 = vsyncpa [#allocation8], 1 }
0x11d4   :  { %2927 = vsyncpa [#allocation11], 1 }
0x11d5   :  { %2928 = vsyncpa [#allocation6], 1 }

</bundles_post_ra>
